<compile_context>
chip_gen: v6e
topology: v6e:2x2x1
jax: 0.10.0
libtpu: 0.0.40
codegen_flags: <defaults>
</compile_context>

<pallas_src>
import functools

import jax
import jax.numpy as jnp
import numpy as np
from jax import lax
from jax.experimental import pallas as pl
from jax.experimental.pallas import tpu as pltpu


def _round_up(x, m):
    return ((x + m - 1) // m) * m


def _dense_block_kernel(x_ref, mask_ref, alphas_ref, *refs, num_layers,
                        in_channels, growth, Wp, HpWp, ML):
    """Whole DilatedDenseBlock for one image (grid over batch).

    x_ref     : (C0, Hp*Wp)          spatially pre-padded input, flattened
    mask_ref  : (1, Hp*Wp)           1.0 on the HxW interior, 0.0 on pad ring
    alphas_ref: (num_layers,) SMEM   PReLU alphas
    per layer : w_dep (Cin, 9*Cr), b_dep (Cin, 1), w_pt (G, 9*Cr),
                b_pt (G, 1), gamma (G, 1), beta (G, 1)
    out_ref   : (C_total, Hp*Wp)     lane-dense padded feature slab
    scratch   : feat (C_total, FLAT), hbuf (Cin_max, FLAT), pbuf (9*Cr_max, Hp*Wp)

    The "live" padded image occupies lanes [ML, ML + Hp*Wp) of the FLAT axis;
    everything outside is a zero guard so shifted tap loads never go OOB.
    """
    n_per = 6
    layer_refs = refs[:num_layers * n_per]
    out_ref = refs[num_layers * n_per]
    feat_ref, h_ref, p_ref = refs[num_layers * n_per + 1:]

    # Zero guards / padding ring / patch buffer (uninitialized VMEM may be NaN).
    feat_ref[...] = jnp.zeros_like(feat_ref)
    h_ref[...] = jnp.zeros_like(h_ref)
    p_ref[...] = jnp.zeros_like(p_ref)

    mask = mask_ref[...]  # (1, HpWp)

    # Drop the (already zero-padded) input into the flat layout, lane-aligned.
    feat_ref[0:in_channels, ML:ML + HpWp] = x_ref[...].astype(jnp.float32)

    def im2col(src_ref, cin, cr, dil):
        # Gather the 9 dilated taps into the patch buffer -> (9*cr, HpWp).
        for t in range(9):
            ky, kx = divmod(t, 3)
            off = (ky - 1) * dil * Wp + (kx - 1) * dil
            p_ref[t * cr:t * cr + cin, :] = \
                src_ref[0:cin, ML + off:ML + off + HpWp]
        return p_ref[0:9 * cr, :]

    for i in range(num_layers):
        dil = 2 ** i
        cin = in_channels + i * growth
        cr = _round_up(cin, 8)
        wd_ref, bd_ref, wp_ref, bp_ref, g_ref, be_ref = \
            layer_refs[i * n_per:(i + 1) * n_per]

        # ---- conv_dep: one im2col matmul (Cin, 9*Cr) @ (9*Cr, HpWp) ----
        patches = im2col(feat_ref, cin, cr, dil)
        h = jnp.dot(wd_ref[...], patches, preferred_element_type=jnp.float32)
        h = (h + bd_ref[...]) * mask                  # re-zero the pad ring
        h_ref[0:cin, ML:ML + HpWp] = h

        # ---- conv_point: one im2col matmul (G, 9*Cr) @ (9*Cr, HpWp) ----
        patches = im2col(h_ref, cin, cr, dil)
        y = jnp.dot(wp_ref[...], patches, preferred_element_type=jnp.float32)
        y = y + bp_ref[...]

        # ---- LayerNorm over channels (sublane axis), eps=1e-5, then PReLU ----
        mu = jnp.mean(y, axis=0, keepdims=True)
        var = jnp.mean(jnp.square(y - mu), axis=0, keepdims=True)
        yn = (y - mu) * lax.rsqrt(var + 1e-5)
        yn = yn * g_ref[...] + be_ref[...]
        alpha = alphas_ref[i]
        yn = jnp.where(yn >= 0.0, yn, alpha * yn)

        # Dense concat: write this layer's growth slice at its channel offset.
        feat_ref[cin:cin + growth, ML:ML + HpWp] = yn * mask

    out_ref[...] = feat_ref[:, ML:ML + HpWp].astype(out_ref.dtype)


def _im2col_weight(w_hwio, cr):
    """HWIO (3,3,I,O) -> (O, 9*cr), zero-padding each tap's channel block."""
    kh, kw, ci, co = w_hwio.shape
    wt = jnp.transpose(w_hwio, (3, 0, 1, 2)).reshape(co, kh * kw, ci)
    wt = jnp.pad(wt, ((0, 0), (0, 0), (0, cr - ci)))
    return wt.reshape(co, kh * kw * cr).astype(jnp.float32)


def dilated_dense_block(x_nchw, layer_params):
    """DilatedDenseBlock.forward. Input/output NCHW (PyTorch convention)."""
    N, C0, H, W = x_nchw.shape
    num_layers = len(layer_params)
    growth = layer_params[0]["w_pt"].shape[-1]
    c_total = C0 + num_layers * growth
    cin_max = C0 + (num_layers - 1) * growth
    cr_max = _round_up(cin_max, 8)

    pm = 2 ** (num_layers - 1)           # max padding == max dilation
    Hp, Wp = H + 2 * pm, W + 2 * pm
    HpWp = Hp * Wp
    maxoff = pm * Wp + pm                # largest |tap offset| in flat layout
    ML = _round_up(maxoff, 128)          # lane-aligned left guard
    FLAT = _round_up(ML + HpWp + maxoff, 128)

    # One tiny pad of the raw input (activations are never padded in HBM again).
    xp = jnp.pad(x_nchw, ((0, 0), (0, 0), (pm, pm), (pm, pm)))
    xp = xp.reshape(N, C0, HpWp)

    # Interior mask (trace-time constant).
    m = np.zeros((Hp, Wp), np.float32)
    m[pm:pm + H, pm:pm + W] = 1.0
    mask = jnp.asarray(m.reshape(1, HpWp))

    alphas = jnp.concatenate(
        [p["alpha"].astype(jnp.float32).reshape(1) for p in layer_params])

    inputs = [xp, mask, alphas]
    in_specs = [
        pl.BlockSpec((None, C0, HpWp), lambda n: (n, 0, 0)),
        pl.BlockSpec((1, HpWp), lambda n: (0, 0)),
        pl.BlockSpec(memory_space=pltpu.MemorySpace.SMEM),
    ]
    for i, p in enumerate(layer_params):
        cin = C0 + i * growth
        cr = _round_up(cin, 8)
        layer_in = [
            _im2col_weight(p["w_dep"], cr),
            p["b_dep"].reshape(cin, 1).astype(jnp.float32),
            _im2col_weight(p["w_pt"], cr),
            p["b_pt"].reshape(growth, 1).astype(jnp.float32),
            p["gamma"].reshape(growth, 1).astype(jnp.float32),
            p["beta"].reshape(growth, 1).astype(jnp.float32),
        ]
        inputs += layer_in
        in_specs += [pl.BlockSpec(a.shape, lambda n: (0, 0)) for a in layer_in]

    kernel = functools.partial(
        _dense_block_kernel, num_layers=num_layers, in_channels=C0,
        growth=growth, Wp=Wp, HpWp=HpWp, ML=ML)

    out_flat = pl.pallas_call(
        kernel,
        out_shape=jax.ShapeDtypeStruct((N, c_total, HpWp), x_nchw.dtype),
        grid=(N,),
        in_specs=in_specs,
        out_specs=pl.BlockSpec((None, c_total, HpWp), lambda n: (n, 0, 0)),
        scratch_shapes=[
            pltpu.VMEM((c_total, FLAT), jnp.float32),      # dense concat buffer
            pltpu.VMEM((cin_max, FLAT), jnp.float32),      # conv_dep intermediate
            pltpu.VMEM((9 * cr_max, HpWp), jnp.float32),   # im2col patch buffer
        ],
        compiler_params=pltpu.CompilerParams(
            dimension_semantics=("parallel",),
            vmem_limit_bytes=32 * 1024 * 1024),
    )(*inputs)

    # Lane-dense padded slab -> NCHW interior (cheap wrapper-side layout fix).
    out = out_flat.reshape(N, c_total, Hp, Wp)[:, :, pm:pm + H, pm:pm + W]
    return out
    # TODO(synk): for N=1 on v7x, add a second parallel grid axis (spatial
    # row bands with halo handling) so both TensorCores stay busy.


def init_params(key, in_channels, growth_rate, num_layers, dtype=jnp.float32):
    params = []
    for i in range(num_layers):
        cin = in_channels + i * growth_rate
        key, k1, k2, k3, k4 = jax.random.split(key, 5)
        s = 1.0 / float(np.sqrt(cin * 9))
        params.append(dict(
            w_dep=jax.random.uniform(k1, (3, 3, cin, cin), dtype, -s, s),
            b_dep=jax.random.uniform(k2, (cin,), dtype, -s, s),
            w_pt=jax.random.uniform(k3, (3, 3, cin, growth_rate), dtype, -s, s),
            b_pt=jax.random.uniform(k4, (growth_rate,), dtype, -s, s),
            gamma=jnp.ones((growth_rate,), dtype),   # nn.LayerNorm default
            beta=jnp.zeros((growth_rate,), dtype),
            alpha=jnp.full((1,), 0.25, dtype),        # nn.PReLU default
        ))
    return params


# ---------------- pure-JAX reference (for correctness check) ----------------
def _ref_conv(x, w, b, dil):
    y = lax.conv_general_dilated(
        x, w, window_strides=(1, 1), padding=[(dil, dil), (dil, dil)],
        rhs_dilation=(dil, dil), dimension_numbers=("NHWC", "HWIO", "NHWC"))
    return y + b


def ref_dilated_dense_block(x_nchw, layer_params):
    out = jnp.transpose(x_nchw, (0, 2, 3, 1))
    for i, p in enumerate(layer_params):
        d = 2 ** i
        h = _ref_conv(out, p["w_dep"], p["b_dep"], d)
        y = _ref_conv(h, p["w_pt"], p["b_pt"], d)
        mean = jnp.mean(y, -1, keepdims=True)
        var = jnp.mean(jnp.square(y - mean), -1, keepdims=True)
        y = (y - mean) * lax.rsqrt(var + 1e-5) * p["gamma"] + p["beta"]
        y = jnp.where(y >= 0.0, y, p["alpha"][0] * y)
        out = jnp.concatenate([out, y], axis=-1)
    return jnp.transpose(out, (0, 3, 1, 2))


if __name__ == "__main__":
    in_channels, growth_rate, num_layers = 4, 4, 3
    key = jax.random.PRNGKey(0)
    kx, kp = jax.random.split(key)
    x = jax.random.normal(kx, (2, in_channels, 16, 16), jnp.float32)  # NCHW
    params = init_params(kp, in_channels, growth_rate, num_layers)

    fwd = jax.jit(dilated_dense_block)
    out = jax.block_until_ready(fwd(x, params))
    assert out.shape == (2, in_channels + num_layers * growth_rate, 16, 16)

    ref = ref_dilated_dense_block(x, params)
    np.testing.assert_allclose(np.asarray(out), np.asarray(ref),
                               rtol=2e-3, atol=2e-3)
    print("KERNEL_OK")
</pallas_src>

<mosaic_0001>
module attributes {stable_mosaic.version = 11 : i64} {
  func.func @_dense_block_kernel(%arg0: i32, %arg1: memref<1x4x576xf32, #tpu.memory_space<vmem>>, %arg2: memref<1x576xf32, #tpu.memory_space<vmem>>, %arg3: memref<3xf32, #tpu.memory_space<smem>>, %arg4: memref<4x72xf32, #tpu.memory_space<vmem>>, %arg5: memref<4x1xf32, #tpu.memory_space<vmem>>, %arg6: memref<4x72xf32, #tpu.memory_space<vmem>>, %arg7: memref<4x1xf32, #tpu.memory_space<vmem>>, %arg8: memref<4x1xf32, #tpu.memory_space<vmem>>, %arg9: memref<4x1xf32, #tpu.memory_space<vmem>>, %arg10: memref<8x72xf32, #tpu.memory_space<vmem>>, %arg11: memref<8x1xf32, #tpu.memory_space<vmem>>, %arg12: memref<4x72xf32, #tpu.memory_space<vmem>>, %arg13: memref<4x1xf32, #tpu.memory_space<vmem>>, %arg14: memref<4x1xf32, #tpu.memory_space<vmem>>, %arg15: memref<4x1xf32, #tpu.memory_space<vmem>>, %arg16: memref<12x144xf32, #tpu.memory_space<vmem>>, %arg17: memref<12x1xf32, #tpu.memory_space<vmem>>, %arg18: memref<4x144xf32, #tpu.memory_space<vmem>>, %arg19: memref<4x1xf32, #tpu.memory_space<vmem>>, %arg20: memref<4x1xf32, #tpu.memory_space<vmem>>, %arg21: memref<4x1xf32, #tpu.memory_space<vmem>>, %arg22: memref<1x16x576xf32, #tpu.memory_space<vmem>>, %arg23: memref<16x896xf32, #tpu.memory_space<vmem>>, %arg24: memref<12x896xf32, #tpu.memory_space<vmem>>, %arg25: memref<144x576xf32, #tpu.memory_space<vmem>>) attributes {dimension_semantics = [#tpu.dimension_semantics<parallel>], iteration_bounds = array<i64: 2>, scalar_prefetch = 0 : i64, scratch_operands = 3 : i64, tpu.core_type = #tpu.core_type<tc>, window_params = [{transform_indices = @transform_0, window_bounds = array<i64: 1, 4, 576>}, {pipeline_mode = #tpu.pipeline_mode<synchronous>, transform_indices = @transform_1, window_bounds = array<i64: 1, 576>}, {transform_indices = @transform_2, window_bounds = array<i64: 3>}, {pipeline_mode = #tpu.pipeline_mode<synchronous>, transform_indices = @transform_3, window_bounds = array<i64: 4, 72>}, {pipeline_mode = #tpu.pipeline_mode<synchronous>, transform_indices = @transform_4, window_bounds = array<i64: 4, 1>}, {pipeline_mode = #tpu.pipeline_mode<synchronous>, transform_indices = @transform_5, window_bounds = array<i64: 4, 72>}, {pipeline_mode = #tpu.pipeline_mode<synchronous>, transform_indices = @transform_6, window_bounds = array<i64: 4, 1>}, {pipeline_mode = #tpu.pipeline_mode<synchronous>, transform_indices = @transform_7, window_bounds = array<i64: 4, 1>}, {pipeline_mode = #tpu.pipeline_mode<synchronous>, transform_indices = @transform_8, window_bounds = array<i64: 4, 1>}, {pipeline_mode = #tpu.pipeline_mode<synchronous>, transform_indices = @transform_9, window_bounds = array<i64: 8, 72>}, {pipeline_mode = #tpu.pipeline_mode<synchronous>, transform_indices = @transform_10, window_bounds = array<i64: 8, 1>}, {pipeline_mode = #tpu.pipeline_mode<synchronous>, transform_indices = @transform_11, window_bounds = array<i64: 4, 72>}, {pipeline_mode = #tpu.pipeline_mode<synchronous>, transform_indices = @transform_12, window_bounds = array<i64: 4, 1>}, {pipeline_mode = #tpu.pipeline_mode<synchronous>, transform_indices = @transform_13, window_bounds = array<i64: 4, 1>}, {pipeline_mode = #tpu.pipeline_mode<synchronous>, transform_indices = @transform_14, window_bounds = array<i64: 4, 1>}, {pipeline_mode = #tpu.pipeline_mode<synchronous>, transform_indices = @transform_15, window_bounds = array<i64: 12, 144>}, {pipeline_mode = #tpu.pipeline_mode<synchronous>, transform_indices = @transform_16, window_bounds = array<i64: 12, 1>}, {pipeline_mode = #tpu.pipeline_mode<synchronous>, transform_indices = @transform_17, window_bounds = array<i64: 4, 144>}, {pipeline_mode = #tpu.pipeline_mode<synchronous>, transform_indices = @transform_18, window_bounds = array<i64: 4, 1>}, {pipeline_mode = #tpu.pipeline_mode<synchronous>, transform_indices = @transform_19, window_bounds = array<i64: 4, 1>}, {pipeline_mode = #tpu.pipeline_mode<synchronous>, transform_indices = @transform_20, window_bounds = array<i64: 4, 1>}, {transform_indices = @transform_21, window_bounds = array<i64: 1, 16, 576>}]} {
    %cst = arith.constant 0.000000e+00 : f32
    %0 = vector.broadcast %cst : f32 to vector<16x896xf32>
    %c0 = arith.constant 0 : index
    %c0_0 = arith.constant 0 : index
    %1 = vector.load %arg23[%c0, %c0_0] : memref<16x896xf32, #tpu.memory_space<vmem>>, vector<16x896xf32>
    tpu.vector_store %arg23[%c0, %c0_0], %0 {strides = array<i32>} : memref<16x896xf32, #tpu.memory_space<vmem>>, vector<16x896xf32>,
    %cst_1 = arith.constant 0.000000e+00 : f32
    %2 = vector.broadcast %cst_1 : f32 to vector<12x896xf32>
    %c0_2 = arith.constant 0 : index
    %c0_3 = arith.constant 0 : index
    %3 = vector.load %arg24[%c0_2, %c0_3] : memref<12x896xf32, #tpu.memory_space<vmem>>, vector<12x896xf32>
    tpu.vector_store %arg24[%c0_2, %c0_3], %2 {strides = array<i32>} : memref<12x896xf32, #tpu.memory_space<vmem>>, vector<12x896xf32>,
    %cst_4 = arith.constant 0.000000e+00 : f32
    %4 = vector.broadcast %cst_4 : f32 to vector<144x576xf32>
    %c0_5 = arith.constant 0 : index
    %c0_6 = arith.constant 0 : index
    %5 = vector.load %arg25[%c0_5, %c0_6] : memref<144x576xf32, #tpu.memory_space<vmem>>, vector<144x576xf32>
    tpu.vector_store %arg25[%c0_5, %c0_6], %4 {strides = array<i32>} : memref<144x576xf32, #tpu.memory_space<vmem>>, vector<144x576xf32>,
    %c0_7 = arith.constant 0 : index
    %c0_8 = arith.constant 0 : index
    %6 = vector.load %arg2[%c0_7, %c0_8] : memref<1x576xf32, #tpu.memory_space<vmem>>, vector<1x576xf32>
    %c0_9 = arith.constant 0 : index
    %c0_10 = arith.constant 0 : index
    %c0_11 = arith.constant 0 : index
    %7 = vector.load %arg1[%c0_9, %c0_10, %c0_11] : memref<1x4x576xf32, #tpu.memory_space<vmem>>, vector<1x4x576xf32>
    %8 = vector.shape_cast %7 : vector<1x4x576xf32> to vector<4x576xf32>
    %c0_12 = arith.constant 0 : index
    %c128 = arith.constant 128 : index
    %9 = vector.load %arg23[%c0_12, %c128] : memref<16x896xf32, #tpu.memory_space<vmem>>, vector<4x576xf32>
    tpu.vector_store %arg23[%c0_12, %c128], %8 {strides = array<i32>} : memref<16x896xf32, #tpu.memory_space<vmem>>, vector<4x576xf32>,
    %c0_13 = arith.constant 0 : index
    %c103 = arith.constant 103 : index
    %10 = vector.load %arg23[%c0_13, %c103] : memref<16x896xf32, #tpu.memory_space<vmem>>, vector<4x576xf32>
    %c0_14 = arith.constant 0 : index
    %c0_15 = arith.constant 0 : index
    %11 = vector.load %arg25[%c0_14, %c0_15] : memref<144x576xf32, #tpu.memory_space<vmem>>, vector<4x576xf32>
    tpu.vector_store %arg25[%c0_14, %c0_15], %10 {strides = array<i32>} : memref<144x576xf32, #tpu.memory_space<vmem>>, vector<4x576xf32>,
    %c0_16 = arith.constant 0 : index
    %c104 = arith.constant 104 : index
    %12 = vector.load %arg23[%c0_16, %c104] : memref<16x896xf32, #tpu.memory_space<vmem>>, vector<4x576xf32>
    %c8 = arith.constant 8 : index
    %c0_17 = arith.constant 0 : index
    %13 = vector.load %arg25[%c8, %c0_17] : memref<144x576xf32, #tpu.memory_space<vmem>>, vector<4x576xf32>
    tpu.vector_store %arg25[%c8, %c0_17], %12 {strides = array<i32>} : memref<144x576xf32, #tpu.memory_space<vmem>>, vector<4x576xf32>,
    %c0_18 = arith.constant 0 : index
    %c105 = arith.constant 105 : index
    %14 = vector.load %arg23[%c0_18, %c105] : memref<16x896xf32, #tpu.memory_space<vmem>>, vector<4x576xf32>
    %c16 = arith.constant 16 : index
    %c0_19 = arith.constant 0 : index
    %15 = vector.load %arg25[%c16, %c0_19] : memref<144x576xf32, #tpu.memory_space<vmem>>, vector<4x576xf32>
    tpu.vector_store %arg25[%c16, %c0_19], %14 {strides = array<i32>} : memref<144x576xf32, #tpu.memory_space<vmem>>, vector<4x576xf32>,
    %c0_20 = arith.constant 0 : index
    %c127 = arith.constant 127 : index
    %16 = vector.load %arg23[%c0_20, %c127] : memref<16x896xf32, #tpu.memory_space<vmem>>, vector<4x576xf32>
    %c24 = arith.constant 24 : index
    %c0_21 = arith.constant 0 : index
    %17 = vector.load %arg25[%c24, %c0_21] : memref<144x576xf32, #tpu.memory_space<vmem>>, vector<4x576xf32>
    tpu.vector_store %arg25[%c24, %c0_21], %16 {strides = array<i32>} : memref<144x576xf32, #tpu.memory_space<vmem>>, vector<4x576xf32>,
    %c0_22 = arith.constant 0 : index
    %c128_23 = arith.constant 128 : index
    %18 = vector.load %arg23[%c0_22, %c128_23] : memref<16x896xf32, #tpu.memory_space<vmem>>, vector<4x576xf32>
    %c32 = arith.constant 32 : index
    %c0_24 = arith.constant 0 : index
    %19 = vector.load %arg25[%c32, %c0_24] : memref<144x576xf32, #tpu.memory_space<vmem>>, vector<4x576xf32>
    tpu.vector_store %arg25[%c32, %c0_24], %18 {strides = array<i32>} : memref<144x576xf32, #tpu.memory_space<vmem>>, vector<4x576xf32>,
    %c0_25 = arith.constant 0 : index
    %c129 = arith.constant 129 : index
    %20 = vector.load %arg23[%c0_25, %c129] : memref<16x896xf32, #tpu.memory_space<vmem>>, vector<4x576xf32>
    %c40 = arith.constant 40 : index
    %c0_26 = arith.constant 0 : index
    %21 = vector.load %arg25[%c40, %c0_26] : memref<144x576xf32, #tpu.memory_space<vmem>>, vector<4x576xf32>
    tpu.vector_store %arg25[%c40, %c0_26], %20 {strides = array<i32>} : memref<144x576xf32, #tpu.memory_space<vmem>>, vector<4x576xf32>,
    %c0_27 = arith.constant 0 : index
    %c151 = arith.constant 151 : index
    %22 = vector.load %arg23[%c0_27, %c151] : memref<16x896xf32, #tpu.memory_space<vmem>>, vector<4x576xf32>
    %c48 = arith.constant 48 : index
    %c0_28 = arith.constant 0 : index
    %23 = vector.load %arg25[%c48, %c0_28] : memref<144x576xf32, #tpu.memory_space<vmem>>, vector<4x576xf32>
    tpu.vector_store %arg25[%c48, %c0_28], %22 {strides = array<i32>} : memref<144x576xf32, #tpu.memory_space<vmem>>, vector<4x576xf32>,
    %c0_29 = arith.constant 0 : index
    %c152 = arith.constant 152 : index
    %24 = vector.load %arg23[%c0_29, %c152] : memref<16x896xf32, #tpu.memory_space<vmem>>, vector<4x576xf32>
    %c56 = arith.constant 56 : index
    %c0_30 = arith.constant 0 : index
    %25 = vector.load %arg25[%c56, %c0_30] : memref<144x576xf32, #tpu.memory_space<vmem>>, vector<4x576xf32>
    tpu.vector_store %arg25[%c56, %c0_30], %24 {strides = array<i32>} : memref<144x576xf32, #tpu.memory_space<vmem>>, vector<4x576xf32>,
    %c0_31 = arith.constant 0 : index
    %c153 = arith.constant 153 : index
    %26 = vector.load %arg23[%c0_31, %c153] : memref<16x896xf32, #tpu.memory_space<vmem>>, vector<4x576xf32>
    %c64 = arith.constant 64 : index
    %c0_32 = arith.constant 0 : index
    %27 = vector.load %arg25[%c64, %c0_32] : memref<144x576xf32, #tpu.memory_space<vmem>>, vector<4x576xf32>
    tpu.vector_store %arg25[%c64, %c0_32], %26 {strides = array<i32>} : memref<144x576xf32, #tpu.memory_space<vmem>>, vector<4x576xf32>,
    %c0_33 = arith.constant 0 : index
    %c0_34 = arith.constant 0 : index
    %28 = vector.load %arg25[%c0_33, %c0_34] : memref<144x576xf32, #tpu.memory_space<vmem>>, vector<72x576xf32>
    %c0_35 = arith.constant 0 : index
    %c0_36 = arith.constant 0 : index
    %29 = vector.load %arg4[%c0_35, %c0_36] : memref<4x72xf32, #tpu.memory_space<vmem>>, vector<4x72xf32>
    %cst_37 = arith.constant dense<0.000000e+00> : vector<4x576xf32>
    %30 = tpu.matmul %29, %28, %cst_37 {dimension_numbers = #tpu.dot_dimension_numbers<[1], [0], [0], [1], [0, 0, 1, 1], [], []>} : vector<4x72xf32>, vector<72x576xf32>, vector<4x576xf32> -> vector<4x576xf32>
    %c0_38 = arith.constant 0 : index
    %c0_39 = arith.constant 0 : index
    %31 = vector.load %arg5[%c0_38, %c0_39] : memref<4x1xf32, #tpu.memory_space<vmem>>, vector<4x1xf32>
    %32 = vector.broadcast %31 : vector<4x1xf32> to vector<4x576xf32>
    %33 = arith.addf %30, %32 : vector<4x576xf32>
    %34 = vector.broadcast %6 : vector<1x576xf32> to vector<4x576xf32>
    %35 = arith.mulf %33, %34 : vector<4x576xf32>
    %c0_40 = arith.constant 0 : index
    %c128_41 = arith.constant 128 : index
    %36 = vector.load %arg24[%c0_40, %c128_41] : memref<12x896xf32, #tpu.memory_space<vmem>>, vector<4x576xf32>
    tpu.vector_store %arg24[%c0_40, %c128_41], %35 {strides = array<i32>} : memref<12x896xf32, #tpu.memory_space<vmem>>, vector<4x576xf32>,
    %c0_42 = arith.constant 0 : index
    %c103_43 = arith.constant 103 : index
    %37 = vector.load %arg24[%c0_42, %c103_43] : memref<12x896xf32, #tpu.memory_space<vmem>>, vector<4x576xf32>
    %c0_44 = arith.constant 0 : index
    %c0_45 = arith.constant 0 : index
    %38 = vector.load %arg25[%c0_44, %c0_45] : memref<144x576xf32, #tpu.memory_space<vmem>>, vector<4x576xf32>
    tpu.vector_store %arg25[%c0_44, %c0_45], %37 {strides = array<i32>} : memref<144x576xf32, #tpu.memory_space<vmem>>, vector<4x576xf32>,
    %c0_46 = arith.constant 0 : index
    %c104_47 = arith.constant 104 : index
    %39 = vector.load %arg24[%c0_46, %c104_47] : memref<12x896xf32, #tpu.memory_space<vmem>>, vector<4x576xf32>
    %c8_48 = arith.constant 8 : index
    %c0_49 = arith.constant 0 : index
    %40 = vector.load %arg25[%c8_48, %c0_49] : memref<144x576xf32, #tpu.memory_space<vmem>>, vector<4x576xf32>
    tpu.vector_store %arg25[%c8_48, %c0_49], %39 {strides = array<i32>} : memref<144x576xf32, #tpu.memory_space<vmem>>, vector<4x576xf32>,
    %c0_50 = arith.constant 0 : index
    %c105_51 = arith.constant 105 : index
    %41 = vector.load %arg24[%c0_50, %c105_51] : memref<12x896xf32, #tpu.memory_space<vmem>>, vector<4x576xf32>
    %c16_52 = arith.constant 16 : index
    %c0_53 = arith.constant 0 : index
    %42 = vector.load %arg25[%c16_52, %c0_53] : memref<144x576xf32, #tpu.memory_space<vmem>>, vector<4x576xf32>
    tpu.vector_store %arg25[%c16_52, %c0_53], %41 {strides = array<i32>} : memref<144x576xf32, #tpu.memory_space<vmem>>, vector<4x576xf32>,
    %c0_54 = arith.constant 0 : index
    %c127_55 = arith.constant 127 : index
    %43 = vector.load %arg24[%c0_54, %c127_55] : memref<12x896xf32, #tpu.memory_space<vmem>>, vector<4x576xf32>
    %c24_56 = arith.constant 24 : index
    %c0_57 = arith.constant 0 : index
    %44 = vector.load %arg25[%c24_56, %c0_57] : memref<144x576xf32, #tpu.memory_space<vmem>>, vector<4x576xf32>
    tpu.vector_store %arg25[%c24_56, %c0_57], %43 {strides = array<i32>} : memref<144x576xf32, #tpu.memory_space<vmem>>, vector<4x576xf32>,
    %c0_58 = arith.constant 0 : index
    %c128_59 = arith.constant 128 : index
    %45 = vector.load %arg24[%c0_58, %c128_59] : memref<12x896xf32, #tpu.memory_space<vmem>>, vector<4x576xf32>
    %c32_60 = arith.constant 32 : index
    %c0_61 = arith.constant 0 : index
    %46 = vector.load %arg25[%c32_60, %c0_61] : memref<144x576xf32, #tpu.memory_space<vmem>>, vector<4x576xf32>
    tpu.vector_store %arg25[%c32_60, %c0_61], %45 {strides = array<i32>} : memref<144x576xf32, #tpu.memory_space<vmem>>, vector<4x576xf32>,
    %c0_62 = arith.constant 0 : index
    %c129_63 = arith.constant 129 : index
    %47 = vector.load %arg24[%c0_62, %c129_63] : memref<12x896xf32, #tpu.memory_space<vmem>>, vector<4x576xf32>
    %c40_64 = arith.constant 40 : index
    %c0_65 = arith.constant 0 : index
    %48 = vector.load %arg25[%c40_64, %c0_65] : memref<144x576xf32, #tpu.memory_space<vmem>>, vector<4x576xf32>
    tpu.vector_store %arg25[%c40_64, %c0_65], %47 {strides = array<i32>} : memref<144x576xf32, #tpu.memory_space<vmem>>, vector<4x576xf32>,
    %c0_66 = arith.constant 0 : index
    %c151_67 = arith.constant 151 : index
    %49 = vector.load %arg24[%c0_66, %c151_67] : memref<12x896xf32, #tpu.memory_space<vmem>>, vector<4x576xf32>
    %c48_68 = arith.constant 48 : index
    %c0_69 = arith.constant 0 : index
    %50 = vector.load %arg25[%c48_68, %c0_69] : memref<144x576xf32, #tpu.memory_space<vmem>>, vector<4x576xf32>
    tpu.vector_store %arg25[%c48_68, %c0_69], %49 {strides = array<i32>} : memref<144x576xf32, #tpu.memory_space<vmem>>, vector<4x576xf32>,
    %c0_70 = arith.constant 0 : index
    %c152_71 = arith.constant 152 : index
    %51 = vector.load %arg24[%c0_70, %c152_71] : memref<12x896xf32, #tpu.memory_space<vmem>>, vector<4x576xf32>
    %c56_72 = arith.constant 56 : index
    %c0_73 = arith.constant 0 : index
    %52 = vector.load %arg25[%c56_72, %c0_73] : memref<144x576xf32, #tpu.memory_space<vmem>>, vector<4x576xf32>
    tpu.vector_store %arg25[%c56_72, %c0_73], %51 {strides = array<i32>} : memref<144x576xf32, #tpu.memory_space<vmem>>, vector<4x576xf32>,
    %c0_74 = arith.constant 0 : index
    %c153_75 = arith.constant 153 : index
    %53 = vector.load %arg24[%c0_74, %c153_75] : memref<12x896xf32, #tpu.memory_space<vmem>>, vector<4x576xf32>
    %c64_76 = arith.constant 64 : index
    %c0_77 = arith.constant 0 : index
    %54 = vector.load %arg25[%c64_76, %c0_77] : memref<144x576xf32, #tpu.memory_space<vmem>>, vector<4x576xf32>
    tpu.vector_store %arg25[%c64_76, %c0_77], %53 {strides = array<i32>} : memref<144x576xf32, #tpu.memory_space<vmem>>, vector<4x576xf32>,
    %c0_78 = arith.constant 0 : index
    %c0_79 = arith.constant 0 : index
    %55 = vector.load %arg25[%c0_78, %c0_79] : memref<144x576xf32, #tpu.memory_space<vmem>>, vector<72x576xf32>
    %c0_80 = arith.constant 0 : index
    %c0_81 = arith.constant 0 : index
    %56 = vector.load %arg6[%c0_80, %c0_81] : memref<4x72xf32, #tpu.memory_space<vmem>>, vector<4x72xf32>
    %cst_82 = arith.constant dense<0.000000e+00> : vector<4x576xf32>
    %57 = tpu.matmul %56, %55, %cst_82 {dimension_numbers = #tpu.dot_dimension_numbers<[1], [0], [0], [1], [0, 0, 1, 1], [], []>} : vector<4x72xf32>, vector<72x576xf32>, vector<4x576xf32> -> vector<4x576xf32>
    %c0_83 = arith.constant 0 : index
    %c0_84 = arith.constant 0 : index
    %58 = vector.load %arg7[%c0_83, %c0_84] : memref<4x1xf32, #tpu.memory_space<vmem>>, vector<4x1xf32>
    %59 = vector.broadcast %58 : vector<4x1xf32> to vector<4x576xf32>
    %60 = arith.addf %57, %59 : vector<4x576xf32>
    %cst_85 = arith.constant dense<0.000000e+00> : vector<576xf32>
    %61 = vector.multi_reduction <add>, %60, %cst_85 [0] : vector<4x576xf32> to vector<576xf32>
    %62 = vector.shape_cast %61 : vector<576xf32> to vector<1x576xf32>
    %cst_86 = arith.constant 4.000000e+00 : f32
    %63 = vector.broadcast %cst_86 : f32 to vector<1x576xf32>
    %64 = arith.divf %62, %63 : vector<1x576xf32>
    %65 = vector.broadcast %64 : vector<1x576xf32> to vector<4x576xf32>
    %66 = arith.subf %60, %65 : vector<4x576xf32>
    %67 = arith.mulf %66, %66 : vector<4x576xf32>
    %cst_87 = arith.constant dense<0.000000e+00> : vector<576xf32>
    %68 = vector.multi_reduction <add>, %67, %cst_87 [0] : vector<4x576xf32> to vector<576xf32>
    %69 = vector.shape_cast %68 : vector<576xf32> to vector<1x576xf32>
    %cst_88 = arith.constant 4.000000e+00 : f32
    %70 = vector.broadcast %cst_88 : f32 to vector<1x576xf32>
    %71 = arith.divf %69, %70 : vector<1x576xf32>
    %72 = vector.broadcast %64 : vector<1x576xf32> to vector<4x576xf32>
    %73 = arith.subf %60, %72 : vector<4x576xf32>
    %cst_89 = arith.constant 9.99999974E-6 : f32
    %74 = vector.broadcast %cst_89 : f32 to vector<1x576xf32>
    %75 = arith.addf %71, %74 : vector<1x576xf32>
    %76 = math.rsqrt %75 : vector<1x576xf32>
    %77 = vector.broadcast %76 : vector<1x576xf32> to vector<4x576xf32>
    %78 = arith.mulf %73, %77 : vector<4x576xf32>
    %c0_90 = arith.constant 0 : index
    %c0_91 = arith.constant 0 : index
    %79 = vector.load %arg8[%c0_90, %c0_91] : memref<4x1xf32, #tpu.memory_space<vmem>>, vector<4x1xf32>
    %80 = vector.broadcast %79 : vector<4x1xf32> to vector<4x576xf32>
    %81 = arith.mulf %78, %80 : vector<4x576xf32>
    %c0_92 = arith.constant 0 : index
    %c0_93 = arith.constant 0 : index
    %82 = vector.load %arg9[%c0_92, %c0_93] : memref<4x1xf32, #tpu.memory_space<vmem>>, vector<4x1xf32>
    %83 = vector.broadcast %82 : vector<4x1xf32> to vector<4x576xf32>
    %84 = arith.addf %81, %83 : vector<4x576xf32>
    %c0_94 = arith.constant 0 : index
    %85 = memref.load %arg3[%c0_94] : memref<3xf32, #tpu.memory_space<smem>>
    %cst_95 = arith.constant 0.000000e+00 : f32
    %86 = vector.broadcast %cst_95 : f32 to vector<4x576xf32>
    %87 = arith.cmpf oge, %84, %86 : vector<4x576xf32>
    %88 = vector.broadcast %85 : f32 to vector<4x576xf32>
    %89 = arith.mulf %88, %84 : vector<4x576xf32>
    %90 = arith.select %87, %84, %89 : vector<4x576xi1>, vector<4x576xf32>
    %91 = vector.broadcast %6 : vector<1x576xf32> to vector<4x576xf32>
    %92 = arith.mulf %90, %91 : vector<4x576xf32>
    %c4 = arith.constant 4 : index
    %c128_96 = arith.constant 128 : index
    %93 = vector.load %arg23[%c4, %c128_96] : memref<16x896xf32, #tpu.memory_space<vmem>>, vector<4x576xf32>
    tpu.vector_store %arg23[%c4, %c128_96], %92 {strides = array<i32>} : memref<16x896xf32, #tpu.memory_space<vmem>>, vector<4x576xf32>,
    %c0_97 = arith.constant 0 : index
    %c78 = arith.constant 78 : index
    %94 = vector.load %arg23[%c0_97, %c78] : memref<16x896xf32, #tpu.memory_space<vmem>>, vector<8x576xf32>
    %c0_98 = arith.constant 0 : index
    %c0_99 = arith.constant 0 : index
    %95 = vector.load %arg25[%c0_98, %c0_99] : memref<144x576xf32, #tpu.memory_space<vmem>>, vector<8x576xf32>
    tpu.vector_store %arg25[%c0_98, %c0_99], %94 {strides = array<i32>} : memref<144x576xf32, #tpu.memory_space<vmem>>, vector<8x576xf32>,
    %c0_100 = arith.constant 0 : index
    %c80 = arith.constant 80 : index
    %96 = vector.load %arg23[%c0_100, %c80] : memref<16x896xf32, #tpu.memory_space<vmem>>, vector<8x576xf32>
    %c8_101 = arith.constant 8 : index
    %c0_102 = arith.constant 0 : index
    %97 = vector.load %arg25[%c8_101, %c0_102] : memref<144x576xf32, #tpu.memory_space<vmem>>, vector<8x576xf32>
    tpu.vector_store %arg25[%c8_101, %c0_102], %96 {strides = array<i32>} : memref<144x576xf32, #tpu.memory_space<vmem>>, vector<8x576xf32>,
    %c0_103 = arith.constant 0 : index
    %c82 = arith.constant 82 : index
    %98 = vector.load %arg23[%c0_103, %c82] : memref<16x896xf32, #tpu.memory_space<vmem>>, vector<8x576xf32>
    %c16_104 = arith.constant 16 : index
    %c0_105 = arith.constant 0 : index
    %99 = vector.load %arg25[%c16_104, %c0_105] : memref<144x576xf32, #tpu.memory_space<vmem>>, vector<8x576xf32>
    tpu.vector_store %arg25[%c16_104, %c0_105], %98 {strides = array<i32>} : memref<144x576xf32, #tpu.memory_space<vmem>>, vector<8x576xf32>,
    %c0_106 = arith.constant 0 : index
    %c126 = arith.constant 126 : index
    %100 = vector.load %arg23[%c0_106, %c126] : memref<16x896xf32, #tpu.memory_space<vmem>>, vector<8x576xf32>
    %c24_107 = arith.constant 24 : index
    %c0_108 = arith.constant 0 : index
    %101 = vector.load %arg25[%c24_107, %c0_108] : memref<144x576xf32, #tpu.memory_space<vmem>>, vector<8x576xf32>
    tpu.vector_store %arg25[%c24_107, %c0_108], %100 {strides = array<i32>} : memref<144x576xf32, #tpu.memory_space<vmem>>, vector<8x576xf32>,
    %c0_109 = arith.constant 0 : index
    %c128_110 = arith.constant 128 : index
    %102 = vector.load %arg23[%c0_109, %c128_110] : memref<16x896xf32, #tpu.memory_space<vmem>>, vector<8x576xf32>
    %c32_111 = arith.constant 32 : index
    %c0_112 = arith.constant 0 : index
    %103 = vector.load %arg25[%c32_111, %c0_112] : memref<144x576xf32, #tpu.memory_space<vmem>>, vector<8x576xf32>
    tpu.vector_store %arg25[%c32_111, %c0_112], %102 {strides = array<i32>} : memref<144x576xf32, #tpu.memory_space<vmem>>, vector<8x576xf32>,
    %c0_113 = arith.constant 0 : index
    %c130 = arith.constant 130 : index
    %104 = vector.load %arg23[%c0_113, %c130] : memref<16x896xf32, #tpu.memory_space<vmem>>, vector<8x576xf32>
    %c40_114 = arith.constant 40 : index
    %c0_115 = arith.constant 0 : index
    %105 = vector.load %arg25[%c40_114, %c0_115] : memref<144x576xf32, #tpu.memory_space<vmem>>, vector<8x576xf32>
    tpu.vector_store %arg25[%c40_114, %c0_115], %104 {strides = array<i32>} : memref<144x576xf32, #tpu.memory_space<vmem>>, vector<8x576xf32>,
    %c0_116 = arith.constant 0 : index
    %c174 = arith.constant 174 : index
    %106 = vector.load %arg23[%c0_116, %c174] : memref<16x896xf32, #tpu.memory_space<vmem>>, vector<8x576xf32>
    %c48_117 = arith.constant 48 : index
    %c0_118 = arith.constant 0 : index
    %107 = vector.load %arg25[%c48_117, %c0_118] : memref<144x576xf32, #tpu.memory_space<vmem>>, vector<8x576xf32>
    tpu.vector_store %arg25[%c48_117, %c0_118], %106 {strides = array<i32>} : memref<144x576xf32, #tpu.memory_space<vmem>>, vector<8x576xf32>,
    %c0_119 = arith.constant 0 : index
    %c176 = arith.constant 176 : index
    %108 = vector.load %arg23[%c0_119, %c176] : memref<16x896xf32, #tpu.memory_space<vmem>>, vector<8x576xf32>
    %c56_120 = arith.constant 56 : index
    %c0_121 = arith.constant 0 : index
    %109 = vector.load %arg25[%c56_120, %c0_121] : memref<144x576xf32, #tpu.memory_space<vmem>>, vector<8x576xf32>
    tpu.vector_store %arg25[%c56_120, %c0_121], %108 {strides = array<i32>} : memref<144x576xf32, #tpu.memory_space<vmem>>, vector<8x576xf32>,
    %c0_122 = arith.constant 0 : index
    %c178 = arith.constant 178 : index
    %110 = vector.load %arg23[%c0_122, %c178] : memref<16x896xf32, #tpu.memory_space<vmem>>, vector<8x576xf32>
    %c64_123 = arith.constant 64 : index
    %c0_124 = arith.constant 0 : index
    %111 = vector.load %arg25[%c64_123, %c0_124] : memref<144x576xf32, #tpu.memory_space<vmem>>, vector<8x576xf32>
    tpu.vector_store %arg25[%c64_123, %c0_124], %110 {strides = array<i32>} : memref<144x576xf32, #tpu.memory_space<vmem>>, vector<8x576xf32>,
    %c0_125 = arith.constant 0 : index
    %c0_126 = arith.constant 0 : index
    %112 = vector.load %arg25[%c0_125, %c0_126] : memref<144x576xf32, #tpu.memory_space<vmem>>, vector<72x576xf32>
    %c0_127 = arith.constant 0 : index
    %c0_128 = arith.constant 0 : index
    %113 = vector.load %arg10[%c0_127, %c0_128] : memref<8x72xf32, #tpu.memory_space<vmem>>, vector<8x72xf32>
    %cst_129 = arith.constant dense<0.000000e+00> : vector<8x576xf32>
    %114 = tpu.matmul %113, %112, %cst_129 {dimension_numbers = #tpu.dot_dimension_numbers<[1], [0], [0], [1], [0, 0, 1, 1], [], []>} : vector<8x72xf32>, vector<72x576xf32>, vector<8x576xf32> -> vector<8x576xf32>
    %c0_130 = arith.constant 0 : index
    %c0_131 = arith.constant 0 : index
    %115 = vector.load %arg11[%c0_130, %c0_131] : memref<8x1xf32, #tpu.memory_space<vmem>>, vector<8x1xf32>
    %116 = vector.broadcast %115 : vector<8x1xf32> to vector<8x576xf32>
    %117 = arith.addf %114, %116 : vector<8x576xf32>
    %118 = vector.broadcast %6 : vector<1x576xf32> to vector<8x576xf32>
    %119 = arith.mulf %117, %118 : vector<8x576xf32>
    %c0_132 = arith.constant 0 : index
    %c128_133 = arith.constant 128 : index
    %120 = vector.load %arg24[%c0_132, %c128_133] : memref<12x896xf32, #tpu.memory_space<vmem>>, vector<8x576xf32>
    tpu.vector_store %arg24[%c0_132, %c128_133], %119 {strides = array<i32>} : memref<12x896xf32, #tpu.memory_space<vmem>>, vector<8x576xf32>,
    %c0_134 = arith.constant 0 : index
    %c78_135 = arith.constant 78 : index
    %121 = vector.load %arg24[%c0_134, %c78_135] : memref<12x896xf32, #tpu.memory_space<vmem>>, vector<8x576xf32>
    %c0_136 = arith.constant 0 : index
    %c0_137 = arith.constant 0 : index
    %122 = vector.load %arg25[%c0_136, %c0_137] : memref<144x576xf32, #tpu.memory_space<vmem>>, vector<8x576xf32>
    tpu.vector_store %arg25[%c0_136, %c0_137], %121 {strides = array<i32>} : memref<144x576xf32, #tpu.memory_space<vmem>>, vector<8x576xf32>,
    %c0_138 = arith.constant 0 : index
    %c80_139 = arith.constant 80 : index
    %123 = vector.load %arg24[%c0_138, %c80_139] : memref<12x896xf32, #tpu.memory_space<vmem>>, vector<8x576xf32>
    %c8_140 = arith.constant 8 : index
    %c0_141 = arith.constant 0 : index
    %124 = vector.load %arg25[%c8_140, %c0_141] : memref<144x576xf32, #tpu.memory_space<vmem>>, vector<8x576xf32>
    tpu.vector_store %arg25[%c8_140, %c0_141], %123 {strides = array<i32>} : memref<144x576xf32, #tpu.memory_space<vmem>>, vector<8x576xf32>,
    %c0_142 = arith.constant 0 : index
    %c82_143 = arith.constant 82 : index
    %125 = vector.load %arg24[%c0_142, %c82_143] : memref<12x896xf32, #tpu.memory_space<vmem>>, vector<8x576xf32>
    %c16_144 = arith.constant 16 : index
    %c0_145 = arith.constant 0 : index
    %126 = vector.load %arg25[%c16_144, %c0_145] : memref<144x576xf32, #tpu.memory_space<vmem>>, vector<8x576xf32>
    tpu.vector_store %arg25[%c16_144, %c0_145], %125 {strides = array<i32>} : memref<144x576xf32, #tpu.memory_space<vmem>>, vector<8x576xf32>,
    %c0_146 = arith.constant 0 : index
    %c126_147 = arith.constant 126 : index
    %127 = vector.load %arg24[%c0_146, %c126_147] : memref<12x896xf32, #tpu.memory_space<vmem>>, vector<8x576xf32>
    %c24_148 = arith.constant 24 : index
    %c0_149 = arith.constant 0 : index
    %128 = vector.load %arg25[%c24_148, %c0_149] : memref<144x576xf32, #tpu.memory_space<vmem>>, vector<8x576xf32>
    tpu.vector_store %arg25[%c24_148, %c0_149], %127 {strides = array<i32>} : memref<144x576xf32, #tpu.memory_space<vmem>>, vector<8x576xf32>,
    %c0_150 = arith.constant 0 : index
    %c128_151 = arith.constant 128 : index
    %129 = vector.load %arg24[%c0_150, %c128_151] : memref<12x896xf32, #tpu.memory_space<vmem>>, vector<8x576xf32>
    %c32_152 = arith.constant 32 : index
    %c0_153 = arith.constant 0 : index
    %130 = vector.load %arg25[%c32_152, %c0_153] : memref<144x576xf32, #tpu.memory_space<vmem>>, vector<8x576xf32>
    tpu.vector_store %arg25[%c32_152, %c0_153], %129 {strides = array<i32>} : memref<144x576xf32, #tpu.memory_space<vmem>>, vector<8x576xf32>,
    %c0_154 = arith.constant 0 : index
    %c130_155 = arith.constant 130 : index
    %131 = vector.load %arg24[%c0_154, %c130_155] : memref<12x896xf32, #tpu.memory_space<vmem>>, vector<8x576xf32>
    %c40_156 = arith.constant 40 : index
    %c0_157 = arith.constant 0 : index
    %132 = vector.load %arg25[%c40_156, %c0_157] : memref<144x576xf32, #tpu.memory_space<vmem>>, vector<8x576xf32>
    tpu.vector_store %arg25[%c40_156, %c0_157], %131 {strides = array<i32>} : memref<144x576xf32, #tpu.memory_space<vmem>>, vector<8x576xf32>,
    %c0_158 = arith.constant 0 : index
    %c174_159 = arith.constant 174 : index
    %133 = vector.load %arg24[%c0_158, %c174_159] : memref<12x896xf32, #tpu.memory_space<vmem>>, vector<8x576xf32>
    %c48_160 = arith.constant 48 : index
    %c0_161 = arith.constant 0 : index
    %134 = vector.load %arg25[%c48_160, %c0_161] : memref<144x576xf32, #tpu.memory_space<vmem>>, vector<8x576xf32>
    tpu.vector_store %arg25[%c48_160, %c0_161], %133 {strides = array<i32>} : memref<144x576xf32, #tpu.memory_space<vmem>>, vector<8x576xf32>,
    %c0_162 = arith.constant 0 : index
    %c176_163 = arith.constant 176 : index
    %135 = vector.load %arg24[%c0_162, %c176_163] : memref<12x896xf32, #tpu.memory_space<vmem>>, vector<8x576xf32>
    %c56_164 = arith.constant 56 : index
    %c0_165 = arith.constant 0 : index
    %136 = vector.load %arg25[%c56_164, %c0_165] : memref<144x576xf32, #tpu.memory_space<vmem>>, vector<8x576xf32>
    tpu.vector_store %arg25[%c56_164, %c0_165], %135 {strides = array<i32>} : memref<144x576xf32, #tpu.memory_space<vmem>>, vector<8x576xf32>,
    %c0_166 = arith.constant 0 : index
    %c178_167 = arith.constant 178 : index
    %137 = vector.load %arg24[%c0_166, %c178_167] : memref<12x896xf32, #tpu.memory_space<vmem>>, vector<8x576xf32>
    %c64_168 = arith.constant 64 : index
    %c0_169 = arith.constant 0 : index
    %138 = vector.load %arg25[%c64_168, %c0_169] : memref<144x576xf32, #tpu.memory_space<vmem>>, vector<8x576xf32>
    tpu.vector_store %arg25[%c64_168, %c0_169], %137 {strides = array<i32>} : memref<144x576xf32, #tpu.memory_space<vmem>>, vector<8x576xf32>,
    %c0_170 = arith.constant 0 : index
    %c0_171 = arith.constant 0 : index
    %139 = vector.load %arg25[%c0_170, %c0_171] : memref<144x576xf32, #tpu.memory_space<vmem>>, vector<72x576xf32>
    %c0_172 = arith.constant 0 : index
    %c0_173 = arith.constant 0 : index
    %140 = vector.load %arg12[%c0_172, %c0_173] : memref<4x72xf32, #tpu.memory_space<vmem>>, vector<4x72xf32>
    %cst_174 = arith.constant dense<0.000000e+00> : vector<4x576xf32>
    %141 = tpu.matmul %140, %139, %cst_174 {dimension_numbers = #tpu.dot_dimension_numbers<[1], [0], [0], [1], [0, 0, 1, 1], [], []>} : vector<4x72xf32>, vector<72x576xf32>, vector<4x576xf32> -> vector<4x576xf32>
    %c0_175 = arith.constant 0 : index
    %c0_176 = arith.constant 0 : index
    %142 = vector.load %arg13[%c0_175, %c0_176] : memref<4x1xf32, #tpu.memory_space<vmem>>, vector<4x1xf32>
    %143 = vector.broadcast %142 : vector<4x1xf32> to vector<4x576xf32>
    %144 = arith.addf %141, %143 : vector<4x576xf32>
    %cst_177 = arith.constant dense<0.000000e+00> : vector<576xf32>
    %145 = vector.multi_reduction <add>, %144, %cst_177 [0] : vector<4x576xf32> to vector<576xf32>
    %146 = vector.shape_cast %145 : vector<576xf32> to vector<1x576xf32>
    %cst_178 = arith.constant 4.000000e+00 : f32
    %147 = vector.broadcast %cst_178 : f32 to vector<1x576xf32>
    %148 = arith.divf %146, %147 : vector<1x576xf32>
    %149 = vector.broadcast %148 : vector<1x576xf32> to vector<4x576xf32>
    %150 = arith.subf %144, %149 : vector<4x576xf32>
    %151 = arith.mulf %150, %150 : vector<4x576xf32>
    %cst_179 = arith.constant dense<0.000000e+00> : vector<576xf32>
    %152 = vector.multi_reduction <add>, %151, %cst_179 [0] : vector<4x576xf32> to vector<576xf32>
    %153 = vector.shape_cast %152 : vector<576xf32> to vector<1x576xf32>
    %cst_180 = arith.constant 4.000000e+00 : f32
    %154 = vector.broadcast %cst_180 : f32 to vector<1x576xf32>
    %155 = arith.divf %153, %154 : vector<1x576xf32>
    %156 = vector.broadcast %148 : vector<1x576xf32> to vector<4x576xf32>
    %157 = arith.subf %144, %156 : vector<4x576xf32>
    %cst_181 = arith.constant 9.99999974E-6 : f32
    %158 = vector.broadcast %cst_181 : f32 to vector<1x576xf32>
    %159 = arith.addf %155, %158 : vector<1x576xf32>
    %160 = math.rsqrt %159 : vector<1x576xf32>
    %161 = vector.broadcast %160 : vector<1x576xf32> to vector<4x576xf32>
    %162 = arith.mulf %157, %161 : vector<4x576xf32>
    %c0_182 = arith.constant 0 : index
    %c0_183 = arith.constant 0 : index
    %163 = vector.load %arg14[%c0_182, %c0_183] : memref<4x1xf32, #tpu.memory_space<vmem>>, vector<4x1xf32>
    %164 = vector.broadcast %163 : vector<4x1xf32> to vector<4x576xf32>
    %165 = arith.mulf %162, %164 : vector<4x576xf32>
    %c0_184 = arith.constant 0 : index
    %c0_185 = arith.constant 0 : index
    %166 = vector.load %arg15[%c0_184, %c0_185] : memref<4x1xf32, #tpu.memory_space<vmem>>, vector<4x1xf32>
    %167 = vector.broadcast %166 : vector<4x1xf32> to vector<4x576xf32>
    %168 = arith.addf %165, %167 : vector<4x576xf32>
    %c1 = arith.constant 1 : index
    %169 = memref.load %arg3[%c1] : memref<3xf32, #tpu.memory_space<smem>>
    %cst_186 = arith.constant 0.000000e+00 : f32
    %170 = vector.broadcast %cst_186 : f32 to vector<4x576xf32>
    %171 = arith.cmpf oge, %168, %170 : vector<4x576xf32>
    %172 = vector.broadcast %169 : f32 to vector<4x576xf32>
    %173 = arith.mulf %172, %168 : vector<4x576xf32>
    %174 = arith.select %171, %168, %173 : vector<4x576xi1>, vector<4x576xf32>
    %175 = vector.broadcast %6 : vector<1x576xf32> to vector<4x576xf32>
    %176 = arith.mulf %174, %175 : vector<4x576xf32>
    %c8_187 = arith.constant 8 : index
    %c128_188 = arith.constant 128 : index
    %177 = vector.load %arg23[%c8_187, %c128_188] : memref<16x896xf32, #tpu.memory_space<vmem>>, vector<4x576xf32>
    tpu.vector_store %arg23[%c8_187, %c128_188], %176 {strides = array<i32>} : memref<16x896xf32, #tpu.memory_space<vmem>>, vector<4x576xf32>,
    %c0_189 = arith.constant 0 : index
    %c28 = arith.constant 28 : index
    %178 = vector.load %arg23[%c0_189, %c28] : memref<16x896xf32, #tpu.memory_space<vmem>>, vector<12x576xf32>
    %c0_190 = arith.constant 0 : index
    %c0_191 = arith.constant 0 : index
    %179 = vector.load %arg25[%c0_190, %c0_191] : memref<144x576xf32, #tpu.memory_space<vmem>>, vector<12x576xf32>
    tpu.vector_store %arg25[%c0_190, %c0_191], %178 {strides = array<i32>} : memref<144x576xf32, #tpu.memory_space<vmem>>, vector<12x576xf32>,
    %c0_192 = arith.constant 0 : index
    %c32_193 = arith.constant 32 : index
    %180 = vector.load %arg23[%c0_192, %c32_193] : memref<16x896xf32, #tpu.memory_space<vmem>>, vector<12x576xf32>
    %c16_194 = arith.constant 16 : index
    %c0_195 = arith.constant 0 : index
    %181 = vector.load %arg25[%c16_194, %c0_195] : memref<144x576xf32, #tpu.memory_space<vmem>>, vector<12x576xf32>
    tpu.vector_store %arg25[%c16_194, %c0_195], %180 {strides = array<i32>} : memref<144x576xf32, #tpu.memory_space<vmem>>, vector<12x576xf32>,
    %c0_196 = arith.constant 0 : index
    %c36 = arith.constant 36 : index
    %182 = vector.load %arg23[%c0_196, %c36] : memref<16x896xf32, #tpu.memory_space<vmem>>, vector<12x576xf32>
    %c32_197 = arith.constant 32 : index
    %c0_198 = arith.constant 0 : index
    %183 = vector.load %arg25[%c32_197, %c0_198] : memref<144x576xf32, #tpu.memory_space<vmem>>, vector<12x576xf32>
    tpu.vector_store %arg25[%c32_197, %c0_198], %182 {strides = array<i32>} : memref<144x576xf32, #tpu.memory_space<vmem>>, vector<12x576xf32>,
    %c0_199 = arith.constant 0 : index
    %c124 = arith.constant 124 : index
    %184 = vector.load %arg23[%c0_199, %c124] : memref<16x896xf32, #tpu.memory_space<vmem>>, vector<12x576xf32>
    %c48_200 = arith.constant 48 : index
    %c0_201 = arith.constant 0 : index
    %185 = vector.load %arg25[%c48_200, %c0_201] : memref<144x576xf32, #tpu.memory_space<vmem>>, vector<12x576xf32>
    tpu.vector_store %arg25[%c48_200, %c0_201], %184 {strides = array<i32>} : memref<144x576xf32, #tpu.memory_space<vmem>>, vector<12x576xf32>,
    %c0_202 = arith.constant 0 : index
    %c128_203 = arith.constant 128 : index
    %186 = vector.load %arg23[%c0_202, %c128_203] : memref<16x896xf32, #tpu.memory_space<vmem>>, vector<12x576xf32>
    %c64_204 = arith.constant 64 : index
    %c0_205 = arith.constant 0 : index
    %187 = vector.load %arg25[%c64_204, %c0_205] : memref<144x576xf32, #tpu.memory_space<vmem>>, vector<12x576xf32>
    tpu.vector_store %arg25[%c64_204, %c0_205], %186 {strides = array<i32>} : memref<144x576xf32, #tpu.memory_space<vmem>>, vector<12x576xf32>,
    %c0_206 = arith.constant 0 : index
    %c132 = arith.constant 132 : index
    %188 = vector.load %arg23[%c0_206, %c132] : memref<16x896xf32, #tpu.memory_space<vmem>>, vector<12x576xf32>
    %c80_207 = arith.constant 80 : index
    %c0_208 = arith.constant 0 : index
    %189 = vector.load %arg25[%c80_207, %c0_208] : memref<144x576xf32, #tpu.memory_space<vmem>>, vector<12x576xf32>
    tpu.vector_store %arg25[%c80_207, %c0_208], %188 {strides = array<i32>} : memref<144x576xf32, #tpu.memory_space<vmem>>, vector<12x576xf32>,
    %c0_209 = arith.constant 0 : index
    %c220 = arith.constant 220 : index
    %190 = vector.load %arg23[%c0_209, %c220] : memref<16x896xf32, #tpu.memory_space<vmem>>, vector<12x576xf32>
    %c96 = arith.constant 96 : index
    %c0_210 = arith.constant 0 : index
    %191 = vector.load %arg25[%c96, %c0_210] : memref<144x576xf32, #tpu.memory_space<vmem>>, vector<12x576xf32>
    tpu.vector_store %arg25[%c96, %c0_210], %190 {strides = array<i32>} : memref<144x576xf32, #tpu.memory_space<vmem>>, vector<12x576xf32>,
    %c0_211 = arith.constant 0 : index
    %c224 = arith.constant 224 : index
    %192 = vector.load %arg23[%c0_211, %c224] : memref<16x896xf32, #tpu.memory_space<vmem>>, vector<12x576xf32>
    %c112 = arith.constant 112 : index
    %c0_212 = arith.constant 0 : index
    %193 = vector.load %arg25[%c112, %c0_212] : memref<144x576xf32, #tpu.memory_space<vmem>>, vector<12x576xf32>
    tpu.vector_store %arg25[%c112, %c0_212], %192 {strides = array<i32>} : memref<144x576xf32, #tpu.memory_space<vmem>>, vector<12x576xf32>,
    %c0_213 = arith.constant 0 : index
    %c228 = arith.constant 228 : index
    %194 = vector.load %arg23[%c0_213, %c228] : memref<16x896xf32, #tpu.memory_space<vmem>>, vector<12x576xf32>
    %c128_214 = arith.constant 128 : index
    %c0_215 = arith.constant 0 : index
    %195 = vector.load %arg25[%c128_214, %c0_215] : memref<144x576xf32, #tpu.memory_space<vmem>>, vector<12x576xf32>
    tpu.vector_store %arg25[%c128_214, %c0_215], %194 {strides = array<i32>} : memref<144x576xf32, #tpu.memory_space<vmem>>, vector<12x576xf32>,
    %c0_216 = arith.constant 0 : index
    %c0_217 = arith.constant 0 : index
    %196 = vector.load %arg25[%c0_216, %c0_217] : memref<144x576xf32, #tpu.memory_space<vmem>>, vector<144x576xf32>
    %c0_218 = arith.constant 0 : index
    %c0_219 = arith.constant 0 : index
    %197 = vector.load %arg16[%c0_218, %c0_219] : memref<12x144xf32, #tpu.memory_space<vmem>>, vector<12x144xf32>
    %cst_220 = arith.constant dense<0.000000e+00> : vector<12x576xf32>
    %198 = tpu.matmul %197, %196, %cst_220 {dimension_numbers = #tpu.dot_dimension_numbers<[1], [0], [0], [1], [0, 0, 1, 1], [], []>} : vector<12x144xf32>, vector<144x576xf32>, vector<12x576xf32> -> vector<12x576xf32>
    %c0_221 = arith.constant 0 : index
    %c0_222 = arith.constant 0 : index
    %199 = vector.load %arg17[%c0_221, %c0_222] : memref<12x1xf32, #tpu.memory_space<vmem>>, vector<12x1xf32>
    %200 = vector.broadcast %199 : vector<12x1xf32> to vector<12x576xf32>
    %201 = arith.addf %198, %200 : vector<12x576xf32>
    %202 = vector.broadcast %6 : vector<1x576xf32> to vector<12x576xf32>
    %203 = arith.mulf %201, %202 : vector<12x576xf32>
    %c0_223 = arith.constant 0 : index
    %c128_224 = arith.constant 128 : index
    %204 = vector.load %arg24[%c0_223, %c128_224] : memref<12x896xf32, #tpu.memory_space<vmem>>, vector<12x576xf32>
    tpu.vector_store %arg24[%c0_223, %c128_224], %203 {strides = array<i32>} : memref<12x896xf32, #tpu.memory_space<vmem>>, vector<12x576xf32>,
    %c0_225 = arith.constant 0 : index
    %c28_226 = arith.constant 28 : index
    %205 = vector.load %arg24[%c0_225, %c28_226] : memref<12x896xf32, #tpu.memory_space<vmem>>, vector<12x576xf32>
    %c0_227 = arith.constant 0 : index
    %c0_228 = arith.constant 0 : index
    %206 = vector.load %arg25[%c0_227, %c0_228] : memref<144x576xf32, #tpu.memory_space<vmem>>, vector<12x576xf32>
    tpu.vector_store %arg25[%c0_227, %c0_228], %205 {strides = array<i32>} : memref<144x576xf32, #tpu.memory_space<vmem>>, vector<12x576xf32>,
    %c0_229 = arith.constant 0 : index
    %c32_230 = arith.constant 32 : index
    %207 = vector.load %arg24[%c0_229, %c32_230] : memref<12x896xf32, #tpu.memory_space<vmem>>, vector<12x576xf32>
    %c16_231 = arith.constant 16 : index
    %c0_232 = arith.constant 0 : index
    %208 = vector.load %arg25[%c16_231, %c0_232] : memref<144x576xf32, #tpu.memory_space<vmem>>, vector<12x576xf32>
    tpu.vector_store %arg25[%c16_231, %c0_232], %207 {strides = array<i32>} : memref<144x576xf32, #tpu.memory_space<vmem>>, vector<12x576xf32>,
    %c0_233 = arith.constant 0 : index
    %c36_234 = arith.constant 36 : index
    %209 = vector.load %arg24[%c0_233, %c36_234] : memref<12x896xf32, #tpu.memory_space<vmem>>, vector<12x576xf32>
    %c32_235 = arith.constant 32 : index
    %c0_236 = arith.constant 0 : index
    %210 = vector.load %arg25[%c32_235, %c0_236] : memref<144x576xf32, #tpu.memory_space<vmem>>, vector<12x576xf32>
    tpu.vector_store %arg25[%c32_235, %c0_236], %209 {strides = array<i32>} : memref<144x576xf32, #tpu.memory_space<vmem>>, vector<12x576xf32>,
    %c0_237 = arith.constant 0 : index
    %c124_238 = arith.constant 124 : index
    %211 = vector.load %arg24[%c0_237, %c124_238] : memref<12x896xf32, #tpu.memory_space<vmem>>, vector<12x576xf32>
    %c48_239 = arith.constant 48 : index
    %c0_240 = arith.constant 0 : index
    %212 = vector.load %arg25[%c48_239, %c0_240] : memref<144x576xf32, #tpu.memory_space<vmem>>, vector<12x576xf32>
    tpu.vector_store %arg25[%c48_239, %c0_240], %211 {strides = array<i32>} : memref<144x576xf32, #tpu.memory_space<vmem>>, vector<12x576xf32>,
    %c0_241 = arith.constant 0 : index
    %c128_242 = arith.constant 128 : index
    %213 = vector.load %arg24[%c0_241, %c128_242] : memref<12x896xf32, #tpu.memory_space<vmem>>, vector<12x576xf32>
    %c64_243 = arith.constant 64 : index
    %c0_244 = arith.constant 0 : index
    %214 = vector.load %arg25[%c64_243, %c0_244] : memref<144x576xf32, #tpu.memory_space<vmem>>, vector<12x576xf32>
    tpu.vector_store %arg25[%c64_243, %c0_244], %213 {strides = array<i32>} : memref<144x576xf32, #tpu.memory_space<vmem>>, vector<12x576xf32>,
    %c0_245 = arith.constant 0 : index
    %c132_246 = arith.constant 132 : index
    %215 = vector.load %arg24[%c0_245, %c132_246] : memref<12x896xf32, #tpu.memory_space<vmem>>, vector<12x576xf32>
    %c80_247 = arith.constant 80 : index
    %c0_248 = arith.constant 0 : index
    %216 = vector.load %arg25[%c80_247, %c0_248] : memref<144x576xf32, #tpu.memory_space<vmem>>, vector<12x576xf32>
    tpu.vector_store %arg25[%c80_247, %c0_248], %215 {strides = array<i32>} : memref<144x576xf32, #tpu.memory_space<vmem>>, vector<12x576xf32>,
    %c0_249 = arith.constant 0 : index
    %c220_250 = arith.constant 220 : index
    %217 = vector.load %arg24[%c0_249, %c220_250] : memref<12x896xf32, #tpu.memory_space<vmem>>, vector<12x576xf32>
    %c96_251 = arith.constant 96 : index
    %c0_252 = arith.constant 0 : index
    %218 = vector.load %arg25[%c96_251, %c0_252] : memref<144x576xf32, #tpu.memory_space<vmem>>, vector<12x576xf32>
    tpu.vector_store %arg25[%c96_251, %c0_252], %217 {strides = array<i32>} : memref<144x576xf32, #tpu.memory_space<vmem>>, vector<12x576xf32>,
    %c0_253 = arith.constant 0 : index
    %c224_254 = arith.constant 224 : index
    %219 = vector.load %arg24[%c0_253, %c224_254] : memref<12x896xf32, #tpu.memory_space<vmem>>, vector<12x576xf32>
    %c112_255 = arith.constant 112 : index
    %c0_256 = arith.constant 0 : index
    %220 = vector.load %arg25[%c112_255, %c0_256] : memref<144x576xf32, #tpu.memory_space<vmem>>, vector<12x576xf32>
    tpu.vector_store %arg25[%c112_255, %c0_256], %219 {strides = array<i32>} : memref<144x576xf32, #tpu.memory_space<vmem>>, vector<12x576xf32>,
    %c0_257 = arith.constant 0 : index
    %c228_258 = arith.constant 228 : index
    %221 = vector.load %arg24[%c0_257, %c228_258] : memref<12x896xf32, #tpu.memory_space<vmem>>, vector<12x576xf32>
    %c128_259 = arith.constant 128 : index
    %c0_260 = arith.constant 0 : index
    %222 = vector.load %arg25[%c128_259, %c0_260] : memref<144x576xf32, #tpu.memory_space<vmem>>, vector<12x576xf32>
    tpu.vector_store %arg25[%c128_259, %c0_260], %221 {strides = array<i32>} : memref<144x576xf32, #tpu.memory_space<vmem>>, vector<12x576xf32>,
    %c0_261 = arith.constant 0 : index
    %c0_262 = arith.constant 0 : index
    %223 = vector.load %arg25[%c0_261, %c0_262] : memref<144x576xf32, #tpu.memory_space<vmem>>, vector<144x576xf32>
    %c0_263 = arith.constant 0 : index
    %c0_264 = arith.constant 0 : index
    %224 = vector.load %arg18[%c0_263, %c0_264] : memref<4x144xf32, #tpu.memory_space<vmem>>, vector<4x144xf32>
    %cst_265 = arith.constant dense<0.000000e+00> : vector<4x576xf32>
    %225 = tpu.matmul %224, %223, %cst_265 {dimension_numbers = #tpu.dot_dimension_numbers<[1], [0], [0], [1], [0, 0, 1, 1], [], []>} : vector<4x144xf32>, vector<144x576xf32>, vector<4x576xf32> -> vector<4x576xf32>
    %c0_266 = arith.constant 0 : index
    %c0_267 = arith.constant 0 : index
    %226 = vector.load %arg19[%c0_266, %c0_267] : memref<4x1xf32, #tpu.memory_space<vmem>>, vector<4x1xf32>
    %227 = vector.broadcast %226 : vector<4x1xf32> to vector<4x576xf32>
    %228 = arith.addf %225, %227 : vector<4x576xf32>
    %cst_268 = arith.constant dense<0.000000e+00> : vector<576xf32>
    %229 = vector.multi_reduction <add>, %228, %cst_268 [0] : vector<4x576xf32> to vector<576xf32>
    %230 = vector.shape_cast %229 : vector<576xf32> to vector<1x576xf32>
    %cst_269 = arith.constant 4.000000e+00 : f32
    %231 = vector.broadcast %cst_269 : f32 to vector<1x576xf32>
    %232 = arith.divf %230, %231 : vector<1x576xf32>
    %233 = vector.broadcast %232 : vector<1x576xf32> to vector<4x576xf32>
    %234 = arith.subf %228, %233 : vector<4x576xf32>
    %235 = arith.mulf %234, %234 : vector<4x576xf32>
    %cst_270 = arith.constant dense<0.000000e+00> : vector<576xf32>
    %236 = vector.multi_reduction <add>, %235, %cst_270 [0] : vector<4x576xf32> to vector<576xf32>
    %237 = vector.shape_cast %236 : vector<576xf32> to vector<1x576xf32>
    %cst_271 = arith.constant 4.000000e+00 : f32
    %238 = vector.broadcast %cst_271 : f32 to vector<1x576xf32>
    %239 = arith.divf %237, %238 : vector<1x576xf32>
    %240 = vector.broadcast %232 : vector<1x576xf32> to vector<4x576xf32>
    %241 = arith.subf %228, %240 : vector<4x576xf32>
    %cst_272 = arith.constant 9.99999974E-6 : f32
    %242 = vector.broadcast %cst_272 : f32 to vector<1x576xf32>
    %243 = arith.addf %239, %242 : vector<1x576xf32>
    %244 = math.rsqrt %243 : vector<1x576xf32>
    %245 = vector.broadcast %244 : vector<1x576xf32> to vector<4x576xf32>
    %246 = arith.mulf %241, %245 : vector<4x576xf32>
    %c0_273 = arith.constant 0 : index
    %c0_274 = arith.constant 0 : index
    %247 = vector.load %arg20[%c0_273, %c0_274] : memref<4x1xf32, #tpu.memory_space<vmem>>, vector<4x1xf32>
    %248 = vector.broadcast %247 : vector<4x1xf32> to vector<4x576xf32>
    %249 = arith.mulf %246, %248 : vector<4x576xf32>
    %c0_275 = arith.constant 0 : index
    %c0_276 = arith.constant 0 : index
    %250 = vector.load %arg21[%c0_275, %c0_276] : memref<4x1xf32, #tpu.memory_space<vmem>>, vector<4x1xf32>
    %251 = vector.broadcast %250 : vector<4x1xf32> to vector<4x576xf32>
    %252 = arith.addf %249, %251 : vector<4x576xf32>
    %c2 = arith.constant 2 : index
    %253 = memref.load %arg3[%c2] : memref<3xf32, #tpu.memory_space<smem>>
    %cst_277 = arith.constant 0.000000e+00 : f32
    %254 = vector.broadcast %cst_277 : f32 to vector<4x576xf32>
    %255 = arith.cmpf oge, %252, %254 : vector<4x576xf32>
    %256 = vector.broadcast %253 : f32 to vector<4x576xf32>
    %257 = arith.mulf %256, %252 : vector<4x576xf32>
    %258 = arith.select %255, %252, %257 : vector<4x576xi1>, vector<4x576xf32>
    %259 = vector.broadcast %6 : vector<1x576xf32> to vector<4x576xf32>
    %260 = arith.mulf %258, %259 : vector<4x576xf32>
    %c12 = arith.constant 12 : index
    %c128_278 = arith.constant 128 : index
    %261 = vector.load %arg23[%c12, %c128_278] : memref<16x896xf32, #tpu.memory_space<vmem>>, vector<4x576xf32>
    tpu.vector_store %arg23[%c12, %c128_278], %260 {strides = array<i32>} : memref<16x896xf32, #tpu.memory_space<vmem>>, vector<4x576xf32>,
    %c0_279 = arith.constant 0 : index
    %c128_280 = arith.constant 128 : index
    %262 = vector.load %arg23[%c0_279, %c128_280] : memref<16x896xf32, #tpu.memory_space<vmem>>, vector<16x576xf32>
    %c0_281 = arith.constant 0 : index
    %c0_282 = arith.constant 0 : index
    %c0_283 = arith.constant 0 : index
    %263 = vector.load %arg22[%c0_281, %c0_282, %c0_283] : memref<1x16x576xf32, #tpu.memory_space<vmem>>, vector<1x16x576xf32>
    %264 = vector.shape_cast %263 : vector<1x16x576xf32> to vector<16x576xf32>
    %265 = vector.shape_cast %262 : vector<16x576xf32> to vector<1x16x576xf32>
    tpu.vector_store %arg22[%c0_281, %c0_282, %c0_283], %265 {strides = array<i32>} : memref<1x16x576xf32, #tpu.memory_space<vmem>>, vector<1x16x576xf32>,
    return
  }
  func.func @transform_0(%arg0: i32) -> (i32, i32, i32) {
    %c0_i32 = arith.constant 0 : i32
    %c0_i32_0 = arith.constant 0 : i32
    %c0_i32_1 = arith.constant 0 : i32
    return %arg0, %c0_i32, %c0_i32_0 : i32, i32, i32
  }
  func.func @transform_1(%arg0: i32) -> (i32, i32) {
    %c0_i32 = arith.constant 0 : i32
    %c0_i32_0 = arith.constant 0 : i32
    %c0_i32_1 = arith.constant 0 : i32
    return %c0_i32, %c0_i32_0 : i32, i32
  }
  func.func @transform_2(%arg0: i32) -> i32 {
    %c0_i32 = arith.constant 0 : i32
    %c0_i32_0 = arith.constant 0 : i32
    return %c0_i32 : i32
  }
  func.func @transform_3(%arg0: i32) -> (i32, i32) {
    %c0_i32 = arith.constant 0 : i32
    %c0_i32_0 = arith.constant 0 : i32
    %c0_i32_1 = arith.constant 0 : i32
    return %c0_i32, %c0_i32_0 : i32, i32
  }
  func.func @transform_4(%arg0: i32) -> (i32, i32) {
    %c0_i32 = arith.constant 0 : i32
    %c0_i32_0 = arith.constant 0 : i32
    %c0_i32_1 = arith.constant 0 : i32
    return %c0_i32, %c0_i32_0 : i32, i32
  }
  func.func @transform_5(%arg0: i32) -> (i32, i32) {
    %c0_i32 = arith.constant 0 : i32
    %c0_i32_0 = arith.constant 0 : i32
    %c0_i32_1 = arith.constant 0 : i32
    return %c0_i32, %c0_i32_0 : i32, i32
  }
  func.func @transform_6(%arg0: i32) -> (i32, i32) {
    %c0_i32 = arith.constant 0 : i32
    %c0_i32_0 = arith.constant 0 : i32
    %c0_i32_1 = arith.constant 0 : i32
    return %c0_i32, %c0_i32_0 : i32, i32
  }
  func.func @transform_7(%arg0: i32) -> (i32, i32) {
    %c0_i32 = arith.constant 0 : i32
    %c0_i32_0 = arith.constant 0 : i32
    %c0_i32_1 = arith.constant 0 : i32
    return %c0_i32, %c0_i32_0 : i32, i32
  }
  func.func @transform_8(%arg0: i32) -> (i32, i32) {
    %c0_i32 = arith.constant 0 : i32
    %c0_i32_0 = arith.constant 0 : i32
    %c0_i32_1 = arith.constant 0 : i32
    return %c0_i32, %c0_i32_0 : i32, i32
  }
  func.func @transform_9(%arg0: i32) -> (i32, i32) {
    %c0_i32 = arith.constant 0 : i32
    %c0_i32_0 = arith.constant 0 : i32
    %c0_i32_1 = arith.constant 0 : i32
    return %c0_i32, %c0_i32_0 : i32, i32
  }
  func.func @transform_10(%arg0: i32) -> (i32, i32) {
    %c0_i32 = arith.constant 0 : i32
    %c0_i32_0 = arith.constant 0 : i32
    %c0_i32_1 = arith.constant 0 : i32
    return %c0_i32, %c0_i32_0 : i32, i32
  }
  func.func @transform_11(%arg0: i32) -> (i32, i32) {
    %c0_i32 = arith.constant 0 : i32
    %c0_i32_0 = arith.constant 0 : i32
    %c0_i32_1 = arith.constant 0 : i32
    return %c0_i32, %c0_i32_0 : i32, i32
  }
  func.func @transform_12(%arg0: i32) -> (i32, i32) {
    %c0_i32 = arith.constant 0 : i32
    %c0_i32_0 = arith.constant 0 : i32
    %c0_i32_1 = arith.constant 0 : i32
    return %c0_i32, %c0_i32_0 : i32, i32
  }
  func.func @transform_13(%arg0: i32) -> (i32, i32) {
    %c0_i32 = arith.constant 0 : i32
    %c0_i32_0 = arith.constant 0 : i32
    %c0_i32_1 = arith.constant 0 : i32
    return %c0_i32, %c0_i32_0 : i32, i32
  }
  func.func @transform_14(%arg0: i32) -> (i32, i32) {
    %c0_i32 = arith.constant 0 : i32
    %c0_i32_0 = arith.constant 0 : i32
    %c0_i32_1 = arith.constant 0 : i32
    return %c0_i32, %c0_i32_0 : i32, i32
  }
  func.func @transform_15(%arg0: i32) -> (i32, i32) {
    %c0_i32 = arith.constant 0 : i32
    %c0_i32_0 = arith.constant 0 : i32
    %c0_i32_1 = arith.constant 0 : i32
    return %c0_i32, %c0_i32_0 : i32, i32
  }
  func.func @transform_16(%arg0: i32) -> (i32, i32) {
    %c0_i32 = arith.constant 0 : i32
    %c0_i32_0 = arith.constant 0 : i32
    %c0_i32_1 = arith.constant 0 : i32
    return %c0_i32, %c0_i32_0 : i32, i32
  }
  func.func @transform_17(%arg0: i32) -> (i32, i32) {
    %c0_i32 = arith.constant 0 : i32
    %c0_i32_0 = arith.constant 0 : i32
    %c0_i32_1 = arith.constant 0 : i32
    return %c0_i32, %c0_i32_0 : i32, i32
  }
  func.func @transform_18(%arg0: i32) -> (i32, i32) {
    %c0_i32 = arith.constant 0 : i32
    %c0_i32_0 = arith.constant 0 : i32
    %c0_i32_1 = arith.constant 0 : i32
    return %c0_i32, %c0_i32_0 : i32, i32
  }
  func.func @transform_19(%arg0: i32) -> (i32, i32) {
    %c0_i32 = arith.constant 0 : i32
    %c0_i32_0 = arith.constant 0 : i32
    %c0_i32_1 = arith.constant 0 : i32
    return %c0_i32, %c0_i32_0 : i32, i32
  }
  func.func @transform_20(%arg0: i32) -> (i32, i32) {
    %c0_i32 = arith.constant 0 : i32
    %c0_i32_0 = arith.constant 0 : i32
    %c0_i32_1 = arith.constant 0 : i32
    return %c0_i32, %c0_i32_0 : i32, i32
  }
  func.func @transform_21(%arg0: i32) -> (i32, i32, i32) {
    %c0_i32 = arith.constant 0 : i32
    %c0_i32_0 = arith.constant 0 : i32
    %c0_i32_1 = arith.constant 0 : i32
    return %arg0, %c0_i32, %c0_i32_0 : i32, i32, i32
  }
}

</mosaic_0001>

<bundles_post_ra>
// kernel: dilated_dense_block.1
= control target key start
LH: loop header
LB: loop body
LE: loop exit
PB: predicated region body
PF: predicated region fallthrough
CT: control target
= control target key end

     0   :  { %s8155_s0 = inlined_call_operand.vmem [shape: f32[2,4,576], index: 0, kind: input, shape index: {}]   ;;  %s8156_s1 = inlined_call_operand.vmem [shape: f32[1,576], index: 1, kind: input, shape index: {}]   ;;  %s8157_s2 = inlined_call_operand.vmem [shape: f32[3], index: 2, kind: input, shape index: {}]   ;;  %s8158_s3 = inlined_call_operand.vmem [shape: f32[4,72], index: 3, kind: input, shape index: {}]   ;;  %s8159_s4 = inlined_call_operand.vmem [shape: f32[4,1], index: 4, kind: input, shape index: {}]   ;;  %s8160_s5 = inlined_call_operand.vmem [shape: f32[4,72], index: 5, kind: input, shape index: {}]   ;;  %s8161_s6 = inlined_call_operand.vmem [shape: f32[4,1], index: 6, kind: input, shape index: {}]   ;;  %s8162_s7 = inlined_call_operand.vmem [shape: f32[4,1], index: 7, kind: input, shape index: {}]   ;;  %s8163_s8 = inlined_call_operand.vmem [shape: f32[4,1], index: 8, kind: input, shape index: {}]   ;;  %s8164_s9 = inlined_call_operand.vmem [shape: f32[8,72], index: 9, kind: input, shape index: {}]   ;;  %s8165_s10 = inlined_call_operand.vmem [shape: f32[8,1], index: 10, kind: input, shape index: {}]   ;;  %s8166_s11 = inlined_call_operand.vmem [shape: f32[4,72], index: 11, kind: input, shape index: {}]   ;;  %s8167_s12 = inlined_call_operand.vmem [shape: f32[4,1], index: 12, kind: input, shape index: {}]   ;;  %s8168_s13 = inlined_call_operand.vmem [shape: f32[4,1], index: 13, kind: input, shape index: {}]   ;;  %s8169_s14 = inlined_call_operand.vmem [shape: f32[4,1], index: 14, kind: input, shape index: {}]   ;;  %s8170_s15 = inlined_call_operand.vmem [shape: f32[12,144], index: 15, kind: input, shape index: {}]   ;;  %s8171_s16 = inlined_call_operand.vmem [shape: f32[12,1], index: 16, kind: input, shape index: {}]   ;;  %s8172_s17 = inlined_call_operand.vmem [shape: f32[4,144], index: 17, kind: input, shape index: {}]   ;;  %s8173_s18 = inlined_call_operand.vmem [shape: f32[4,1], index: 18, kind: input, shape index: {}]   ;;  %s8174_s19 = inlined_call_operand.vmem [shape: f32[4,1], index: 19, kind: input, shape index: {}]   ;;  %s8175_s20 = inlined_call_operand.vmem [shape: f32[4,1], index: 20, kind: input, shape index: {}]   ;;  %s8176_s21 = inlined_call_operand.vmem [shape: f32[2,16,576], index: 21, kind: output, shape index: {}]  }
   0x1   :  { %8180 = sst [smem:[#allocation11_spill]] %s8155_s0 }
   0x2   :  { %8181 = sst [smem:[#allocation12_spill]] %s8156_s1 }
   0x3   :  { %8182 = sst [smem:[#allocation13_spill]] %s8157_s2 }
   0x4   :  { %8183 = sst [smem:[#allocation14_spill]] %s8158_s3 }
   0x5   :  { %8184 = sst [smem:[#allocation15_spill]] %s8159_s4 }
   0x6   :  { %8185 = sst [smem:[#allocation16_spill]] %s8160_s5 }
   0x7   :  { %26 = vsyncpa [#allocation6], 0  ;;  %s6078_s2 = smov 0  }
   0x8 LB: > { %s6084_s25 = sadd.s32 4294967295, %s5938_s2   ;;  %p5620_p0 = scmp.ge.s32.totalorder %s5938_s2, 1  ;;  %s5938_s2 = sphi %s6078_s2, %s32_s2  }
   0x9   : > { %p509_p1 = scmp.lt.s32.totalorder %s5938_s2, 3  ;;  %s8186_s3 = sld [smem:[#allocation13_spill]] }
   0xa   : > { %p5786_p3 = scmp.eq.s32.totalorder %s6084_s25, 0 }
   0xb   : > { %p6091_p2 = pnand %p5620_p0, %p509_p1 }
   0xd   : > { %p5782_p4 = pneg %p6091_p2 }
   0xf   : > { %s525_s28 = sshll.u32 %s8186_s3, 4  ;;  %p5783_p5 = pnand %p5786_p3, %p5782_p4  ;;  %s526_s28 = int_to_ptr.vmem [resolvable:$true] %s525_s28 }
  0x10   : > { %s5913_s0 = scalar_lea.vmem %s526_s28, 16  ;;  %p5921_p10 = scmp.lt.s32.totalorder %s526_s28, %s526_s28 }
  0x11   : > { %p5914_p6 = scmp.ne.s32.totalorder %s526_s28, %s5913_s0  ;;  %p5915_p7 = pneg %p5783_p5 }
  0x12   : > { %p5922_p11 = scmp.lt.s32.totalorder %s5913_s0, %s5913_s0 }
  0x13   : > { %p5916_p8 = pnand %p5915_p7, %p5914_p6 }
  0x14   : > { %p5923_p12 = por %p5922_p11, %p5921_p10 }
  0x15   : > { %p5917_p9 = pneg %p5916_p8 }
  0x17   : > { %p5924_p13 = pnand %p5923_p12, %p5917_p9 }
  0x19   : > { %5927 = shalt.err (!%p5924_p13)
}
  0x1a   : > { %s5940_s4 = smov [#allocation5]   ;;  %600 = sbr.rel (%p6091_p2) target bundleno = 2679 (0xa77), region = 104 }
  0x1b   : > { %5785 = dma.vmem_to_smem (!%p5783_p5), %s526_s28, 16, %s5940_s4, [#allocation6]  }
  0x1f   : > { %5933 = dma.done.wait (%p5786_p3), [#allocation6], 16  }
  0x20   : > { %5935 = vsyncadd (%p5786_p3), [#allocation6], 4294967280 }
  0x21   : > { %606 = sfence }
  0x22   : > { %p661_p0 = scmp.lt.s32.totalorder %s6084_s25, 1  ;;  %v5941_v0 = vmov 0.0   ;;  %vm804_vm0 = vcmask 519168   ;;  %s8188_s23 = sld [smem:[#allocation11_spill]]  ;;  %vm703_vm1 = vcmask 523264   ;;  %v5950_v56 = vmov 0  }
  0x23   : > { %674 = vst [vmem:[#allocation2 + $0x18] sm:$0xff] %v5941_v0  ;;  %671 = vst [vmem:[#allocation2] sm:$0xff] %v5941_v0  ;;  %1236 = vmatprep.mubr.f32.mxu0 %v5941_v0  ;;  %1307 = vmatprep.mubr.f32.mxu1 %v5941_v0  ;;  %s5942_s24 = smov 103   ;;  %s5943_s26 = smov 104   ;;  %vm1101_vm2 = vcmask 842752   ;;  %vm1066_vm3 = vcmask 850944  }
  0x24   : > { %672 = vst [vmem:[#allocation2 + $0x8] sm:$0xff] %v5941_v0  ;;  %673 = vst [vmem:[#allocation2 + $0x10] sm:$0xff] %v5941_v0  ;;  %s8200_s25 = smov (!%p661_p0, %s6084_s25), 1  ;;  %s5944_s27 = smov 105   ;;  %5824 = vset.pattern.permute.xlu0 %v5950_v56  ;;  %5825 = vset.pattern.permute.xlu1 %v5950_v56  ;;  %vm1031_vm4 = vcmask 859136   ;;  %vm996_vm5 = vcmask 1039360  }
  0x25   : > { %675 = vst [vmem:[#allocation2 + $0x20] sm:$0xff] %v5941_v0  ;;  %676 = vst [vmem:[#allocation2 + $0x28] sm:$0xff] %v5941_v0  ;;  %s5776_s30 = smul.u32 20, %s8200_s25  ;;  %s5945_s3 = smov 127   ;;  %vm950_vm6 = vcmask 7168   ;;  %vm910_vm7 = vcmask 187392  }
  0x26   : > { %678 = vst [vmem:[#allocation2 + $0x38] sm:$0xff] %v5941_v0  ;;  %679 = vst [vmem:[#allocation2 + $0x40] sm:$0xff] %v5941_v0  ;;  %s5946_s28 = smov 1   ;;  %s5947_s29 = smov 23   ;;  %vm870_vm8 = vcmask 195584   ;;  %vm830_vm9 = vcmask 203776  }
  0x27   : > { %680 = vst [vmem:[#allocation2 + $0x48] sm:$0xff] %v5941_v0  ;;  %681 = vst [vmem:[#allocation2 + $0x50] sm:$0xff] %v5941_v0  ;;  %s5948_s0 = smov 24   ;;  %s5949_s4 = smov 25   ;;  %vm1168_vm10 = vcmask 588800   ;;  %vm5951_vm11 = vmmov 0  }
  0x28   : > { %682 = vst [vmem:[#allocation2 + $0x58] sm:$0xff] %v5941_v0  ;;  %683 = vst [vmem:[#allocation2 + $0x60] sm:$0xff] %v5941_v0  ;;  %s665_s1 = scalar_lea.vmem %s8188_s23, %s5776_s30  ;;  %s8189_s22 = sld [smem:[#allocation15_spill]]  ;;  %vm1989_vm12 = vcmask 1043456  }
  0x29   : > { %684 = vst [vmem:[#allocation2 + $0x68] sm:$0xff] %v5941_v0  ;;  %685 = vst [vmem:[#allocation3] sm:$0xff] %v5941_v0  ;;  %v792_v1 = vld [vmem:[%s665_s1 + $0x8] sm:$0xff]  ;;  %v791_v2 = vld [vmem:[%s665_s1] sm:$0xff]  ;;  %s8190_s30 = sld [smem:[#allocation14_spill]]  ;;  %s5953_s5 = smov 46  }
  0x2a   : > { %686 = vst [vmem:[#allocation3 + $0x8] sm:$0xff] %v5941_v0  ;;  %687 = vst [vmem:[#allocation3 + $0x10] sm:$0xff] %v5941_v0  ;;  %v793_v3 = vld [vmem:[%s665_s1 + $0x10] sm:$0xf]  ;;  %v797_v4 = vcombine.high %v792_v1, %v792_v1  ;;  %v796_v5 = vcombine.high %v791_v2, %v791_v2  ;;  %v926_v32 = vld [vmem:[#allocation2] sm:$0xf] }
  0x2b   : > { %688 = vst [vmem:[#allocation3 + $0x18] sm:$0xff] %v5941_v0  ;;  %689 = vst [vmem:[#allocation3 + $0x20] sm:$0xff] %v5941_v0  ;;  %v886_v36 = vld [vmem:[#allocation2] sm:$0xf]  ;;  %s8191_s23 = sld [smem:[#allocation12_spill]] }
  0x2c   : > { %690 = vst [vmem:[#allocation3 + $0x28] sm:$0xff] %v5941_v0  ;;  %692 = vst [vmem:[#allocation3 + $0x38] sm:$0xf] %v5941_v0  ;;  %v846_v42 = vld [vmem:[#allocation2] sm:$0xf] }
  0x2d   : > { %693 = vst [vmem:[#allocation3 + $0x40] sm:$0xf] %v5941_v0  ;;  %694 = vst [vmem:[#allocation3 + $0x48] sm:$0xf] %v5941_v0  ;;  %v806_v46 = vld [vmem:[#allocation2] sm:$0xf] }
  0x2e   : > { %695 = vst [vmem:[#allocation3 + $0x50] sm:$0xf] %v5941_v0  ;;  %696 = vst [vmem:[#allocation3 + $0x58] sm:$0xf] %v5941_v0  ;;  %v1162_v55 = vld [vmem:[%s8189_s22] sm:$0xf] }
  0x2f   : > { %697 = vst [vmem:[#allocation3 + $0x60] sm:$0xf] %v5941_v0  ;;  %698 = vst [vmem:[#allocation3 + $0x68] sm:$0xf] %v5941_v0  ;;  %s5954_s22 = smov 48  }
  0x30   : > { %699 = vst [vmem:[#allocation4] sm:$0xff] %v5941_v0  ;;  %700 = vst [vmem:[#allocation4 + $0x8] sm:$0xff] %v5941_v0 }
  0x31   : > { %701 = vst [vmem:[#allocation4 + $0x10] sm:$0xff] %v5941_v0  ;;  %702 = vst [vmem:[#allocation4 + $0x18] sm:$0xff] %v5941_v0 }
  0x32   : > { %705 = vst [vmem:[#allocation4 + $0x28] sm:$0xff] %v5941_v0  ;;  %706 = vst [vmem:[#allocation4 + $0x30] sm:$0xff] %v5941_v0 }
  0x33   : > { %707 = vst [vmem:[#allocation4 + $0x38] sm:$0xff] %v5941_v0  ;;  %708 = vst [vmem:[#allocation4 + $0x40] sm:$0xff] %v5941_v0 }
  0x34   : > { %710 = vst [vmem:[#allocation4 + $0x50] sm:$0xff] %v5941_v0  ;;  %711 = vst [vmem:[#allocation4 + $0x58] sm:$0xff] %v5941_v0 }
  0x35   : > { %712 = vst [vmem:[#allocation4 + $0x60] sm:$0xff] %v5941_v0  ;;  %713 = vst [vmem:[#allocation4 + $0x68] sm:$0xff] %v5941_v0 }
  0x36   : > { %715 = vst [vmem:[#allocation4 + $0x78] sm:$0xff] %v5941_v0  ;;  %716 = vst [vmem:[#allocation4 + $0x80] sm:$0xff] %v5941_v0 }
  0x37   : > { %717 = vst [vmem:[#allocation4 + $0x88] sm:$0xff] %v5941_v0  ;;  %718 = vst [vmem:[#allocation4 + $0x90] sm:$0xff] %v5941_v0 }
  0x38   : > { %720 = vst [vmem:[#allocation4 + $0xa0] sm:$0xff] %v5941_v0  ;;  %721 = vst [vmem:[#allocation4 + $0xa8] sm:$0xff] %v5941_v0 }
  0x39   : > { %722 = vst [vmem:[#allocation4 + $0xb0] sm:$0xff] %v5941_v0  ;;  %723 = vst [vmem:[#allocation4 + $0xb8] sm:$0xff] %v5941_v0 }
  0x3a   : > { %725 = vst [vmem:[#allocation4 + $0xc8] sm:$0xff] %v5941_v0  ;;  %726 = vst [vmem:[#allocation4 + $0xd0] sm:$0xff] %v5941_v0 }
  0x3b   : > { %727 = vst [vmem:[#allocation4 + $0xd8] sm:$0xff] %v5941_v0  ;;  %728 = vst [vmem:[#allocation4 + $0xe0] sm:$0xff] %v5941_v0 }
  0x3c   : > { %730 = vst [vmem:[#allocation4 + $0xf0] sm:$0xff] %v5941_v0  ;;  %731 = vst [vmem:[#allocation4 + $0xf8] sm:$0xff] %v5941_v0 }
  0x3d   : > { %732 = vst [vmem:[#allocation4 + $0x100] sm:$0xff] %v5941_v0  ;;  %733 = vst [vmem:[#allocation4 + $0x108] sm:$0xff] %v5941_v0 }
  0x3e   : > { %735 = vst [vmem:[#allocation4 + $0x118] sm:$0xff] %v5941_v0  ;;  %736 = vst [vmem:[#allocation4 + $0x120] sm:$0xff] %v5941_v0 }
  0x3f   : > { %737 = vst [vmem:[#allocation4 + $0x128] sm:$0xff] %v5941_v0  ;;  %738 = vst [vmem:[#allocation4 + $0x130] sm:$0xff] %v5941_v0 }
  0x40   : > { %740 = vst [vmem:[#allocation4 + $0x140] sm:$0xff] %v5941_v0  ;;  %741 = vst [vmem:[#allocation4 + $0x148] sm:$0xff] %v5941_v0 }
  0x41   : > { %742 = vst [vmem:[#allocation4 + $0x150] sm:$0xff] %v5941_v0  ;;  %743 = vst [vmem:[#allocation4 + $0x158] sm:$0xff] %v5941_v0 }
  0x42   : > { %745 = vst [vmem:[#allocation4 + $0x168] sm:$0xff] %v5941_v0  ;;  %746 = vst [vmem:[#allocation4 + $0x170] sm:$0xff] %v5941_v0 }
  0x43   : > { %747 = vst [vmem:[#allocation4 + $0x178] sm:$0xff] %v5941_v0  ;;  %748 = vst [vmem:[#allocation4 + $0x180] sm:$0xff] %v5941_v0 }
  0x44   : > { %755 = vst [vmem:[#allocation4 + $0x1b8] sm:$0xff] %v5941_v0  ;;  %756 = vst [vmem:[#allocation4 + $0x1c0] sm:$0xff] %v5941_v0 }
  0x45   : > { %757 = vst [vmem:[#allocation4 + $0x1c8] sm:$0xff] %v5941_v0  ;;  %758 = vst [vmem:[#allocation4 + $0x1d0] sm:$0xff] %v5941_v0 }
  0x46   : > { %765 = vst [vmem:[#allocation4 + $0x208] sm:$0xff] %v5941_v0  ;;  %766 = vst [vmem:[#allocation4 + $0x210] sm:$0xff] %v5941_v0 }
  0x47   : > { %767 = vst [vmem:[#allocation4 + $0x218] sm:$0xff] %v5941_v0  ;;  %768 = vst [vmem:[#allocation4 + $0x220] sm:$0xff] %v5941_v0 }
  0x48   : > { %775 = vst [vmem:[#allocation4 + $0x258] sm:$0xff] %v5941_v0  ;;  %776 = vst [vmem:[#allocation4 + $0x260] sm:$0xff] %v5941_v0 }
  0x49   : > { %777 = vst [vmem:[#allocation4 + $0x268] sm:$0xff] %v5941_v0  ;;  %778 = vst [vmem:[#allocation4 + $0x270] sm:$0xff] %v5941_v0 }
  0x4a   : > { %785 = vst [vmem:[#allocation4 + $0x2a8] sm:$0xff] %v5941_v0  ;;  %786 = vst [vmem:[#allocation4 + $0x2b0] sm:$0xff] %v5941_v0 }
  0x4b   : > { %787 = vst [vmem:[#allocation4 + $0x2b8] sm:$0xff] %v5941_v0  ;;  %788 = vst [vmem:[#allocation4 + $0x2c0] sm:$0xff] %v5941_v0 }
  0x4c   : > { %744 = vst.msk [vmem:[#allocation4 + $0x160] sm:$0xff] %vm703_vm1, %v5941_v0  ;;  %704 = vst.msk [vmem:[#allocation4 + $0x20] sm:$0xff] %vm703_vm1, %v5941_v0 }
  0x4d   : > { %709 = vst.msk [vmem:[#allocation4 + $0x48] sm:$0xff] %vm703_vm1, %v5941_v0  ;;  %714 = vst.msk [vmem:[#allocation4 + $0x70] sm:$0xff] %vm703_vm1, %v5941_v0 }
  0x4e   : > { %719 = vst.msk [vmem:[#allocation4 + $0x98] sm:$0xff] %vm703_vm1, %v5941_v0  ;;  %724 = vst.msk [vmem:[#allocation4 + $0xc0] sm:$0xff] %vm703_vm1, %v5941_v0 }
  0x4f   : > { %729 = vst.msk [vmem:[#allocation4 + $0xe8] sm:$0xff] %vm703_vm1, %v5941_v0  ;;  %734 = vst.msk [vmem:[#allocation4 + $0x110] sm:$0xff] %vm703_vm1, %v5941_v0 }
  0x50   : > { %739 = vst.msk [vmem:[#allocation4 + $0x138] sm:$0xff] %vm703_vm1, %v5941_v0  ;;  %749 = vst.msk [vmem:[#allocation4 + $0x188] sm:$0xff] %vm703_vm1, %v5941_v0 }
  0x51   : > { %754 = vst.msk [vmem:[#allocation4 + $0x1b0] sm:$0xff] %vm703_vm1, %v5941_v0  ;;  %759 = vst.msk [vmem:[#allocation4 + $0x1d8] sm:$0xff] %vm703_vm1, %v5941_v0 }
  0x52   : > { %764 = vst.msk [vmem:[#allocation4 + $0x200] sm:$0xff] %vm703_vm1, %v5941_v0  ;;  %769 = vst.msk [vmem:[#allocation4 + $0x228] sm:$0xff] %vm703_vm1, %v5941_v0 }
  0x53   : > { %774 = vst.msk [vmem:[#allocation4 + $0x250] sm:$0xff] %vm703_vm1, %v5941_v0  ;;  %779 = vst.msk [vmem:[#allocation4 + $0x278] sm:$0xff] %vm703_vm1, %v5941_v0 }
  0x54   : > { %784 = vst.msk [vmem:[#allocation4 + $0x2a0] sm:$0xff] %vm703_vm1, %v5941_v0  ;;  %789 = vst.msk [vmem:[#allocation4 + $0x2c8] sm:$0xff] %vm703_vm1, %v5941_v0 }
  0x55   : > { %802 = vst [vmem:[#allocation2 + $0x18] sm:$0xf] %v792_v1  ;;  %800 = vst [vmem:[#allocation2 + $0x8] sm:$0xf] %v791_v2 }
  0x56   : > { %805 = vst.msk [vmem:[#allocation2 + $0x28] sm:$0xf] %vm804_vm0, %v793_v3  ;;  %801 = vst [vmem:[#allocation2 + $0x10] sm:$0xf] %v796_v5 }
  0x57   : > { %803 = vst [vmem:[#allocation2 + $0x20] sm:$0xf] %v797_v4 }
  0x5c   : > { %v1083_v6 = vld [vmem:[#allocation2 + $0x18] sm:$0xf]  ;;  %v1081_v7 = vld [vmem:[#allocation2 + $0x8] sm:$0xf] }
  0x5d   : > { %1095 = vrot.lane.b32.xlu0 %v1083_v6, %s5942_s24  ;;  %1091 = vrot.lane.b32.xlu1 %v1081_v7, %s5942_s24  ;;  %v1048_v8 = vld [vmem:[#allocation2 + $0x18] sm:$0xf]  ;;  %v1046_v9 = vld [vmem:[#allocation2 + $0x8] sm:$0xf]  ;;  %v1082_v12 = vld [vmem:[#allocation2 + $0x10] sm:$0xf] }
  0x5e   : > { %v1085_v10 = vld [vmem:[#allocation2 + $0x28] sm:$0xf]  ;;  %v1013_v11 = vld [vmem:[#allocation2 + $0x18] sm:$0xf]  ;;  %v1047_v13 = vld [vmem:[#allocation2 + $0x10] sm:$0xf] }
  0x5f   : > { %v1084_v14 = vld [vmem:[#allocation2 + $0x20] sm:$0xf]  ;;  %v1012_v15 = vld [vmem:[#allocation2 + $0x10] sm:$0xf]  ;;  %v1050_v16 = vld [vmem:[#allocation2 + $0x28] sm:$0xf] }
  0x60   : > { %v1049_v17 = vld [vmem:[#allocation2 + $0x20] sm:$0xf]  ;;  %v1011_v18 = vld [vmem:[#allocation2 + $0x8] sm:$0xf]  ;;  %v977_v19 = vld [vmem:[#allocation2 + $0x10] sm:$0xf] }
  0x61   : > { %1060 = vrot.lane.b32.xlu0 %v1048_v8, %s5943_s26  ;;  %1056 = vrot.lane.b32.xlu1 %v1046_v9, %s5943_s26  ;;  %v978_v20 = vld [vmem:[#allocation2 + $0x18] sm:$0xf]  ;;  %v1014_v21 = vld [vmem:[#allocation2 + $0x20] sm:$0xf]  ;;  %v967_v22 = vld [vmem:[#allocation2 + $0x10] sm:$0xf] }
  0x62   : > { %972 = vst [vmem:[#allocation4 + $0xa8] sm:$0xf] %v967_v22  ;;  %v966_v23 = vld [vmem:[#allocation2 + $0x8] sm:$0xf]  ;;  %v979_v26 = vld [vmem:[#allocation2 + $0x20] sm:$0xf] }
  0x63   : > { %971 = vst [vmem:[#allocation4 + $0xa0] sm:$0xf] %v966_v23  ;;  %v1015_v24 = vld [vmem:[#allocation2 + $0x28] sm:$0xf]  ;;  %v928_v29 = vld [vmem:[#allocation2 + $0x10] sm:$0xf] }
  0x64   : > { %v976_v25 = vld [vmem:[#allocation2 + $0x8] sm:$0xf]  ;;  %v969_v30 = vld [vmem:[#allocation2 + $0x20] sm:$0xf]  ;;  %v968_v31 = vld [vmem:[#allocation2 + $0x18] sm:$0xf] }
  0x65   : > { %1099 = vrot.lane.b32.xlu0 %v1085_v10, %s5942_s24  ;;  %1025 = vrot.lane.b32.xlu1 %v1013_v11, %s5944_s27  ;;  %v980_v27 = vld [vmem:[#allocation2 + $0x28] sm:$0xf]  ;;  %974 = vst [vmem:[#allocation4 + $0xb8] sm:$0xf] %v969_v30  ;;  %973 = vst [vmem:[#allocation4 + $0xb0] sm:$0xf] %v968_v31 }
  0x66   : > { %v927_v28 = vld [vmem:[#allocation2 + $0x8] sm:$0xf]  ;;  %v929_v34 = vld [vmem:[#allocation2 + $0x18] sm:$0xf]  ;;  %v888_v35 = vld [vmem:[#allocation2 + $0x10] sm:$0xf] }
  0x67   : > { %v887_v33 = vld [vmem:[#allocation2 + $0x8] sm:$0xf]  ;;  %v930_v37 = vld [vmem:[#allocation2 + $0x20] sm:$0xf]  ;;  %v848_v39 = vld [vmem:[#allocation2 + $0x10] sm:$0xf] }
  0x68   : > { %v847_v38 = vld [vmem:[#allocation2 + $0x8] sm:$0xf]  ;;  %v889_v40 = vld [vmem:[#allocation2 + $0x18] sm:$0xf]  ;;  %v890_v41 = vld [vmem:[#allocation2 + $0x20] sm:$0xf] }
  0x69   : > { %1093 = vrot.lane.b32.xlu0 %v1082_v12, %s5942_s24  ;;  %1058 = vrot.lane.b32.xlu1 %v1047_v13, %s5943_s26  ;;  %v807_v43 = vld [vmem:[#allocation2 + $0x8] sm:$0xf]  ;;  %v849_v44 = vld [vmem:[#allocation2 + $0x18] sm:$0xf]  ;;  %v808_v45 = vld [vmem:[#allocation2 + $0x10] sm:$0xf] }
  0x6a   : > { %v850_v47 = vld [vmem:[#allocation2 + $0x20] sm:$0xf]  ;;  %v970_v48 = vld [vmem:[#allocation2 + $0x28] sm:$0xf]  ;;  %v809_v50 = vld [vmem:[#allocation2 + $0x18] sm:$0xf] }
  0x6b   : > { %975 = vst.msk [vmem:[#allocation4 + $0xc0] sm:$0xf] %vm804_vm0, %v970_v48  ;;  %v810_v49 = vld [vmem:[#allocation2 + $0x20] sm:$0xf]  ;;  %v891_v51 = vld [vmem:[#allocation2 + $0x28] sm:$0xf] }
  0x6c   : > { %v931_v52 = vld [vmem:[#allocation2 + $0x28] sm:$0xf] }
  0x6d   : > { %1097 = vrot.lane.b32.xlu1 %v1084_v14, %s5942_s24  ;;  %1023 = vrot.lane.b32.xlu0 %v1012_v15, %s5944_s27  ;;  %v811_v53 = vld [vmem:[#allocation2 + $0x28] sm:$0xf] }
  0x6e   : > { %v851_v54 = vld [vmem:[#allocation2 + $0x28] sm:$0xf] }
  0x71   : > { %1064 = vrot.lane.b32.xlu1 %v1050_v16, %s5943_s26  ;;  %1062 = vrot.lane.b32.xlu0 %v1049_v17, %s5943_s26 }
  0x75   : > { %1021 = vrot.lane.b32.xlu0 %v1011_v18, %s5944_s27  ;;  %988 = vrot.lane.b32.xlu1 %v977_v19, %s5945_s3 }
  0x79   : > { %990 = vrot.lane.b32.xlu0 %v978_v20, %s5945_s3  ;;  %1027 = vrot.lane.b32.xlu1 %v1014_v21, %s5944_s27 }
  0x7d   : > { %1029 = vrot.lane.b32.xlu0 %v1015_v24, %s5944_s27  ;;  %986 = vrot.lane.b32.xlu1 %v976_v25, %s5945_s3 }
  0x81   : > { %992 = vrot.lane.b32.xlu0 %v979_v26, %s5945_s3  ;;  %994 = vrot.lane.b32.xlu1 %v980_v27, %s5945_s3 }
  0x85   : > { %940 = vrot.lane.b32.xlu0 %v927_v28, %s5946_s28  ;;  %942 = vrot.lane.b32.xlu1 %v928_v29, %s5946_s28 }
  0x89   : > { %938 = vrot.lane.b32.xlu0 %v926_v32, %s5946_s28  ;;  %900 = vrot.lane.b32.xlu1 %v887_v33, %s5947_s29 }
  0x8d   : > { %944 = vrot.lane.b32.xlu1 %v929_v34, %s5946_s28  ;;  %902 = vrot.lane.b32.xlu0 %v888_v35, %s5947_s29 }
  0x91   : > { %898 = vrot.lane.b32.xlu1 %v886_v36, %s5947_s29  ;;  %946 = vrot.lane.b32.xlu0 %v930_v37, %s5946_s28 }
  0x95   : > { %860 = vrot.lane.b32.xlu0 %v847_v38, %s5948_s0  ;;  %862 = vrot.lane.b32.xlu1 %v848_v39, %s5948_s0 }
  0x99   : > { %904 = vrot.lane.b32.xlu0 %v889_v40, %s5947_s29  ;;  %906 = vrot.lane.b32.xlu1 %v890_v41, %s5947_s29 }
  0x9d   : > { %858 = vrot.lane.b32.xlu0 %v846_v42, %s5948_s0  ;;  %820 = vrot.lane.b32.xlu1 %v807_v43, %s5949_s4  ;;  %v1137_v43 = vld [vmem:[#allocation4 + $0xa8] sm:$0xff] }
  0xa1   : > { %864 = vrot.lane.b32.xlu1 %v849_v44, %s5948_s0  ;;  %822 = vrot.lane.b32.xlu0 %v808_v45, %s5949_s4 }
  0xa5   : > { %818 = vrot.lane.b32.xlu1 %v806_v46, %s5949_s4  ;;  %866 = vrot.lane.b32.xlu0 %v850_v47, %s5948_s0  ;;  %v1136_v47 = vld [vmem:[#allocation4 + $0xa0] sm:$0xff] }
  0xa9   : > { %826 = vrot.lane.b32.xlu1 %v810_v49, %s5949_s4  ;;  %824 = vrot.lane.b32.xlu0 %v809_v50, %s5949_s4 }
  0xad   : > { %908 = vrot.lane.b32.xlu1 %v891_v51, %s5947_s29  ;;  %948 = vrot.lane.b32.xlu0 %v931_v52, %s5946_s28 }
  0xb1   : > { %828 = vrot.lane.b32.xlu1 %v811_v53, %s5949_s4  ;;  %868 = vrot.lane.b32.xlu0 %v851_v54, %s5948_s0  ;;  %v1139_v54 = vld [vmem:[#allocation4 + $0xb8] sm:$0xff] }
  0xb5   : > { %1165 = vperm.xlu0 %5824, %v1162_v55   ;;  %v1138_v55 = vld [vmem:[#allocation4 + $0xb0] sm:$0xff] }
  0xcf   : > { %v1096_v57 = vpop.permute.xlu0 %1095  ;;  %v1092_v58 = vpop.permute.xlu1 %1091 }
  0xd3   : > { %v1061_v59 = vpop.permute.xlu0 %1060  ;;  %v1057_v60 = vpop.permute.xlu1 %1056 }
  0xd7   : > { %v1100_v61 = vpop.permute.xlu0 %1099  ;;  %v1026_v62 = vpop.permute.xlu1 %1025 }
  0xd8   : > { %1115 = vst.msk [vmem:[#allocation4 + $0x160] sm:$0xf] %vm804_vm0, %v1100_v61 }
  0xdb   : > { %v1094_v63 = vpop.permute.xlu0 %1093  ;;  %v1059_v1 = vpop.permute.xlu1 %1058 }
  0xdc   : > { %v1102_v2 = vsel %vm1101_vm2, %v1092_v58, %v1094_v63  ;;  %v1103_v3 = vsel %vm1101_vm2, %v1094_v63, %v1096_v57  ;;  %v1067_v4 = vsel %vm1066_vm3, %v1057_v60, %v1059_v1  ;;  %v1068_v5 = vsel %vm1066_vm3, %v1059_v1, %v1061_v59 }
  0xdd   : > { %1111 = vst [vmem:[#allocation4 + $0x140] sm:$0xf] %v1102_v2  ;;  %1112 = vst [vmem:[#allocation4 + $0x148] sm:$0xf] %v1103_v3 }
  0xde   : > { %1076 = vst [vmem:[#allocation4 + $0x118] sm:$0xf] %v1067_v4  ;;  %1077 = vst [vmem:[#allocation4 + $0x120] sm:$0xf] %v1068_v5 }
  0xdf   : > { %v1098_v6 = vpop.permute.xlu1 %1097  ;;  %v1024_v7 = vpop.permute.xlu0 %1023 }
  0xe0   : > { %v1104_v8 = vsel %vm1101_vm2, %v1096_v57, %v1098_v6  ;;  %v1105_v9 = vsel %vm1101_vm2, %v1098_v6, %v1100_v61  ;;  %v1033_v10 = vsel %vm1031_vm4, %v1024_v7, %v1026_v62 }
  0xe1   : > { %1113 = vst [vmem:[#allocation4 + $0x150] sm:$0xf] %v1104_v8  ;;  %1114 = vst [vmem:[#allocation4 + $0x158] sm:$0xf] %v1105_v9 }
  0xe2   : > { %1042 = vst [vmem:[#allocation4 + $0xf8] sm:$0xf] %v1033_v10 }
  0xe3   : > { %v1065_v11 = vpop.permute.xlu1 %1064  ;;  %v1063_v12 = vpop.permute.xlu0 %1062 }
  0xe4   : > { %1080 = vst.msk [vmem:[#allocation4 + $0x138] sm:$0xf] %vm804_vm0, %v1065_v11  ;;  %v1069_v13 = vsel %vm1066_vm3, %v1061_v59, %v1063_v12  ;;  %v1070_v14 = vsel %vm1066_vm3, %v1063_v12, %v1065_v11  ;;  %v1157_v15 = vld [vmem:[#allocation4 + $0x148] sm:$0xff]  ;;  %v1156_v16 = vld [vmem:[#allocation4 + $0x140] sm:$0xff] }
  0xe5   : > { %1078 = vst [vmem:[#allocation4 + $0x128] sm:$0xf] %v1069_v13  ;;  %1079 = vst [vmem:[#allocation4 + $0x130] sm:$0xf] %v1070_v14  ;;  %1186 = vmatprep.subr.mxu0 %v1157_v15  ;;  %v1152_v17 = vld [vmem:[#allocation4 + $0x120] sm:$0xff]  ;;  %v1151_v20 = vld [vmem:[#allocation4 + $0x118] sm:$0xff] }
  0xe6   : > { %1187 = vmatpush1.msra.mxu0 %v1156_v16 }
  0xe7   : > { %1188 = vmatprep.subr.mxu0 %v1152_v17  ;;  %v1022_v18 = vpop.permute.xlu0 %1021  ;;  %v989_v19 = vpop.permute.xlu1 %988 }
  0xe8   : > { %v1032_v21 = vsel %vm1031_vm4, %v1022_v18, %v1024_v7  ;;  %1189 = vmatpush1.msra.mxu0 %v1151_v20  ;;  %v1159_v23 = vld [vmem:[#allocation4 + $0x158] sm:$0xff]  ;;  %v1158_v24 = vld [vmem:[#allocation4 + $0x150] sm:$0xff] }
  0xe9   : > { %v1147_v22 = vld [vmem:[#allocation4 + $0xf8] sm:$0xff]  ;;  %1041 = vst [vmem:[#allocation4 + $0xf0] sm:$0xf] %v1032_v21  ;;  %1257 = vmatprep.subr.mxu1 %v1159_v23 }
  0xea   : > { %1190 = vmatprep.subr.mxu0 %v1147_v22  ;;  %1258 = vmatpush1.msra.mxu1 %v1158_v24 }
  0xeb   : > { %v991_v25 = vpop.permute.xlu0 %990  ;;  %v1028_v26 = vpop.permute.xlu1 %1027 }
  0xec   : > { %v998_v27 = vsel %vm996_vm5, %v989_v19, %v991_v25  ;;  %v1034_v28 = vsel %vm1031_vm4, %v1026_v62, %v1028_v26  ;;  %v1154_v29 = vld [vmem:[#allocation4 + $0x130] sm:$0xff]  ;;  %v1153_v30 = vld [vmem:[#allocation4 + $0x128] sm:$0xff] }
  0xed   : > { %1007 = vst [vmem:[#allocation4 + $0xd0] sm:$0xf] %v998_v27  ;;  %1043 = vst [vmem:[#allocation4 + $0x100] sm:$0xf] %v1034_v28  ;;  %1259 = vmatprep.subr.mxu1 %v1154_v29 }
  0xee   : > { %1260 = vmatpush1.msra.mxu1 %v1153_v30 }
  0xef   : > { %v1030_v31 = vpop.permute.xlu0 %1029  ;;  %v987_v32 = vpop.permute.xlu1 %986 }
  0xf0   : > { %v1035_v33 = vsel %vm1031_vm4, %v1028_v26, %v1030_v31  ;;  %1045 = vst.msk [vmem:[#allocation4 + $0x110] sm:$0xf] %vm804_vm0, %v1030_v31  ;;  %v997_v34 = vsel %vm996_vm5, %v987_v32, %v989_v19  ;;  %v1146_v35 = vld [vmem:[#allocation4 + $0xf0] sm:$0xff] }
  0xf1   : > { %1044 = vst [vmem:[#allocation4 + $0x108] sm:$0xf] %v1035_v33  ;;  %1006 = vst [vmem:[#allocation4 + $0xc8] sm:$0xf] %v997_v34  ;;  %1191 = vmatpush1.msra.mxu0 %v1146_v35 }
  0xf3   : > { %v993_v36 = vpop.permute.xlu0 %992  ;;  %v995_v37 = vpop.permute.xlu1 %994 }
  0xf4   : > { %v999_v38 = vsel %vm996_vm5, %v991_v25, %v993_v36  ;;  %v1000_v39 = vsel %vm996_vm5, %v993_v36, %v995_v37  ;;  %1010 = vst.msk [vmem:[#allocation4 + $0xe8] sm:$0xf] %vm804_vm0, %v995_v37  ;;  %v1142_v40 = vld [vmem:[#allocation4 + $0xd0] sm:$0xff]  ;;  %v1148_v48 = vld [vmem:[#allocation4 + $0x100] sm:$0xff] }
  0xf5   : > { %1008 = vst [vmem:[#allocation4 + $0xd8] sm:$0xf] %v999_v38  ;;  %1009 = vst [vmem:[#allocation4 + $0xe0] sm:$0xf] %v1000_v39  ;;  %1192 = vmatprep.subr.mxu0 %v1142_v40  ;;  %v1161_v40 = vld [vmem:[%s8190_s30] sm:$0xf] }
  0xf6   : > { %s5952_s30 = smov 2  }
  0xf7   : > { %v941_v41 = vpop.permute.xlu0 %940  ;;  %v943_v42 = vpop.permute.xlu1 %942 }
  0xf8   : > { %v952_v44 = vsel %vm950_vm6, %v941_v41, %v943_v42  ;;  %v1141_v45 = vld [vmem:[#allocation4 + $0xc8] sm:$0xff] }
  0xf9   : > { %v1149_v46 = vld [vmem:[#allocation4 + $0x108] sm:$0xff]  ;;  %962 = vst [vmem:[#allocation4 + $0x80] sm:$0xf] %v952_v44  ;;  %1193 = vmatpush1.msra.mxu0 %v1141_v45 }
  0xfa   : > { %1261 = vmatprep.subr.mxu1 %v1149_v46  ;;  %1194 = vmatprep.subr.mxu0 %v1137_v43  ;;  %v1160_v43 = vld [vmem:[#allocation4 + $0x160] sm:$0xff] }
  0xfb   : > { %1262 = vmatpush1.msra.mxu1 %v1148_v48  ;;  %v939_v49 = vpop.permute.xlu0 %938  ;;  %v901_v50 = vpop.permute.xlu1 %900  ;;  %1195 = vmatpush1.msra.mxu0 %v1136_v47 }
  0xfc   : > { %v951_v51 = vsel %vm950_vm6, %v939_v49, %v941_v41  ;;  %v1144_v52 = vld [vmem:[#allocation4 + $0xe0] sm:$0xff]  ;;  %v1143_v53 = vld [vmem:[#allocation4 + $0xd8] sm:$0xff] }
  0xfd   : > { %961 = vst [vmem:[#allocation4 + $0x78] sm:$0xf] %v951_v51  ;;  %1263 = vmatprep.subr.mxu1 %v1144_v52  ;;  %v1155_v49 = vld [vmem:[#allocation4 + $0x138] sm:$0xff]  ;;  %v1145_v51 = vld [vmem:[#allocation4 + $0xe8] sm:$0xff]  ;;  %v1140_v52 = vld [vmem:[#allocation4 + $0xc0] sm:$0xff] }
  0xfe   : > { %1264 = vmatpush1.msra.mxu1 %v1143_v53 }
  0xff   : > { %v945_v56 = vpop.permute.xlu1 %944  ;;  %v903_v57 = vpop.permute.xlu0 %902  ;;  %1265 = vmatprep.subr.mxu1 %v1139_v54 }
 0x100   : > { %v953_v58 = vsel %vm950_vm6, %v943_v42, %v945_v56  ;;  %v912_v59 = vsel %vm910_vm7, %v901_v50, %v903_v57  ;;  %v1132_v60 = vld [vmem:[#allocation4 + $0x80] sm:$0xff]  ;;  %1266 = vmatpush1.msra.mxu1 %v1138_v55 }
 0x101   : > { %963 = vst [vmem:[#allocation4 + $0x88] sm:$0xf] %v953_v58  ;;  %922 = vst [vmem:[#allocation4 + $0x58] sm:$0xf] %v912_v59  ;;  %1196 = vmatprep.subr.mxu0 %v1132_v60  ;;  %v1498_v58 = vld [vmem:[#allocation3] sm:$0xf] }
 0x102   : > { %v1459_v59 = vld [vmem:[#allocation3] sm:$0xf]  ;;  %1510 = vrot.lane.b32.xlu1 %v1498_v58, %s5947_s29 }
 0x103   : > { %v899_v61 = vpop.permute.xlu1 %898  ;;  %v6309_v62 = vpop.permute.xlu0 %946  ;;  %v1420_v60 = vld [vmem:[#allocation3] sm:$0xf] }
 0x104   : > { %v911_v63 = vsel %vm910_vm7, %v899_v61, %v901_v50  ;;  %v954_v1 = vsel %vm950_vm6, %v945_v56, %v6309_v62  ;;  %v1131_v2 = vld [vmem:[#allocation4 + $0x78] sm:$0xff]  ;;  %v1150_v50 = vld [vmem:[#allocation4 + $0x110] sm:$0xff]  ;;  %v1385_v61 = vlaneseq }
 0x105   : > { %921 = vst [vmem:[#allocation4 + $0x50] sm:$0xf] %v911_v63  ;;  %964 = vst [vmem:[#allocation4 + $0x90] sm:$0xf] %v954_v1  ;;  %1197 = vmatpush1.msra.mxu0 %v1131_v2  ;;  %v790_v1 = vld [vmem:[%s8191_s23] sm:$0x1f] }
 0x106   : > { %1432 = vrot.lane.b32.xlu1 %v1420_v60, %s5949_s4  ;;  %s2118_s23 = sld [smem:[#allocation5]] }
 0x107   : > { %v861_v3 = vpop.permute.xlu0 %860  ;;  %v863_v4 = vpop.permute.xlu1 %862 }
 0x108   : > { %v872_v5 = vsel %vm870_vm8, %v861_v3, %v863_v4  ;;  %v1127_v6 = vld [vmem:[#allocation4 + $0x58] sm:$0xff]  ;;  %v1133_v13 = vld [vmem:[#allocation4 + $0x88] sm:$0xff] }
 0x109   : > { %882 = vst [vmem:[#allocation4 + $0x30] sm:$0xf] %v872_v5  ;;  %1198 = vmatprep.subr.mxu0 %v1127_v6 }
 0x10b   : > { %v905_v7 = vpop.permute.xlu0 %904  ;;  %v907_v8 = vpop.permute.xlu1 %906 }
 0x10c   : > { %v913_v9 = vsel %vm910_vm7, %v903_v57, %v905_v7  ;;  %v914_v10 = vsel %vm910_vm7, %v905_v7, %v907_v8  ;;  %v1126_v11 = vld [vmem:[#allocation4 + $0x50] sm:$0xff] }
 0x10d   : > { %v1134_v12 = vld [vmem:[#allocation4 + $0x90] sm:$0xff]  ;;  %923 = vst [vmem:[#allocation4 + $0x60] sm:$0xf] %v913_v9  ;;  %924 = vst [vmem:[#allocation4 + $0x68] sm:$0xf] %v914_v10  ;;  %1199 = vmatpush1.msra.mxu0 %v1126_v11 }
 0x10e   : > { %1267 = vmatprep.subr.mxu1 %v1134_v12  ;;  %v1537_v57 = vld [vmem:[#allocation3] sm:$0xf] }
 0x10f   : > { %1268 = vmatpush1.msra.mxu1 %v1133_v13  ;;  %v859_v14 = vpop.permute.xlu0 %858  ;;  %v821_v15 = vpop.permute.xlu1 %820  ;;  %1549 = vrot.lane.b32.xlu0 %v1537_v57, %s5946_s28 }
 0x110   : > { %v871_v16 = vsel %vm870_vm8, %v859_v14, %v861_v3  ;;  %v1122_v17 = vld [vmem:[#allocation4 + $0x30] sm:$0xff] }
 0x111   : > { %881 = vst [vmem:[#allocation4 + $0x28] sm:$0xf] %v871_v16  ;;  %1200 = vmatprep.subr.mxu0 %v1122_v17 }
 0x113   : > { %v865_v18 = vpop.permute.xlu1 %864  ;;  %v823_v19 = vpop.permute.xlu0 %822  ;;  %1471 = vrot.lane.b32.xlu0 %v1459_v59, %s5948_s0 }
 0x114   : > { %v873_v20 = vsel %vm870_vm8, %v863_v4, %v865_v18  ;;  %v832_v21 = vsel %vm830_vm9, %v821_v15, %v823_v19  ;;  %v1129_v22 = vld [vmem:[#allocation4 + $0x68] sm:$0xff]  ;;  %v1128_v23 = vld [vmem:[#allocation4 + $0x60] sm:$0xff] }
 0x115   : > { %883 = vst [vmem:[#allocation4 + $0x38] sm:$0xf] %v873_v20  ;;  %842 = vst [vmem:[#allocation4 + $0x8] sm:$0xf] %v832_v21  ;;  %1269 = vmatprep.subr.mxu1 %v1129_v22 }
 0x116   : > { %1270 = vmatpush1.msra.mxu1 %v1128_v23 }
 0x117   : > { %v819_v24 = vpop.permute.xlu1 %818  ;;  %v867_v25 = vpop.permute.xlu0 %866 }
 0x118   : > { %v831_v26 = vsel %vm830_vm9, %v819_v24, %v821_v15  ;;  %v874_v27 = vsel %vm870_vm8, %v865_v18, %v867_v25  ;;  %v1121_v28 = vld [vmem:[#allocation4 + $0x28] sm:$0xff] }
 0x119   : > { %841 = vst [vmem:[#allocation4] sm:$0xf] %v831_v26  ;;  %884 = vst [vmem:[#allocation4 + $0x40] sm:$0xf] %v874_v27  ;;  %1201 = vmatpush1.msra.mxu0 %v1121_v28 }
 0x11b   : > { %v827_v29 = vpop.permute.xlu1 %826  ;;  %v825_v30 = vpop.permute.xlu0 %824 }
 0x11c   : > { %v833_v31 = vsel %vm830_vm9, %v823_v19, %v825_v30  ;;  %v834_v32 = vsel %vm830_vm9, %v825_v30, %v827_v29  ;;  %v1117_v33 = vld [vmem:[#allocation4 + $0x8] sm:$0xff]  ;;  %v1123_v41 = vld [vmem:[#allocation4 + $0x38] sm:$0xff] }
 0x11d   : > { %843 = vst [vmem:[#allocation4 + $0x10] sm:$0xf] %v833_v31  ;;  %844 = vst [vmem:[#allocation4 + $0x18] sm:$0xf] %v834_v32  ;;  %1202 = vmatprep.subr.mxu0 %v1117_v33 }
 0x11f   : > { %v909_v34 = vpop.permute.xlu1 %908  ;;  %v949_v35 = vpop.permute.xlu0 %948 }
 0x120   : > { %v915_v36 = vsel %vm910_vm7, %v907_v8, %v909_v34  ;;  %v955_v37 = vsel %vm950_vm6, %v6309_v62, %v949_v35  ;;  %v1116_v38 = vld [vmem:[#allocation4] sm:$0xff]  ;;  %v1386_v62 = vshrl.u32 %v1385_v61, 7 }
 0x121   : > { %v1124_v39 = vld [vmem:[#allocation4 + $0x40] sm:$0xff]  ;;  %925 = vst.msk [vmem:[#allocation4 + $0x70] sm:$0xf] %vm804_vm0, %v915_v36  ;;  %965 = vst.msk [vmem:[#allocation4 + $0x98] sm:$0xf] %vm804_vm0, %v955_v37  ;;  %1203 = vmatpush1.msra.mxu0 %v1116_v38 }
 0x122   : > { %1271 = vmatprep.subr.mxu1 %v1124_v39  ;;  %5692 = vmatprep.subr.mxu0 %v5941_v0  ;;  %v1387_v63 = vsub.s32 0, %v1386_v62  ;;  %v1395_v4 = vsub.s32 2, %v1386_v62  ;;  %v1399_v8 = vsub.s32 3, %v1386_v62  ;;  %v1403_v22 = vsub.s32 4, %v1386_v62 }
 0x123   : > { %1272 = vmatpush1.msra.mxu1 %v1123_v41  ;;  %v829_v42 = vpop.permute.xlu1 %828  ;;  %5627 = vmatmul.mubr.msk.f32.vlgmr.msra.gmra.mxu0 %vm1168_vm10, %v1161_v40  ;;  %v869_v44 = vpop.permute.xlu0 %868 }
 0x124   : > { %v835_v45 = vsel %vm830_vm9, %v827_v29, %v829_v42  ;;  %5693 = vmatpush3.msra.mxu0 %v1160_v43  ;;  %v875_v46 = vsel %vm870_vm8, %v867_v25, %v869_v44  ;;  %v1119_v47 = vld [vmem:[#allocation4 + $0x18] sm:$0xff]  ;;  %v1118_v48 = vld [vmem:[#allocation4 + $0x10] sm:$0xff]  ;;  %5710 = vmatprep.mubr.msk.f32.mxu0 %vm5951_vm11, %v5941_v0  ;;  %v6359_v3 = vrot.slane %v790_v1, %v1387_v63 }
 0x125   : > { %845 = vst.msk [vmem:[#allocation4 + $0x20] sm:$0xf] %vm804_vm0, %v835_v45  ;;  %885 = vst.msk [vmem:[#allocation4 + $0x48] sm:$0xf] %vm804_vm0, %v875_v46  ;;  %5694 = vmatprep.subr.mxu0 %v5941_v0  ;;  %1273 = vmatprep.subr.mxu1 %v1119_v47  ;;  %v6364_v12 = vrot.slane %v790_v1, %v1395_v4  ;;  %v6367_v16 = vrot.slane %v790_v1, %v1399_v8 }
 0x126   : > { %5695 = vmatpush3.msra.mxu0 %v1155_v49  ;;  %1274 = vmatpush1.msra.mxu1 %v1118_v48  ;;  %v6372_v26 = vrot.slane %v790_v1, %v1403_v22 }
 0x127   : > { %5696 = vmatprep.subr.mxu0 %v5941_v0  ;;  %5628 = vmatmul.mubr.msk.f32.vlgmr.msra.gmra.mxu1 %vm1168_vm10, %v1161_v40  ;;  %8192 = vst [vmem:[#allocation8_spill] sm:$0xff] %v6364_v12  ;;  %8193 = vst [vmem:[#allocation9_spill] sm:$0xff] %v6367_v16 }
 0x128   : > { %5697 = vmatpush3.msra.mxu0 %v1150_v50  ;;  %1841 = vmatprep.mubr.f32.mxu1 %v5941_v0  ;;  %v1135_v53 = vld [vmem:[#allocation4 + $0x98] sm:$0xff]  ;;  %v1130_v54 = vld [vmem:[#allocation4 + $0x70] sm:$0xff]  ;;  %8194 = vst [vmem:[#allocation10_spill] sm:$0xff] %v6372_v26 }
 0x129   : > { %5698 = vmatprep.subr.mxu0 %v5941_v0 }
 0x12a   : > { %5699 = vmatpush3.msra.mxu0 %v1145_v51 }
 0x12b   : > { %5700 = vmatprep.subr.mxu0 %v5941_v0 }
 0x12c   : > { %5701 = vmatpush3.msra.mxu0 %v1140_v52  ;;  %v1125_v55 = vld [vmem:[#allocation4 + $0x48] sm:$0xff]  ;;  %v1120_v56 = vld [vmem:[#allocation4 + $0x20] sm:$0xff] }
 0x12d   : > { %5702 = vmatprep.subr.mxu0 %v5941_v0 }
 0x12e   : > { %5703 = vmatpush3.msra.mxu0 %v1135_v53 }
 0x12f   : > { %5704 = vmatprep.subr.mxu0 %v5941_v0 }
 0x130   : > { %5705 = vmatpush3.msra.mxu0 %v1130_v54  ;;  %v1166_v2 = vpop.permute.xlu0 %1165 }
 0x131   : > { %5706 = vmatprep.subr.mxu0 %v5941_v0 }
 0x132   : > { %5707 = vmatpush3.msra.mxu0 %v1125_v55 }
 0x133   : > { %5708 = vmatprep.subr.mxu0 %v5941_v0 }
 0x134   : > { %5709 = vmatpush3.msra.mxu0 %v1120_v56 }
 0x135   : > { %5711 = vmatmul.mubr.msk.f32.vlgmr.msra.gmra.mxu0 %vm1168_vm10, %v1161_v40 }
 0x136   : > { %1912 = vmatprep.mubr.f32.mxu0 %v5941_v0  ;;  %v1391_v0 = vsub.s32 1, %v1386_v62 }
 0x138   : > { %v6361_v7 = vrot.slane %v790_v1, %v1391_v0 }
 0x1e3   : > { %v1238_v5 = vpop.f32.mrf.mxu0 }
 0x1e4   : > { %v1239_v6 = vadd.f32 %v1238_v5, %v1166_v2 }
 0x1e5   : > { %v1240_v9 = vpop.f32.mrf.mxu0 }
 0x1e6   : > { %v1410_v10 = vmul.f32 %v6359_v3, %v1239_v6  ;;  %v1241_v11 = vadd.f32 %v1240_v9, %v1166_v2  ;;  %v1768_v6 = vld [vmem:[%s8161_s6] sm:$0xf] }
 0x1e7   : > { %v1309_v13 = vpop.f32.mrf.mxu1  ;;  %v2107_v9 = vld [vmem:[%s8163_s8] sm:$0xf] }
 0x1e8   : > { %1415 = vst [vmem:[#allocation3 + $0x8] sm:$0xf] %v1410_v10  ;;  %v1411_v14 = vmul.f32 %v6361_v7, %v1241_v11  ;;  %v1310_v15 = vadd.f32 %v1309_v13, %v1166_v2  ;;  %v2096_v13 = vld [vmem:[%s8162_s7] sm:$0xf] }
 0x1e9   : > { %v1311_v17 = vpop.f32.mrf.mxu1 }
 0x1ea   : > { %1416 = vst [vmem:[#allocation3 + $0x10] sm:$0xf] %v1411_v14  ;;  %v1412_v18 = vmul.f32 %v6364_v12, %v1310_v15  ;;  %v1312_v19 = vadd.f32 %v1311_v17, %v1166_v2  ;;  %v1550_v14 = vpop.permute.xlu0 %1549  ;;  %v1511_v15 = vpop.permute.xlu1 %1510 }
 0x1ec   : > { %1417 = vst [vmem:[#allocation3 + $0x18] sm:$0xf] %v1412_v18  ;;  %v1413_v20 = vmul.f32 %v6367_v16, %v1312_v19 }
 0x1ee   : > { %1418 = vst [vmem:[#allocation3 + $0x20] sm:$0xf] %v1413_v20  ;;  %v1472_v17 = vpop.permute.xlu0 %1471  ;;  %v1433_v18 = vpop.permute.xlu1 %1432 }
 0x1ef   : > { %v1688_v21 = vld [vmem:[#allocation3 + $0x8] sm:$0xf] }
 0x1f0   : > { %1698 = vrot.lane.b32.xlu0 %v1688_v21, %s5942_s24  ;;  %v1654_v29 = vld [vmem:[#allocation3 + $0x8] sm:$0xf] }
 0x1f1   : > { %v1620_v30 = vld [vmem:[#allocation3 + $0x8] sm:$0xf]  ;;  %v1577_v33 = vld [vmem:[#allocation3 + $0x10] sm:$0xf] }
 0x1f2   : > { %v1576_v34 = vld [vmem:[#allocation3 + $0x8] sm:$0xf]  ;;  %1582 = vst [vmem:[#allocation4 + $0xa8] sm:$0xf] %v1577_v33  ;;  %v1621_v45 = vld [vmem:[#allocation3 + $0x10] sm:$0xf] }
 0x1f3   : > { %v1578_v23 = vld [vmem:[#allocation3 + $0x18] sm:$0xf]  ;;  %1581 = vst [vmem:[#allocation4 + $0xa0] sm:$0xf] %v1576_v34  ;;  %v1586_v38 = vld [vmem:[#allocation3 + $0x8] sm:$0xf] }
 0x1f4   : > { %v1690_v24 = vld [vmem:[#allocation3 + $0x18] sm:$0xf]  ;;  %1583 = vst [vmem:[#allocation4 + $0xb0] sm:$0xf] %v1578_v23  ;;  %v1538_v39 = vld [vmem:[#allocation3 + $0x8] sm:$0xf] }
 0x1f5   : > { %v1656_v25 = vld [vmem:[#allocation3 + $0x18] sm:$0xf]  ;;  %1702 = vrot.lane.b32.xlu1 %v1690_v24, %s5942_s24  ;;  %v1380_v27 = vpop.f32.mrf.mxu0  ;;  %v1579_v35 = vld [vmem:[#allocation3 + $0x20] sm:$0xf]  ;;  %v1499_v41 = vld [vmem:[#allocation3 + $0x8] sm:$0xf] }
 0x1f6   : > { %1668 = vrot.lane.b32.xlu0 %v1656_v25, %s5943_s26  ;;  %v1381_v28 = vadd.f32 %v1380_v27, %v1166_v2  ;;  %v1622_v36 = vld [vmem:[#allocation3 + $0x18] sm:$0xf]  ;;  %1584 = vst [vmem:[#allocation4 + $0xb8] sm:$0xf] %v1579_v35  ;;  %v1460_v42 = vld [vmem:[#allocation3 + $0x8] sm:$0xf] }
 0x1f7   : > { %v5712_v31 = vpop.f32.mrf.mxu0  ;;  %v1588_v37 = vld [vmem:[#allocation3 + $0x18] sm:$0xf]  ;;  %v1421_v44 = vld [vmem:[#allocation3 + $0x8] sm:$0xf]  ;;  %v1689_v46 = vld [vmem:[#allocation3 + $0x10] sm:$0xf] }
 0x1f8   : > { %v1414_v32 = vmul.f32 %v6372_v26, %v1381_v28  ;;  %v1540_v43 = vld [vmem:[#allocation3 + $0x18] sm:$0xf]  ;;  %v1500_v47 = vld [vmem:[#allocation3 + $0x10] sm:$0xf]  ;;  %v1657_v51 = vld [vmem:[#allocation3 + $0x20] sm:$0xf] }
 0x1f9   : > { %1664 = vrot.lane.b32.xlu1 %v1654_v29, %s5943_s26  ;;  %v1655_v48 = vld [vmem:[#allocation3 + $0x10] sm:$0xf]  ;;  %v1623_v53 = vld [vmem:[#allocation3 + $0x20] sm:$0xf]  ;;  %v1501_v59 = vld [vmem:[#allocation3 + $0x18] sm:$0xf] }
 0x1fa   : > { %1630 = vrot.lane.b32.xlu0 %v1620_v30, %s5944_s27  ;;  %1419 = vst.msk [vmem:[#allocation3 + $0x28] sm:$0xf] %vm804_vm0, %v1414_v32  ;;  %v1422_v49 = vld [vmem:[#allocation3 + $0x10] sm:$0xf]  ;;  %v1589_v55 = vld [vmem:[#allocation3 + $0x20] sm:$0xf] }
 0x1fb   : > { %v1587_v50 = vld [vmem:[#allocation3 + $0x10] sm:$0xf]  ;;  %v1691_v56 = vld [vmem:[#allocation3 + $0x20] sm:$0xf]  ;;  %v1423_v63 = vld [vmem:[#allocation3 + $0x18] sm:$0xf] }
 0x1fc   : > { %v1539_v52 = vld [vmem:[#allocation3 + $0x10] sm:$0xf]  ;;  %v1541_v58 = vld [vmem:[#allocation3 + $0x20] sm:$0xf]  ;;  %v1462_v5 = vld [vmem:[#allocation3 + $0x18] sm:$0xf] }
 0x1fd   : > { %1634 = vrot.lane.b32.xlu1 %v1622_v36, %s5944_s27  ;;  %v1461_v54 = vld [vmem:[#allocation3 + $0x10] sm:$0xf]  ;;  %v1502_v60 = vld [vmem:[#allocation3 + $0x20] sm:$0xf] }
 0x1fe   : > { %1600 = vrot.lane.b32.xlu0 %v1588_v37, %s5945_s3  ;;  %v1463_v61 = vld [vmem:[#allocation3 + $0x20] sm:$0xf] }
 0x1ff   : > { %v1424_v8 = vld [vmem:[#allocation3 + $0x20] sm:$0xf] }
 0x201   : > { %1596 = vrot.lane.b32.xlu1 %v1586_v38, %s5945_s3  ;;  %v1580_v40 = vld [vmem:[#allocation3 + $0x28] sm:$0xf] }
 0x202   : > { %1551 = vrot.lane.b32.xlu0 %v1538_v39, %s5946_s28  ;;  %1585 = vst.msk [vmem:[#allocation4 + $0xc0] sm:$0xf] %vm804_vm0, %v1580_v40  ;;  %v1692_v57 = vld [vmem:[#allocation3 + $0x28] sm:$0xf] }
 0x203   : > { %v1658_v62 = vld [vmem:[#allocation3 + $0x28] sm:$0xf] }
 0x204   : > { %v1624_v1 = vld [vmem:[#allocation3 + $0x28] sm:$0xf] }
 0x205   : > { %1512 = vrot.lane.b32.xlu1 %v1499_v41, %s5947_s29  ;;  %v1542_v0 = vld [vmem:[#allocation3 + $0x28] sm:$0xf] }
 0x206   : > { %1473 = vrot.lane.b32.xlu0 %v1460_v42, %s5948_s0  ;;  %v1590_v2 = vld [vmem:[#allocation3 + $0x28] sm:$0xf] }
 0x207   : > { %v1464_v4 = vld [vmem:[#allocation3 + $0x28] sm:$0xf] }
 0x208   : > { %v1503_v10 = vld [vmem:[#allocation3 + $0x28] sm:$0xf] }
 0x209   : > { %1434 = vrot.lane.b32.xlu1 %v1421_v44, %s5949_s4  ;;  %v1425_v11 = vld [vmem:[#allocation3 + $0x28] sm:$0xf] }
 0x20a   : > { %1555 = vrot.lane.b32.xlu0 %v1540_v43, %s5946_s28 }
 0x20d   : > { %1700 = vrot.lane.b32.xlu1 %v1689_v46, %s5942_s24 }
 0x20e   : > { %1632 = vrot.lane.b32.xlu0 %v1621_v45, %s5944_s27 }
 0x211   : > { %1666 = vrot.lane.b32.xlu1 %v1655_v48, %s5943_s26 }
 0x212   : > { %1514 = vrot.lane.b32.xlu0 %v1500_v47, %s5947_s29 }
 0x215   : > { %1598 = vrot.lane.b32.xlu1 %v1587_v50, %s5945_s3 }
 0x216   : > { %1436 = vrot.lane.b32.xlu0 %v1422_v49, %s5949_s4 }
 0x219   : > { %1553 = vrot.lane.b32.xlu1 %v1539_v52, %s5946_s28 }
 0x21a   : > { %1670 = vrot.lane.b32.xlu0 %v1657_v51, %s5943_s26 }
 0x21d   : > { %1475 = vrot.lane.b32.xlu1 %v1461_v54, %s5948_s0 }
 0x21e   : > { %1636 = vrot.lane.b32.xlu0 %v1623_v53, %s5944_s27 }
 0x221   : > { %1704 = vrot.lane.b32.xlu1 %v1691_v56, %s5942_s24 }
 0x222   : > { %1602 = vrot.lane.b32.xlu0 %v1589_v55, %s5945_s3 }
 0x225   : > { %1557 = vrot.lane.b32.xlu1 %v1541_v58, %s5946_s28 }
 0x226   : > { %1706 = vrot.lane.b32.xlu0 %v1692_v57, %s5942_s24  ;;  %s5777_s24 = smul.u32 80, %s8200_s25  ;;  %s5955_s25 = smov 78  }
 0x228   : > { %s6590_s1 = scalar_lea.vmem %s8176_s21, %s5777_s24  ;;  %s5965_s24 = smov 96  }
 0x229   : > { %1518 = vrot.lane.b32.xlu1 %v1502_v60, %s5947_s29 }
 0x22a   : > { %1516 = vrot.lane.b32.xlu0 %v1501_v59, %s5947_s29 }
 0x22d   : > { %1672 = vrot.lane.b32.xlu1 %v1658_v62, %s5943_s26  ;;  %s5966_s26 = smov 100  }
 0x22e   : > { %1479 = vrot.lane.b32.xlu0 %v1463_v61, %s5948_s0 }
 0x231   : > { %1638 = vrot.lane.b32.xlu1 %v1624_v1, %s5944_s27 }
 0x232   : > { %1438 = vrot.lane.b32.xlu0 %v1423_v63, %s5949_s4 }
 0x235   : > { %1604 = vrot.lane.b32.xlu1 %v1590_v2, %s5945_s3  ;;  %s5956_s3 = smov 80  }
 0x236   : > { %1559 = vrot.lane.b32.xlu0 %v1542_v0, %s5946_s28  ;;  %s5957_s28 = smov 82  }
 0x239   : > { %1477 = vrot.lane.b32.xlu1 %v1462_v5, %s5948_s0 }
 0x23a   : > { %1481 = vrot.lane.b32.xlu0 %v1464_v4, %s5948_s0  ;;  %s5959_s0 = smov 50  }
 0x23d   : > { %1440 = vrot.lane.b32.xlu1 %v1424_v8, %s5949_s4  ;;  %v1743_v8 = vld [vmem:[#allocation4 + $0xa8] sm:$0xff] }
 0x23e   : > { %1771 = vperm.xlu0 %5824, %v1768_v6  }
 0x241   : > { %1520 = vrot.lane.b32.xlu1 %v1503_v10, %s5947_s29  ;;  %s5958_s29 = smov 126  }
 0x242   : > { %2110 = vperm.xlu0 %5824, %v2107_v9  }
 0x245   : > { %1442 = vrot.lane.b32.xlu1 %v1425_v11, %s5949_s4  ;;  %v1742_v11 = vld [vmem:[#allocation4 + $0xa0] sm:$0xff]  ;;  %s8195_s4 = sld [smem:[#allocation16_spill]] }
 0x249   : > { %2099 = vperm.xlu1 %5825, %v2096_v13  }
 0x262   : > { %v1699_v19 = vpop.permute.xlu0 %1698 }
 0x267   : > { %v6425_v20 = vpop.permute.xlu1 %1702 }
 0x268   : > { %v1669_v21 = vpop.permute.xlu0 %1668 }
 0x26b   : > { %v1665_v22 = vpop.permute.xlu1 %1664 }
 0x26c   : > { %v1631_v23 = vpop.permute.xlu0 %1630 }
 0x26f   : > { %v6427_v24 = vpop.permute.xlu1 %1634 }
 0x270   : > { %v6429_v25 = vpop.permute.xlu0 %1600 }
 0x273   : > { %v1597_v27 = vpop.permute.xlu1 %1596 }
 0x274   : > { %v1552_v28 = vpop.permute.xlu0 %1551 }
 0x275   : > { %v1561_v29 = vsel %vm950_vm6, %v1550_v14, %v1552_v28 }
 0x276   : > { %1571 = vst [vmem:[#allocation4 + $0x78] sm:$0xf] %v1561_v29 }
 0x277   : > { %v1513_v30 = vpop.permute.xlu1 %1512 }
 0x278   : > { %v1474_v31 = vpop.permute.xlu0 %1473  ;;  %v1522_v32 = vsel %vm910_vm7, %v1511_v15, %v1513_v30 }
 0x279   : > { %v1483_v33 = vsel %vm870_vm8, %v1472_v17, %v1474_v31  ;;  %1532 = vst [vmem:[#allocation4 + $0x50] sm:$0xf] %v1522_v32 }
 0x27a   : > { %1493 = vst [vmem:[#allocation4 + $0x28] sm:$0xf] %v1483_v33 }
 0x27b   : > { %v1435_v34 = vpop.permute.xlu1 %1434 }
 0x27c   : > { %v6434_v35 = vpop.permute.xlu0 %1555  ;;  %v1444_v36 = vsel %vm830_vm9, %v1433_v18, %v1435_v34 }
 0x27d   : > { %1454 = vst [vmem:[#allocation4] sm:$0xf] %v1444_v36  ;;  %v1737_v17 = vld [vmem:[#allocation4 + $0x78] sm:$0xff] }
 0x27f   : > { %v1701_v37 = vpop.permute.xlu1 %1700 }
 0x280   : > { %v1633_v38 = vpop.permute.xlu0 %1632  ;;  %v1708_v39 = vsel %vm1101_vm2, %v1699_v19, %v1701_v37  ;;  %v1709_v40 = vsel %vm1101_vm2, %v1701_v37, %v6425_v20 }
 0x281   : > { %v1640_v41 = vsel %vm1031_vm4, %v1631_v23, %v1633_v38  ;;  %v1641_v42 = vsel %vm1031_vm4, %v1633_v38, %v6427_v24  ;;  %1717 = vst [vmem:[#allocation4 + $0x140] sm:$0xf] %v1708_v39  ;;  %1718 = vst [vmem:[#allocation4 + $0x148] sm:$0xf] %v1709_v40 }
 0x282   : > { %1649 = vst [vmem:[#allocation4 + $0xf0] sm:$0xf] %v1640_v41  ;;  %1650 = vst [vmem:[#allocation4 + $0xf8] sm:$0xf] %v1641_v42 }
 0x283   : > { %v1667_v43 = vpop.permute.xlu1 %1666 }
 0x284   : > { %v6443_v44 = vpop.permute.xlu0 %1514  ;;  %v1674_v45 = vsel %vm1066_vm3, %v1665_v22, %v1667_v43  ;;  %v1675_v46 = vsel %vm1066_vm3, %v1667_v43, %v1669_v21  ;;  %v1732_v22 = vld [vmem:[#allocation4 + $0x50] sm:$0xff] }
 0x285   : > { %v1523_v47 = vsel %vm910_vm7, %v1513_v30, %v6443_v44  ;;  %1683 = vst [vmem:[#allocation4 + $0x118] sm:$0xf] %v1674_v45  ;;  %1684 = vst [vmem:[#allocation4 + $0x120] sm:$0xf] %v1675_v46 }
 0x286   : > { %1533 = vst [vmem:[#allocation4 + $0x58] sm:$0xf] %v1523_v47 }
 0x287   : > { %v1599_v48 = vpop.permute.xlu1 %1598 }
 0x288   : > { %v6449_v49 = vpop.permute.xlu0 %1436  ;;  %v1606_v50 = vsel %vm996_vm5, %v1597_v27, %v1599_v48  ;;  %v1607_v51 = vsel %vm996_vm5, %v1599_v48, %v6429_v25  ;;  %v1763_v53 = vld [vmem:[#allocation4 + $0x148] sm:$0xff]  ;;  %v1762_v54 = vld [vmem:[#allocation4 + $0x140] sm:$0xff] }
 0x289   : > { %v1445_v52 = vsel %vm830_vm9, %v1435_v34, %v6449_v49  ;;  %1615 = vst [vmem:[#allocation4 + $0xc8] sm:$0xf] %v1606_v50  ;;  %1616 = vst [vmem:[#allocation4 + $0xd0] sm:$0xf] %v1607_v51  ;;  %1791 = vmatprep.subr.mxu1 %v1763_v53  ;;  %v1753_v62 = vld [vmem:[#allocation4 + $0xf8] sm:$0xff]  ;;  %v1752_v0 = vld [vmem:[#allocation4 + $0xf0] sm:$0xff] }
 0x28a   : > { %1455 = vst [vmem:[#allocation4 + $0x8] sm:$0xf] %v1445_v52  ;;  %1792 = vmatpush1.msra.mxu1 %v1762_v54  ;;  %v6496_v34 = vld [vmem:[#allocation2] sm:$0xff] }
 0x28b   : > { %v1554_v55 = vpop.permute.xlu1 %1553  ;;  %2293 = vrot.lane.b32.xlu1 %v6496_v34, %s5952_s30  ;;  %2253 = vrot.lane.b32.xlu0 %v6496_v34, %s5953_s5 }
 0x28c   : > { %v6456_v56 = vpop.permute.xlu0 %1670  ;;  %v1562_v57 = vsel %vm950_vm6, %v1552_v28, %v1554_v55  ;;  %v1563_v58 = vsel %vm950_vm6, %v1554_v55, %v6434_v35  ;;  %v1758_v60 = vld [vmem:[#allocation4 + $0x120] sm:$0xff]  ;;  %v1757_v61 = vld [vmem:[#allocation4 + $0x118] sm:$0xff] }
 0x28d   : > { %v1676_v59 = vsel %vm1066_vm3, %v1669_v21, %v6456_v56  ;;  %1572 = vst [vmem:[#allocation4 + $0x80] sm:$0xf] %v1562_v57  ;;  %1573 = vst [vmem:[#allocation4 + $0x88] sm:$0xf] %v1563_v58  ;;  %1793 = vmatprep.subr.mxu1 %v1758_v60  ;;  %v1733_v18 = vld [vmem:[#allocation4 + $0x58] sm:$0xff] }
 0x28e   : > { %1685 = vst [vmem:[#allocation4 + $0x128] sm:$0xf] %v1676_v59  ;;  %1794 = vmatpush1.msra.mxu1 %v1757_v61  ;;  %v6486_v28 = vld [vmem:[%s8195_s4] sm:$0xf] }
 0x28f   : > { %v6463_v63 = vpop.permute.xlu1 %1475  ;;  %1795 = vmatprep.subr.mxu1 %v1753_v62  ;;  %2213 = vrot.lane.b32.xlu1 %v6496_v34, %s5954_s22 }
 0x290   : > { %v6465_v1 = vpop.permute.xlu0 %1636  ;;  %v1484_v2 = vsel %vm870_vm8, %v1474_v31, %v6463_v63  ;;  %1796 = vmatpush1.msra.mxu1 %v1752_v0  ;;  %v1748_v5 = vld [vmem:[#allocation4 + $0xd0] sm:$0xff]  ;;  %v1747_v6 = vld [vmem:[#allocation4 + $0xc8] sm:$0xff]  ;;  %v1722_v31 = vld [vmem:[#allocation4] sm:$0xff] }
 0x291   : > { %v1642_v4 = vsel %vm1031_vm4, %v6427_v24, %v6465_v1  ;;  %1494 = vst [vmem:[#allocation4 + $0x30] sm:$0xf] %v1484_v2  ;;  %1797 = vmatprep.subr.mxu1 %v1748_v5  ;;  %v1723_v27 = vld [vmem:[#allocation4 + $0x8] sm:$0xff]  ;;  %v1746_v0 = vld [vmem:[#allocation4 + $0xc0] sm:$0xff]  ;;  %v1745_v2 = vld [vmem:[#allocation4 + $0xb8] sm:$0xff] }
 0x292   : > { %1651 = vst [vmem:[#allocation4 + $0x100] sm:$0xf] %v1642_v4  ;;  %1798 = vmatpush1.msra.mxu1 %v1747_v6  ;;  %v1744_v5 = vld [vmem:[#allocation4 + $0xb0] sm:$0xff] }
 0x293   : > { %v1705_v9 = vpop.permute.xlu1 %1704  ;;  %1799 = vmatprep.subr.mxu1 %v1743_v8 }
 0x294   : > { %v6472_v10 = vpop.permute.xlu0 %1602  ;;  %v1710_v13 = vsel %vm1101_vm2, %v6425_v20, %v1705_v9  ;;  %1800 = vmatpush1.msra.mxu1 %v1742_v11  ;;  %v1738_v15 = vld [vmem:[#allocation4 + $0x80] sm:$0xff] }
 0x295   : > { %v1608_v14 = vsel %vm996_vm5, %v6429_v25, %v6472_v10  ;;  %1719 = vst [vmem:[#allocation4 + $0x150] sm:$0xf] %v1710_v13  ;;  %1801 = vmatprep.subr.mxu1 %v1738_v15  ;;  %v1727_v25 = vld [vmem:[#allocation4 + $0x28] sm:$0xff] }
 0x296   : > { %1617 = vst [vmem:[#allocation4 + $0xd8] sm:$0xf] %v1608_v14  ;;  %1802 = vmatpush1.msra.mxu1 %v1737_v17  ;;  %v1759_v52 = vld [vmem:[#allocation4 + $0x128] sm:$0xff] }
 0x297   : > { %v1558_v19 = vpop.permute.xlu1 %1557  ;;  %1803 = vmatprep.subr.mxu1 %v1733_v18 }
 0x298   : > { %v1707_v21 = vpop.permute.xlu0 %1706  ;;  %v1564_v23 = vsel %vm950_vm6, %v6434_v35, %v1558_v19  ;;  %1804 = vmatpush1.msra.mxu1 %v1732_v22  ;;  %v1728_v24 = vld [vmem:[#allocation4 + $0x30] sm:$0xff] }
 0x299   : > { %v1711_v20 = vsel %vm1101_vm2, %v1705_v9, %v1707_v21  ;;  %1721 = vst.msk [vmem:[#allocation4 + $0x160] sm:$0xf] %vm804_vm0, %v1707_v21  ;;  %1574 = vst [vmem:[#allocation4 + $0x90] sm:$0xf] %v1564_v23  ;;  %1805 = vmatprep.subr.mxu1 %v1728_v24  ;;  %v1754_v59 = vld [vmem:[#allocation4 + $0x100] sm:$0xff] }
 0x29a   : > { %1720 = vst [vmem:[#allocation4 + $0x158] sm:$0xf] %v1711_v20  ;;  %1806 = vmatpush1.msra.mxu1 %v1727_v25 }
 0x29b   : > { %v6488_v29 = vpop.permute.xlu1 %1518  ;;  %1807 = vmatprep.subr.mxu1 %v1723_v27 }
 0x29c   : > { %v1517_v30 = vpop.permute.xlu0 %1516  ;;  %1808 = vmatpush1.msra.mxu1 %v1722_v31  ;;  %v1764_v40 = vld [vmem:[#allocation4 + $0x150] sm:$0xff] }
 0x29d   : > { %v1524_v32 = vsel %vm910_vm7, %v6443_v44, %v1517_v30  ;;  %v1525_v33 = vsel %vm910_vm7, %v1517_v30, %v6488_v29  ;;  %5630 = vmatmul.mubr.msk.f32.vlgmr.msra.gmra.mxu1 %vm1168_vm10, %v6486_v28  ;;  %5713 = vmatprep.subr.mxu1 %v6496_v34 }
 0x29e   : > { %1534 = vst [vmem:[#allocation4 + $0x60] sm:$0xf] %v1524_v32  ;;  %1535 = vst [vmem:[#allocation4 + $0x68] sm:$0xf] %v1525_v33  ;;  %5731 = vmatprep.mubr.msk.f32.mxu1 %vm5951_vm11, %v6496_v34 }
 0x29f   : > { %v1673_v35 = vpop.permute.xlu1 %1672 }
 0x2a0   : > { %v1480_v36 = vpop.permute.xlu0 %1479  ;;  %v1766_v37 = vld [vmem:[#allocation4 + $0x160] sm:$0xff]  ;;  %v1677_v38 = vsel %vm1066_vm3, %v6456_v56, %v1673_v35  ;;  %1687 = vst.msk [vmem:[#allocation4 + $0x138] sm:$0xf] %vm804_vm0, %v1673_v35  ;;  %v1740_v9 = vld [vmem:[#allocation4 + $0x90] sm:$0xff] }
 0x2a1   : > { %5714 = vmatpush3.msra.mxu1 %v1766_v37  ;;  %v1765_v39 = vld [vmem:[#allocation4 + $0x158] sm:$0xff]  ;;  %1686 = vst [vmem:[#allocation4 + $0x130] sm:$0xf] %v1677_v38 }
 0x2a2   : > { %1862 = vmatprep.subr.mxu0 %v1765_v39  ;;  %5715 = vmatprep.subr.mxu1 %v6496_v34 }
 0x2a3   : > { %1863 = vmatpush1.msra.mxu0 %v1764_v40  ;;  %v1639_v41 = vpop.permute.xlu1 %1638 }
 0x2a4   : > { %v1439_v42 = vpop.permute.xlu0 %1438  ;;  %v1643_v43 = vsel %vm1031_vm4, %v6465_v1, %v1639_v41  ;;  %1653 = vst.msk [vmem:[#allocation4 + $0x110] sm:$0xf] %vm804_vm0, %v1639_v41  ;;  %v1749_v1 = vld [vmem:[#allocation4 + $0xd8] sm:$0xff]  ;;  %vm2159_vm4 = vcmask 523268  }
 0x2a5   : > { %v1446_v44 = vsel %vm830_vm9, %v6449_v49, %v1439_v42  ;;  %1652 = vst [vmem:[#allocation4 + $0x108] sm:$0xf] %v1643_v43  ;;  %v1735_v11 = vld [vmem:[#allocation4 + $0x68] sm:$0xff]  ;;  %v1734_v14 = vld [vmem:[#allocation4 + $0x60] sm:$0xff] }
 0x2a6   : > { %1456 = vst [vmem:[#allocation4 + $0x10] sm:$0xf] %v1446_v44 }
 0x2a7   : > { %v1605_v45 = vpop.permute.xlu1 %1604  ;;  %v1761_v47 = vld [vmem:[#allocation4 + $0x138] sm:$0xff] }
 0x2a8   : > { %v1560_v46 = vpop.permute.xlu0 %1559  ;;  %v1609_v48 = vsel %vm996_vm5, %v6472_v10, %v1605_v45  ;;  %1619 = vst.msk [vmem:[#allocation4 + $0xe8] sm:$0xf] %vm804_vm0, %v1605_v45  ;;  %5716 = vmatpush3.msra.mxu1 %v1761_v47  ;;  %v1760_v51 = vld [vmem:[#allocation4 + $0x130] sm:$0xff]  ;;  %v1739_v10 = vld [vmem:[#allocation4 + $0x88] sm:$0xff]  ;;  %vm2456_vm5 = vcmask 637952  }
 0x2a9   : > { %v1565_v50 = vsel %vm950_vm6, %v1558_v19, %v1560_v46  ;;  %1618 = vst [vmem:[#allocation4 + $0xe0] sm:$0xf] %v1609_v48  ;;  %1864 = vmatprep.subr.mxu0 %v1760_v51  ;;  %5717 = vmatprep.subr.mxu1 %v6496_v34  ;;  %vm2421_vm6 = vcmask 654336  }
 0x2aa   : > { %1575 = vst.msk [vmem:[#allocation4 + $0x98] sm:$0xf] %vm804_vm0, %v1565_v50  ;;  %1865 = vmatpush1.msra.mxu0 %v1759_v52 }
 0x2ab   : > { %v1478_v49 = vpop.permute.xlu1 %1477  ;;  %v1756_v54 = vld [vmem:[#allocation4 + $0x110] sm:$0xff] }
 0x2ac   : > { %v1482_v53 = vpop.permute.xlu0 %1481  ;;  %v1485_v55 = vsel %vm870_vm8, %v6463_v63, %v1478_v49  ;;  %v1486_v56 = vsel %vm870_vm8, %v1478_v49, %v1480_v36  ;;  %5718 = vmatpush3.msra.mxu1 %v1756_v54  ;;  %v1755_v58 = vld [vmem:[#allocation4 + $0x108] sm:$0xff] }
 0x2ad   : > { %v1487_v57 = vsel %vm870_vm8, %v1480_v36, %v1482_v53  ;;  %1495 = vst [vmem:[#allocation4 + $0x38] sm:$0xf] %v1485_v55  ;;  %1496 = vst [vmem:[#allocation4 + $0x40] sm:$0xf] %v1486_v56  ;;  %1866 = vmatprep.subr.mxu0 %v1755_v58  ;;  %5719 = vmatprep.subr.mxu1 %v6496_v34  ;;  %v1724_v21 = vld [vmem:[#allocation4 + $0x10] sm:$0xff]  ;;  %vm2351_vm8 = vcmask 1031168  }
 0x2ae   : > { %1497 = vst.msk [vmem:[#allocation4 + $0x48] sm:$0xf] %vm804_vm0, %v1487_v57  ;;  %1867 = vmatpush1.msra.mxu0 %v1754_v59 }
 0x2af   : > { %v1441_v60 = vpop.permute.xlu1 %1440  ;;  %v1751_v61 = vld [vmem:[#allocation4 + $0xe8] sm:$0xff] }
 0x2b0   : > { %v1447_v62 = vsel %vm830_vm9, %v1439_v42, %v1441_v60  ;;  %5720 = vmatpush3.msra.mxu1 %v1751_v61  ;;  %v1750_v63 = vld [vmem:[#allocation4 + $0xe0] sm:$0xff] }
 0x2b1   : > { %1457 = vst [vmem:[#allocation4 + $0x18] sm:$0xf] %v1447_v62  ;;  %1868 = vmatprep.subr.mxu0 %v1750_v63  ;;  %5721 = vmatprep.subr.mxu1 %v6496_v34  ;;  %v1741_v6 = vld [vmem:[#allocation4 + $0x98] sm:$0xff] }
 0x2b2   : > { %1869 = vmatpush1.msra.mxu0 %v1749_v1  ;;  %5722 = vmatpush3.msra.mxu1 %v1746_v0 }
 0x2b3   : > { %v1521_v4 = vpop.permute.xlu1 %1520  ;;  %1870 = vmatprep.subr.mxu0 %v1745_v2  ;;  %5723 = vmatprep.subr.mxu1 %v6496_v34 }
 0x2b4   : > { %v1526_v8 = vsel %vm910_vm7, %v6488_v29, %v1521_v4  ;;  %1871 = vmatpush1.msra.mxu0 %v1744_v5  ;;  %5724 = vmatpush3.msra.mxu1 %v1741_v6  ;;  %v1730_v17 = vld [vmem:[#allocation4 + $0x40] sm:$0xff]  ;;  %v1729_v18 = vld [vmem:[#allocation4 + $0x38] sm:$0xff]  ;;  %vm2386_vm7 = vcmask 670720  }
 0x2b5   : > { %1536 = vst.msk [vmem:[#allocation4 + $0x70] sm:$0xf] %vm804_vm0, %v1526_v8  ;;  %1872 = vmatprep.subr.mxu0 %v1740_v9  ;;  %5725 = vmatprep.subr.mxu1 %v6496_v34  ;;  %v1731_v23 = vld [vmem:[#allocation4 + $0x48] sm:$0xff] }
 0x2b6   : > { %1873 = vmatpush1.msra.mxu0 %v1739_v10 }
 0x2b7   : > { %v1443_v13 = vpop.permute.xlu1 %1442  ;;  %1874 = vmatprep.subr.mxu0 %v1735_v11 }
 0x2b8   : > { %v1448_v15 = vsel %vm830_vm9, %v1441_v60, %v1443_v13  ;;  %1875 = vmatpush1.msra.mxu0 %v1734_v14  ;;  %v1725_v19 = vld [vmem:[#allocation4 + $0x18] sm:$0xff]  ;;  %vm2305_vm9 = vcmask 15360  }
 0x2b9   : > { %1458 = vst.msk [vmem:[#allocation4 + $0x20] sm:$0xf] %vm804_vm0, %v1448_v15  ;;  %1876 = vmatprep.subr.mxu0 %v1730_v17  ;;  %v1772_v24 = vpop.permute.xlu0 %1771 }
 0x2ba   : > { %1877 = vmatpush1.msra.mxu0 %v1729_v18 }
 0x2bb   : > { %1878 = vmatprep.subr.mxu0 %v1725_v19 }
 0x2bc   : > { %1879 = vmatpush1.msra.mxu0 %v1724_v21  ;;  %v1736_v22 = vld [vmem:[#allocation4 + $0x70] sm:$0xff] }
 0x2bd   : > { %5631 = vmatmul.mubr.msk.f32.vlgmr.msra.gmra.mxu0 %vm1168_vm10, %v6486_v28  ;;  %5726 = vmatpush3.msra.mxu1 %v1736_v22 }
 0x2be   : > { %5727 = vmatprep.subr.mxu1 %v6496_v34  ;;  %2590 = vmatprep.mubr.f32.mxu0 %v6496_v34 }
 0x2bf   : > { %5728 = vmatpush3.msra.mxu1 %v1731_v23 }
 0x2c0   : > { %5729 = vmatprep.subr.mxu1 %v6496_v34  ;;  %v1726_v20 = vld [vmem:[#allocation4 + $0x20] sm:$0xff] }
 0x2c1   : > { %5730 = vmatpush3.msra.mxu1 %v1726_v20 }
 0x2c2   : > { %5732 = vmatmul.mubr.msk.f32.vlgmr.msra.gmra.mxu1 %vm1168_vm10, %v6486_v28 }
 0x2c3   : > { %2661 = vmatprep.mubr.f32.mxu1 %v6496_v34 }
 0x35d   : > { %v1843_v25 = vpop.f32.mrf.mxu1 }
 0x35e   : > { %v1844_v27 = vadd.f32 %v1843_v25, %v1772_v24 }
 0x35f   : > { %v1845_v29 = vpop.f32.mrf.mxu1 }
 0x360   : > { %v1990_v28 = vsel %vm1989_vm12, %v1844_v27, 0.0  ;;  %v1846_v30 = vadd.f32 %v1845_v29, %v1772_v24 }
 0x361   : > { %v1991_v31 = vrot.slane %v1990_v28, 4 }
 0x362   : > { %v1997_v32 = vsel %vm1989_vm12, %v1846_v30, 0.0 }
 0x363   : > { %v1992_v33 = vadd.f32 %v1991_v31, %v1990_v28  ;;  %v1998_v35 = vrot.slane %v1997_v32, 4 }
 0x365   : > { %v1993_v36 = vrot.slane %v1992_v33, 2  ;;  %v1999_v37 = vadd.f32 %v1998_v35, %v1997_v32 }
 0x367   : > { %v1994_v38 = vadd.f32 %v1993_v36, %v1992_v33  ;;  %v2000_v39 = vrot.slane %v1999_v37, 2 }
 0x369   : > { %v1995_v40 = vrot.slane %v1994_v38, 1  ;;  %v2001_v41 = vadd.f32 %v2000_v39, %v1999_v37 }
 0x36b   : > { %v1996_v42 = vadd.f32 %v1995_v40, %v1994_v38  ;;  %v2002_v43 = vrot.slane %v2001_v41, 1 }
 0x36d   : > { %v2026_v44 = vmul.f32 0.25, %v1996_v42  ;;  %v2003_v45 = vadd.f32 %v2002_v43, %v2001_v41 }
 0x36f   : > { %v2031_v46 = vsub.f32 %v1844_v27, %v2026_v44  ;;  %v2027_v47 = vmul.f32 0.25, %v2003_v45  ;;  %v6562_v45 = vpop.permute.xlu1 %2099 }
 0x371   : > { %v2036_v48 = vmul.f32 %v2031_v46, %v2031_v46  ;;  %v6547_v50 = vsub.f32 %v1846_v30, %v2027_v47 }
 0x373   : > { %v2041_v51 = vsel %vm1989_vm12, %v2036_v48, 0.0  ;;  %v2037_v52 = vmul.f32 %v6547_v50, %v6547_v50 }
 0x374   : > { %v2042_v49 = vrot.slane %v2041_v51, 4 }
 0x375   : > { %v2048_v53 = vsel %vm1989_vm12, %v2037_v52, 0.0 }
 0x376   : > { %v2043_v54 = vadd.f32 %v2042_v49, %v2041_v51  ;;  %v2049_v55 = vrot.slane %v2048_v53, 4 }
 0x378   : > { %v2044_v56 = vrot.slane %v2043_v54, 2  ;;  %v2050_v57 = vadd.f32 %v2049_v55, %v2048_v53 }
 0x37a   : > { %v2045_v58 = vadd.f32 %v2044_v56, %v2043_v54  ;;  %v2051_v59 = vrot.slane %v2050_v57, 2 }
 0x37c   : > { %v2046_v60 = vrot.slane %v2045_v58, 1  ;;  %v2052_v61 = vadd.f32 %v2051_v59, %v2050_v57  ;;  %v6574_v59 = vpop.permute.xlu0 %2110 }
 0x37d   : > { %v1914_v62 = vpop.f32.mrf.mxu0 }
 0x37e   : > { %v2047_v63 = vadd.f32 %v2046_v60, %v2045_v58  ;;  %v2053_v1 = vrot.slane %v2052_v61, 1  ;;  %v1915_v0 = vadd.f32 %v1914_v62, %v1772_v24  ;;  %v6572_v58 = vstv %s2118_s23  ;;  %s5964_s23 = smov 92  }
 0x37f   : > { %v1916_v2 = vpop.f32.mrf.mxu0 }
 0x380   : > { %v2076_v4 = vmul.f32 0.25, %v2047_v63  ;;  %v2054_v5 = vadd.f32 %v2053_v1, %v2052_v61  ;;  %v2004_v6 = vsel %vm1989_vm12, %v1915_v0, 0.0  ;;  %v1917_v8 = vadd.f32 %v1916_v2, %v1772_v24 }
 0x381   : > { %v2005_v9 = vrot.slane %v2004_v6, 4 }
 0x382   : > { %v2081_v10 = vadd.f32 1e-05, %v2076_v4  ;;  %v2077_v11 = vmul.f32 0.25, %v2054_v5  ;;  %v2011_v13 = vsel %vm1989_vm12, %v1917_v8, 0.0  ;;  %v1985_v14 = vpop.f32.mrf.mxu1 }
 0x383   : > { %v2006_v15 = vadd.f32 %v2005_v9, %v2004_v6  ;;  %v2012_v17 = vrot.slane %v2011_v13, 4  ;;  %v1986_v18 = vadd.f32 %v1985_v14, %v1772_v24 }
 0x384   : > { %5879 = vrsqrt.f32 %v2081_v10  ;;  %v2082_v19 = vadd.f32 1e-05, %v2077_v11  ;;  %v5733_v21 = vpop.f32.mrf.mxu1 }
 0x385   : > { %v2007_v22 = vrot.slane %v2006_v15, 2  ;;  %v2013_v23 = vadd.f32 %v2012_v17, %v2011_v13  ;;  %v2018_v20 = vsel %vm804_vm0, %v1986_v18, 0.0 }
 0x386   : > { %5881 = vrsqrt.f32 %v2082_v19  ;;  %v2019_v25 = vrot.slane %v2018_v20, 4 }
 0x387   : > { %v2008_v27 = vadd.f32 %v2007_v22, %v2006_v15  ;;  %v2014_v29 = vrot.slane %v2013_v23, 2 }
 0x388   : > { %v2020_v28 = vadd.f32 %v2019_v25, %v2018_v20 }
 0x389   : > { %v2009_v30 = vrot.slane %v2008_v27, 1  ;;  %v2015_v31 = vadd.f32 %v2014_v29, %v2013_v23 }
 0x38a   : > { %v2021_v32 = vrot.slane %v2020_v28, 2 }
 0x38b   : > { %v2010_v33 = vadd.f32 %v2009_v30, %v2008_v27  ;;  %v2016_v35 = vrot.slane %v2015_v31, 1 }
 0x38c   : > { %v2022_v36 = vadd.f32 %v2021_v32, %v2020_v28 }
 0x38d   : > { %v2028_v37 = vmul.f32 0.25, %v2010_v33  ;;  %v2017_v24 = vadd.f32 %v2016_v35, %v2015_v31 }
 0x38e   : > { %v2023_v38 = vrot.slane %v2022_v36, 1 }
 0x38f   : > { %v6556_v39 = vsub.f32 %v1915_v0, %v2028_v37  ;;  %v2029_v40 = vmul.f32 0.25, %v2017_v24 }
 0x390   : > { %v2024_v41 = vadd.f32 %v2023_v38, %v2022_v36 }
 0x391   : > { %v5880_v42 = vpop.eup %5879  ;;  %v2038_v43 = vmul.f32 %v6556_v39, %v6556_v39  ;;  %v6560_v44 = vsub.f32 %v1917_v8, %v2029_v40 }
 0x392   : > { %v2091_v47 = vmul.f32 %v5880_v42, %v2031_v46  ;;  %v2030_v48 = vmul.f32 0.25, %v2024_v41 }
 0x393   : > { %v5882_v51 = vpop.eup %5881  ;;  %v2055_v52 = vsel %vm1989_vm12, %v2038_v43, 0.0  ;;  %v2039_v49 = vmul.f32 %v6560_v44, %v6560_v44 }
 0x394   : > { %v2092_v53 = vmul.f32 %v5882_v51, %v6547_v50  ;;  %v2056_v54 = vrot.slane %v2055_v52, 4  ;;  %v6568_v55 = vsub.f32 %v1986_v18, %v2030_v48  ;;  %v2102_v56 = vmul.f32 %v6562_v45, %v2091_v47 }
 0x395   : > { %v2062_v57 = vsel %vm1989_vm12, %v2039_v49, 0.0 }
 0x396   : > { %v2057_v46 = vadd.f32 %v2056_v54, %v2055_v52  ;;  %v2063_v60 = vrot.slane %v2062_v57, 4  ;;  %v2040_v61 = vmul.f32 %v6568_v55, %v6568_v55  ;;  %v2103_v62 = vmul.f32 %v6562_v45, %v2092_v53 }
 0x397   : > { %v2113_v50 = vadd.f32 %v6574_v59, %v2102_v56 }
 0x398   : > { %v2058_v63 = vrot.slane %v2057_v46, 2  ;;  %v2064_v1 = vadd.f32 %v2063_v60, %v2062_v57  ;;  %v2069_v0 = vsel %vm804_vm0, %v2040_v61, 0.0  ;;  %v2114_v2 = vadd.f32 %v6574_v59, %v2103_v62 }
 0x399   : > { %v2070_v4 = vrot.slane %v2069_v0, 4  ;;  %vm2119_vm13 = vcmp.ge.f32.partialorder %v2113_v50, 0.0  ;;  %v2125_v5 = vmul.f32 %v6572_v58, %v2113_v50 }
 0x39a   : > { %v2059_v6 = vadd.f32 %v2058_v63, %v2057_v46  ;;  %v2065_v8 = vrot.slane %v2064_v1, 2  ;;  %vm2120_vm14 = vcmp.ge.f32.partialorder %v2114_v2, 0.0  ;;  %v2126_v9 = vmul.f32 %v6572_v58, %v2114_v2 }
 0x39b   : > { %v2071_v10 = vadd.f32 %v2070_v4, %v2069_v0  ;;  %v2130_v11 = vsel %vm2119_vm13, %v2113_v50, %v2125_v5  ;;  %vm2265_vm13 = vcmask 375808  }
 0x39c   : > { %v2060_v13 = vrot.slane %v2059_v6, 1  ;;  %v2066_v14 = vadd.f32 %v2065_v8, %v2064_v1  ;;  %v2131_v15 = vsel %vm2120_vm14, %v2114_v2, %v2126_v9  ;;  %v2135_v17 = vmul.f32 %v2130_v11, %v6359_v3  ;;  %v2294_v8 = vpop.permute.xlu1 %2293 }
 0x39d   : > { %v2072_v18 = vrot.slane %v2071_v10, 2  ;;  %v2136_v19 = vmul.f32 %v2131_v15, %v6361_v7  ;;  %vm2225_vm14 = vcmask 392192  }
 0x39e   : > { %v2061_v21 = vadd.f32 %v2060_v13, %v2059_v6  ;;  %v2067_v22 = vrot.slane %v2066_v14, 1  ;;  %v2145_v23 = vrot.slane %v2135_v17, 4  ;;  %v2517_v6 = vld [vmem:[%s8165_s10] sm:$0xff] }
 0x39f   : > { %v2073_v20 = vadd.f32 %v2072_v18, %v2071_v10  ;;  %v2146_v25 = vrot.slane %v2136_v19, 4  ;;  %v2254_v10 = vpop.permute.xlu0 %2253 }
 0x3a0   : > { %v2078_v27 = vmul.f32 0.25, %v2061_v21  ;;  %v2068_v29 = vadd.f32 %v2067_v22, %v2066_v14  ;;  %2155 = vst [vmem:[#allocation2 + $0x8] sm:$0xf0] %v2145_v23  ;;  %v6736_v9 = vpop.permute.xlu1 %2213 }
 0x3a1   : > { %v2074_v28 = vrot.slane %v2073_v20, 1  ;;  %2156 = vst [vmem:[#allocation2 + $0x10] sm:$0xf0] %v2146_v25 }
 0x3a2   : > { %v2083_v30 = vadd.f32 1e-05, %v2078_v27  ;;  %v2079_v31 = vmul.f32 0.25, %v2068_v29 }
 0x3a3   : > { %v2075_v32 = vadd.f32 %v2074_v28, %v2073_v20 }
 0x3a4   : > { %5883 = vrsqrt.f32 %v2083_v30  ;;  %v2084_v33 = vadd.f32 1e-05, %v2079_v31 }
 0x3a5   : > { %v2080_v35 = vmul.f32 0.25, %v2075_v32 }
 0x3a6   : > { %5885 = vrsqrt.f32 %v2084_v33 }
 0x3a7   : > { %v2085_v36 = vadd.f32 1e-05, %v2080_v35  ;;  %v6592_v37 = vld [vmem:[#allocation2 + $0x8] sm:$0xff] }
 0x3a8   : > { %v6594_v24 = vld [vmem:[#allocation2 + $0x8] sm:$0xff]  ;;  %v6596_v38 = vld [vmem:[#allocation2 + $0x10] sm:$0xff]  ;;  %5541 = vst [vmem:[%s6590_s1] sm:$0xff] %v6592_v37  ;;  %2446 = vrot.lane.b32.xlu1 %v6592_v37, %s5955_s25  ;;  %2411 = vrot.lane.b32.xlu0 %v6592_v37, %s5956_s3 }
 0x3a9   : > { %v6604_v40 = vld [vmem:[#allocation2 + $0x10] sm:$0xff]  ;;  %3767 = vst [vmem:[#allocation4 + $0x140] sm:$0xff] %v6594_v24  ;;  %5887 = vrsqrt.f32 %v2085_v36  ;;  %5542 = vst [vmem:[%s6590_s1 + $0x8] sm:$0xff] %v6596_v38 }
 0x3aa   : > { %3768 = vst [vmem:[#allocation4 + $0x148] sm:$0xff] %v6604_v40 }
 0x3ac   : > { %2376 = vrot.lane.b32.xlu1 %v6592_v37, %s5957_s28  ;;  %2341 = vrot.lane.b32.xlu0 %v6592_v37, %s5958_s29 }
 0x3b0   : > { %2295 = vrot.lane.b32.xlu1 %v6592_v37, %s5952_s30  ;;  %2255 = vrot.lane.b32.xlu0 %v6592_v37, %s5953_s5 }
 0x3b1   : > { %v5884_v41 = vpop.eup %5883 }
 0x3b2   : > { %v2093_v42 = vmul.f32 %v5884_v41, %v6556_v39 }
 0x3b3   : > { %v5886_v43 = vpop.eup %5885 }
 0x3b4   : > { %v2094_v47 = vmul.f32 %v5886_v43, %v6560_v44  ;;  %v2104_v48 = vmul.f32 %v6562_v45, %v2093_v42  ;;  %2215 = vrot.lane.b32.xlu1 %v6592_v37, %s5954_s22  ;;  %2175 = vrot.lane.b32.xlu0 %v6592_v37, %s5959_s0 }
 0x3b6   : > { %v5888_v51 = vpop.eup %5887  ;;  %v2105_v52 = vmul.f32 %v6562_v45, %v2094_v47  ;;  %v2115_v49 = vadd.f32 %v6574_v59, %v2104_v48 }
 0x3b7   : > { %v2095_v53 = vmul.f32 %v5888_v51, %v6568_v55 }
 0x3b8   : > { %v2116_v39 = vadd.f32 %v6574_v59, %v2105_v52  ;;  %vm2121_vm15 = vcmp.ge.f32.partialorder %v2115_v49, 0.0  ;;  %v2127_v44 = vmul.f32 %v6572_v58, %v2115_v49  ;;  %2448 = vrot.lane.b32.xlu1 %v6596_v38, %s5955_s25  ;;  %2413 = vrot.lane.b32.xlu0 %v6596_v38, %s5956_s3 }
 0x3b9   : > { %v2106_v54 = vmul.f32 %v6562_v45, %v2095_v53 }
 0x3ba   : > { %vm2122_vm2 = vcmp.ge.f32.partialorder %v2116_v39, 0.0  ;;  %v2128_v56 = vmul.f32 %v6572_v58, %v2116_v39  ;;  %v2132_v57 = vsel %vm2121_vm15, %v2115_v49, %v2127_v44  ;;  %vm2185_vm15 = vcmask 408576  }
 0x3bb   : > { %v2117_v46 = vadd.f32 %v6574_v59, %v2106_v54  ;;  %v2137_v55 = vmul.f32 %v2132_v57, %v6364_v12 }
 0x3bc   : > { %v2133_v60 = vsel %vm2122_vm2, %v2116_v39, %v2128_v56  ;;  %2378 = vrot.lane.b32.xlu1 %v6596_v38, %s5957_s28  ;;  %2343 = vrot.lane.b32.xlu0 %v6596_v38, %s5958_s29  ;;  %vm3726_vm2 = vcmask 31744  }
 0x3bd   : > { %vm2123_vm3 = vcmp.ge.f32.partialorder %v2117_v46, 0.0  ;;  %v2129_v61 = vmul.f32 %v6572_v58, %v2117_v46  ;;  %v2138_v45 = vmul.f32 %v2133_v60, %v6367_v16  ;;  %v2147_v62 = vrot.slane %v2137_v55, 4 }
 0x3bf   : > { %v2134_v50 = vsel %vm2123_vm3, %v2117_v46, %v2129_v61  ;;  %v2148_v63 = vrot.slane %v2138_v45, 4  ;;  %2157 = vst [vmem:[#allocation2 + $0x18] sm:$0xf0] %v2147_v62  ;;  %vm3649_vm3 = vcmask 752640  }
 0x3c0   : > { %v2139_v59 = vmul.f32 %v2134_v50, %v6372_v26  ;;  %2257 = vrot.lane.b32.xlu1 %v6596_v38, %s5953_s5  ;;  %2297 = vrot.lane.b32.xlu0 %v6596_v38, %s5952_s30 }
 0x3c1   : > { %2158 = vst [vmem:[#allocation2 + $0x20] sm:$0xf0] %v2148_v63 }
 0x3c2   : > { %v2149_v58 = vrot.slane %v2139_v59, 4 }
 0x3c4   : > { %2160 = vst.msk [vmem:[#allocation2 + $0x28] sm:$0xf0] %vm2159_vm4, %v2149_v58  ;;  %2177 = vrot.lane.b32.xlu1 %v6596_v38, %s5959_s0  ;;  %2217 = vrot.lane.b32.xlu0 %v6596_v38, %s5954_s22 }
 0x3c6   : > { %v6654_v1 = vld [vmem:[#allocation2 + $0x18] sm:$0xff] }
 0x3c7   : > { %v6656_v0 = vld [vmem:[#allocation2 + $0x18] sm:$0xff]  ;;  %5543 = vst [vmem:[%s6590_s1 + $0x10] sm:$0xff] %v6654_v1 }
 0x3c8   : > { %3769 = vst [vmem:[#allocation4 + $0x150] sm:$0xff] %v6656_v0  ;;  %v6661_v2 = vld [vmem:[#allocation2 + $0x20] sm:$0xff]  ;;  %2415 = vrot.lane.b32.xlu1 %v6654_v1, %s5956_s3  ;;  %2450 = vrot.lane.b32.xlu0 %v6654_v1, %s5955_s25 }
 0x3c9   : > { %v6667_v4 = vld [vmem:[#allocation2 + $0x20] sm:$0xff]  ;;  %5544 = vst [vmem:[%s6590_s1 + $0x18] sm:$0xff] %v6661_v2 }
 0x3ca   : > { %3770 = vst [vmem:[#allocation4 + $0x158] sm:$0xff] %v6667_v4 }
 0x3cb   : > { %v6672_v5 = vld [vmem:[#allocation2 + $0x28] sm:$0xff] }
 0x3cc   : > { %5545 = vst.msk [vmem:[%s6590_s1 + $0x20] sm:$0xff] %vm703_vm1, %v6672_v5  ;;  %2345 = vrot.lane.b32.xlu1 %v6654_v1, %s5958_s29  ;;  %2380 = vrot.lane.b32.xlu0 %v6654_v1, %s5957_s28  ;;  %2330 = vst.msk [vmem:[#allocation4 + $0xc0] sm:$0xff] %vm703_vm1, %v6672_v5 }
 0x3d0   : > { %2259 = vrot.lane.b32.xlu1 %v6654_v1, %s5953_s5  ;;  %2299 = vrot.lane.b32.xlu0 %v6654_v1, %s5952_s30 }
 0x3d4   : > { %2454 = vrot.lane.b32.xlu1 %v6672_v5, %s5955_s25  ;;  %2219 = vrot.lane.b32.xlu0 %v6654_v1, %s5954_s22 }
 0x3d8   : > { %2417 = vrot.lane.b32.xlu1 %v6661_v2, %s5956_s3  ;;  %2452 = vrot.lane.b32.xlu0 %v6661_v2, %s5955_s25 }
 0x3dc   : > { %2384 = vrot.lane.b32.xlu1 %v6672_v5, %s5957_s28  ;;  %2419 = vrot.lane.b32.xlu0 %v6672_v5, %s5956_s3 }
 0x3e0   : > { %2347 = vrot.lane.b32.xlu1 %v6661_v2, %s5958_s29  ;;  %2382 = vrot.lane.b32.xlu0 %v6661_v2, %s5957_s28 }
 0x3e4   : > { %2301 = vrot.lane.b32.xlu1 %v6661_v2, %s5952_s30  ;;  %2349 = vrot.lane.b32.xlu0 %v6672_v5, %s5958_s29 }
 0x3e8   : > { %2221 = vrot.lane.b32.xlu1 %v6661_v2, %s5954_s22  ;;  %2173 = vrot.lane.b32.xlu0 %v6496_v34, %s5959_s0 }
 0x3ec   : > { %2179 = vrot.lane.b32.xlu1 %v6654_v1, %s5959_s0  ;;  %2261 = vrot.lane.b32.xlu0 %v6661_v2, %s5953_s5 }
 0x3f0   : > { %2303 = vrot.lane.b32.xlu1 %v6672_v5, %s5952_s30  ;;  %2181 = vrot.lane.b32.xlu0 %v6661_v2, %s5959_s0 }
 0x3f4   : > { %2223 = vrot.lane.b32.xlu1 %v6672_v5, %s5954_s22  ;;  %2263 = vrot.lane.b32.xlu0 %v6672_v5, %s5953_s5 }
 0x3f8   : > { %2520 = vperm.xlu1 %5825, %v2517_v6   ;;  %2183 = vrot.lane.b32.xlu0 %v6672_v5, %s5959_s0 }
 0x3fc   : > { %2838 = vrot.lane.b32.xlu1 %v6496_v34, %s5953_s5  ;;  %2877 = vrot.lane.b32.xlu0 %v6496_v34, %s5952_s30 }
 0x400   : > { %2760 = vrot.lane.b32.xlu1 %v6496_v34, %s5959_s0  ;;  %2799 = vrot.lane.b32.xlu0 %v6496_v34, %s5954_s22 }
 0x41a   : > { %v2447_v11 = vpop.permute.xlu1 %2446  ;;  %v2412_v13 = vpop.permute.xlu0 %2411 }
 0x41e   : > { %v2377_v14 = vpop.permute.xlu1 %2376  ;;  %v2342_v15 = vpop.permute.xlu0 %2341 }
 0x422   : > { %v2296_v17 = vpop.permute.xlu1 %2295  ;;  %v2256_v18 = vpop.permute.xlu0 %2255 }
 0x423   : > { %v2306_v44 = vsel %vm2305_vm9, %v2294_v8, %v2296_v17  ;;  %v2266_v46 = vsel %vm2265_vm13, %v2254_v10, %v2256_v18 }
 0x426   : > { %v2216_v19 = vpop.permute.xlu1 %2215  ;;  %v6738_v21 = vpop.permute.xlu0 %2175 }
 0x427   : > { %v2226_v60 = vsel %vm2225_vm14, %v6736_v9, %v2216_v19 }
 0x42a   : > { %v2449_v22 = vpop.permute.xlu1 %2448  ;;  %v2414_v23 = vpop.permute.xlu0 %2413 }
 0x42b   : > { %v2457_v35 = vsel %vm2456_vm5, %v2447_v11, %v2449_v22  ;;  %v2422_v41 = vsel %vm2421_vm6, %v2412_v13, %v2414_v23 }
 0x42e   : > { %v2379_v20 = vpop.permute.xlu1 %2378  ;;  %v2344_v25 = vpop.permute.xlu0 %2343 }
 0x42f   : > { %v2387_v48 = vsel %vm2386_vm7, %v2377_v14, %v2379_v20  ;;  %v2352_v52 = vsel %vm2351_vm8, %v2342_v15, %v2344_v25 }
 0x432   : > { %v6740_v27 = vpop.permute.xlu1 %2257  ;;  %v6742_v29 = vpop.permute.xlu0 %2297 }
 0x433   : > { %v2307_v39 = vsel %vm2305_vm9, %v2296_v17, %v6742_v29  ;;  %v2267_v57 = vsel %vm2265_vm13, %v2256_v18, %v6740_v27 }
 0x436   : > { %v6744_v28 = vpop.permute.xlu1 %2177  ;;  %v6746_v30 = vpop.permute.xlu0 %2217 }
 0x437   : > { %v2227_v55 = vsel %vm2225_vm14, %v2216_v19, %v6746_v30  ;;  %v2187_v62 = vsel %vm2185_vm15, %v6738_v21, %v6744_v28 }
 0x43a   : > { %v2416_v31 = vpop.permute.xlu1 %2415  ;;  %v2451_v32 = vpop.permute.xlu0 %2450 }
 0x43b   : > { %v2458_v33 = vsel %vm2456_vm5, %v2449_v22, %v2451_v32  ;;  %v2423_v36 = vsel %vm2421_vm6, %v2414_v23, %v2416_v31  ;;  %v6795_v23 = vld [vmem:[%s8164_s9] sm:$0xff] }
 0x43c   : > { %2540 = vmatprep.subr.mxu0 %v2458_v33 }
 0x43d   : > { %2541 = vmatpush1.msra.mxu0 %v2457_v35 }
 0x43e   : > { %v6752_v42 = vpop.permute.xlu1 %2345  ;;  %v2381_v43 = vpop.permute.xlu0 %2380  ;;  %2542 = vmatprep.subr.mxu0 %v2423_v36 }
 0x43f   : > { %v2388_v47 = vsel %vm2386_vm7, %v2379_v20, %v2381_v43  ;;  %2543 = vmatpush1.msra.mxu0 %v2422_v41  ;;  %v2353_v51 = vsel %vm2351_vm8, %v2344_v25, %v6752_v42 }
 0x440   : > { %2544 = vmatprep.subr.mxu0 %v2388_v47 }
 0x441   : > { %2545 = vmatpush1.msra.mxu0 %v2387_v48 }
 0x442   : > { %v6759_v49 = vpop.permute.xlu1 %2259  ;;  %v2300_v53 = vpop.permute.xlu0 %2299  ;;  %2546 = vmatprep.subr.mxu0 %v2353_v51 }
 0x443   : > { %2547 = vmatpush1.msra.mxu0 %v2352_v52 }
 0x444   : > { %2548 = vmatprep.subr.mxu0 %v6596_v38 }
 0x445   : > { %2549 = vmatpush1.msra.mxu0 %v6592_v37 }
 0x446   : > { %v2455_v54 = vpop.permute.xlu1 %2454  ;;  %v6766_v56 = vpop.permute.xlu0 %2219  ;;  %2550 = vmatprep.subr.mxu0 %v2307_v39  ;;  %v2495_v39 = vld [vmem:[#allocation4 + $0xc0] sm:$0xff] }
 0x447   : > { %2470 = vst.msk [vmem:[#allocation4 + $0x160] sm:$0xff] %vm703_vm1, %v2455_v54  ;;  %2551 = vmatpush1.msra.mxu0 %v2306_v44 }
 0x448   : > { %2552 = vmatprep.subr.mxu0 %v2267_v57 }
 0x449   : > { %2553 = vmatpush1.msra.mxu0 %v2266_v46 }
 0x44a   : > { %v2418_v61 = vpop.permute.xlu1 %2417  ;;  %v2453_v45 = vpop.permute.xlu0 %2452  ;;  %2554 = vmatprep.subr.mxu0 %v2227_v55 }
 0x44b   : > { %v2459_v50 = vsel %vm2456_vm5, %v2451_v32, %v2453_v45  ;;  %v2460_v63 = vsel %vm2456_vm5, %v2453_v45, %v2455_v54  ;;  %2555 = vmatpush1.msra.mxu0 %v2226_v60  ;;  %v2424_v8 = vsel %vm2421_vm6, %v2416_v31, %v2418_v61  ;;  %v2308_v31 = vsel %vm2305_vm9, %v6742_v29, %v2300_v53  ;;  %v6839_v60 = vld [vmem:[#allocation2] sm:$0xff] }
 0x44c   : > { %2556 = vmatprep.subr.mxu0 %v2187_v62  ;;  %2611 = vmatprep.subr.mxu1 %v2460_v63  ;;  %v2268_v29 = vsel %vm2265_vm13, %v6740_v27, %v6759_v49 }
 0x44d   : > { %2612 = vmatpush1.msra.mxu1 %v2459_v50 }
 0x44e   : > { %v2385_v59 = vpop.permute.xlu1 %2384  ;;  %v2420_v58 = vpop.permute.xlu0 %2419  ;;  %v2515_v35 = vld [vmem:[#allocation4 + $0x160] sm:$0xff] }
 0x44f   : > { %2400 = vst.msk [vmem:[#allocation4 + $0x110] sm:$0xff] %vm703_vm1, %v2385_v59  ;;  %v2425_v6 = vsel %vm2421_vm6, %v2418_v61, %v2420_v58  ;;  %2435 = vst.msk [vmem:[#allocation4 + $0x138] sm:$0xff] %vm703_vm1, %v2420_v58 }
 0x450   : > { %2613 = vmatprep.subr.mxu1 %v2425_v6 }
 0x451   : > { %2614 = vmatpush1.msra.mxu1 %v2424_v8 }
 0x452   : > { %v2348_v9 = vpop.permute.xlu1 %2347  ;;  %v2383_v10 = vpop.permute.xlu0 %2382 }
 0x453   : > { %v2389_v11 = vsel %vm2386_vm7, %v2381_v43, %v2383_v10  ;;  %v2390_v13 = vsel %vm2386_vm7, %v2383_v10, %v2385_v59  ;;  %v2354_v18 = vsel %vm2351_vm8, %v6752_v42, %v2348_v9  ;;  %v2228_v42 = vsel %vm2225_vm14, %v6746_v30, %v6766_v56 }
 0x454   : > { %2615 = vmatprep.subr.mxu1 %v2390_v13 }
 0x455   : > { %2616 = vmatpush1.msra.mxu1 %v2389_v11 }
 0x456   : > { %v2302_v14 = vpop.permute.xlu1 %2301  ;;  %v2350_v15 = vpop.permute.xlu0 %2349  ;;  %v2510_v36 = vld [vmem:[#allocation4 + $0x138] sm:$0xff]  ;;  %v2505_v48 = vld [vmem:[#allocation4 + $0x110] sm:$0xff] }
 0x457   : > { %v2355_v17 = vsel %vm2351_vm8, %v2348_v9, %v2350_v15  ;;  %2365 = vst.msk [vmem:[#allocation4 + $0xe8] sm:$0xff] %vm703_vm1, %v2350_v15  ;;  %v2309_v20 = vsel %vm2305_vm9, %v2300_v53, %v2302_v14 }
 0x458   : > { %2617 = vmatprep.subr.mxu1 %v2355_v17 }
 0x459   : > { %2618 = vmatpush1.msra.mxu1 %v2354_v18 }
 0x45a   : > { %v2222_v19 = vpop.permute.xlu1 %2221  ;;  %v2174_v22 = vpop.permute.xlu0 %2173  ;;  %2619 = vmatprep.subr.mxu1 %v6661_v2 }
 0x45b   : > { %v2186_v25 = vsel %vm2185_vm15, %v2174_v22, %v6738_v21  ;;  %2620 = vmatpush1.msra.mxu1 %v6654_v1  ;;  %v2229_v41 = vsel %vm2225_vm14, %v6766_v56, %v2222_v19  ;;  %v3096_v22 = vld [vmem:[%s8167_s12] sm:$0xf] }
 0x45c   : > { %2557 = vmatpush1.msra.mxu0 %v2186_v25  ;;  %2621 = vmatprep.subr.mxu1 %v2309_v20  ;;  %v3433_v20 = vld [vmem:[%s8169_s14] sm:$0xf]  ;;  %v3684_v25 = vld [vmem:[#allocation2 + $0x38] sm:$0xf] }
 0x45d   : > { %5633 = vmatmul.mubr.msk.f32.vlgmr.msra.gmra.mxu0 %vm1168_vm10, %v6795_v23  ;;  %2622 = vmatpush1.msra.mxu1 %v2308_v31 }
 0x45e   : > { %v2180_v32 = vpop.permute.xlu1 %2179  ;;  %v2262_v33 = vpop.permute.xlu0 %2261  ;;  %5734 = vmatprep.subr.mxu0 %v6496_v34  ;;  %5752 = vmatprep.mubr.msk.f32.mxu0 %vm5951_vm11, %v6496_v34  ;;  %v2500_v30 = vld [vmem:[#allocation4 + $0xe8] sm:$0xff] }
 0x45f   : > { %v2269_v21 = vsel %vm2265_vm13, %v6759_v49, %v2262_v33  ;;  %5735 = vmatpush3.msra.mxu0 %v2515_v35  ;;  %v2188_v52 = vsel %vm2185_vm15, %v6744_v28, %v2180_v32 }
 0x460   : > { %5736 = vmatprep.subr.mxu0 %v6496_v34  ;;  %2623 = vmatprep.subr.mxu1 %v2269_v21 }
 0x461   : > { %5737 = vmatpush3.msra.mxu0 %v2510_v36  ;;  %2624 = vmatpush1.msra.mxu1 %v2268_v29 }
 0x462   : > { %v2304_v43 = vpop.permute.xlu1 %2303  ;;  %v2182_v47 = vpop.permute.xlu0 %2181  ;;  %5738 = vmatprep.subr.mxu0 %v6496_v34  ;;  %2625 = vmatprep.subr.mxu1 %v2229_v41 }
 0x463   : > { %v2310_v27 = vsel %vm2305_vm9, %v2302_v14, %v2304_v43  ;;  %v2189_v51 = vsel %vm2185_vm15, %v2180_v32, %v2182_v47  ;;  %5739 = vmatpush3.msra.mxu0 %v2505_v48  ;;  %2626 = vmatpush1.msra.mxu1 %v2228_v42  ;;  %v3545_v42 = vld [vmem:[#allocation2 + $0x38] sm:$0xf] }
 0x464   : > { %2320 = vst.msk [vmem:[#allocation4 + $0x98] sm:$0xff] %vm703_vm1, %v2310_v27  ;;  %5740 = vmatprep.subr.mxu0 %v6496_v34  ;;  %2627 = vmatprep.subr.mxu1 %v2189_v51 }
 0x465   : > { %5741 = vmatpush3.msra.mxu0 %v2500_v30  ;;  %2628 = vmatpush1.msra.mxu1 %v2188_v52 }
 0x466   : > { %v2224_v49 = vpop.permute.xlu1 %2223  ;;  %v2264_v53 = vpop.permute.xlu0 %2263  ;;  %5742 = vmatprep.subr.mxu0 %v6496_v34  ;;  %5634 = vmatmul.mubr.msk.f32.vlgmr.msra.gmra.mxu1 %vm1168_vm10, %v6795_v23 }
 0x467   : > { %v2230_v44 = vsel %vm2225_vm14, %v2222_v19, %v2224_v49  ;;  %v2270_v28 = vsel %vm2265_vm13, %v2262_v33, %v2264_v53  ;;  %5743 = vmatpush3.msra.mxu0 %v2495_v39  ;;  %3169 = vmatprep.mubr.f32.mxu1 %v6496_v34  ;;  %v5826_v33 = vpack.i.bf16 %v6839_v60, %v3684_v25 }
 0x468   : > { %2240 = vst.msk [vmem:[#allocation4 + $0x48] sm:$0xff] %vm703_vm1, %v2230_v44  ;;  %2280 = vst.msk [vmem:[#allocation4 + $0x70] sm:$0xff] %vm703_vm1, %v2270_v28  ;;  %5744 = vmatprep.subr.mxu0 %v6496_v34 }
 0x46a   : > { %v2184_v54 = vpop.permute.xlu0 %2183 }
 0x46b   : > { %v2190_v56 = vsel %vm2185_vm15, %v2182_v47, %v2184_v54  ;;  %v2490_v57 = vld [vmem:[#allocation4 + $0x98] sm:$0xff] }
 0x46c   : > { %2200 = vst.msk [vmem:[#allocation4 + $0x20] sm:$0xff] %vm703_vm1, %v2190_v56  ;;  %5745 = vmatpush3.msra.mxu0 %v2490_v57 }
 0x46d   : > { %5746 = vmatprep.subr.mxu0 %v6496_v34 }
 0x46e   : > { %v2878_v32 = vpop.permute.xlu0 %2877 }
 0x46f   : > { %v2485_v46 = vld [vmem:[#allocation4 + $0x70] sm:$0xff]  ;;  %v2480_v55 = vld [vmem:[#allocation4 + $0x48] sm:$0xff] }
 0x470   : > { %5747 = vmatpush3.msra.mxu0 %v2485_v46 }
 0x471   : > { %5748 = vmatprep.subr.mxu0 %v6496_v34 }
 0x472   : > { %5749 = vmatpush3.msra.mxu0 %v2480_v55 }
 0x473   : > { %5750 = vmatprep.subr.mxu0 %v6839_v60  ;;  %v2475_v61 = vld [vmem:[#allocation4 + $0x20] sm:$0xff]  ;;  %v2521_v45 = vpop.permute.xlu1 %2520 }
 0x474   : > { %5751 = vmatpush3.msra.mxu0 %v2475_v61 }
 0x475   : > { %5753 = vmatmul.mubr.msk.f32.vlgmr.msra.gmra.mxu0 %vm1168_vm10, %v6795_v23  ;;  %v3422_v23 = vld [vmem:[%s8168_s13] sm:$0xf] }
 0x476   : > { %3240 = vmatprep.mubr.f32.mxu0 %v6839_v60 }
 0x477   : > { %v6959_v31 = vpop.permute.xlu1 %2838 }
 0x47b   : > { %v6969_v35 = vpop.permute.xlu1 %2760 }
 0x51d   : > { %v2592_v62 = vpop.f32.mrf.mxu0 }
 0x51e   : > { %v2593_v50 = vadd.f32 %v2592_v62, %v2521_v45 }
 0x51f   : > { %v2594_v34 = vpop.f32.mrf.mxu0 }
 0x520   : > { %v6846_v63 = vmul.f32 %v2593_v50, %v6359_v3  ;;  %v2595_v58 = vadd.f32 %v2594_v34, %v2521_v45  ;;  %v3476_v34 = vld [vmem:[#allocation2 + $0x38] sm:$0xf] }
 0x522   : > { %3026 = vrot.lane.b32.xlu0 %v6846_v63, %s5955_s25  ;;  %2992 = vrot.lane.b32.xlu1 %v6846_v63, %s5956_s3  ;;  %v6865_v8 = vmul.f32 %v2595_v58, %v6361_v7 }
 0x526   : > { %2958 = vrot.lane.b32.xlu0 %v6846_v63, %s5957_s28  ;;  %2924 = vrot.lane.b32.xlu1 %v6846_v63, %s5958_s29  ;;  %v2663_v59 = vpop.f32.mrf.mxu1 }
 0x527   : > { %v2664_v6 = vadd.f32 %v2663_v59, %v2521_v45 }
 0x528   : > { %v2665_v15 = vpop.f32.mrf.mxu1 }
 0x529   : > { %v6868_v9 = vmul.f32 %v2664_v6, %v6364_v12  ;;  %v2666_v18 = vadd.f32 %v2665_v15, %v2521_v45 }
 0x52a   : > { %2879 = vrot.lane.b32.xlu0 %v6846_v63, %s5952_s30  ;;  %2840 = vrot.lane.b32.xlu1 %v6846_v63, %s5953_s5 }
 0x52b   : > { %v6898_v19 = vmul.f32 %v2666_v18, %v6367_v16 }
 0x52e   : > { %2801 = vrot.lane.b32.xlu0 %v6846_v63, %s5954_s22  ;;  %2762 = vrot.lane.b32.xlu1 %v6846_v63, %s5959_s0 }
 0x532   : > { %3028 = vrot.lane.b32.xlu0 %v6865_v8, %s5955_s25  ;;  %3030 = vrot.lane.b32.xlu1 %v6868_v9, %s5955_s25 }
 0x535   : > { %v2734_v10 = vpop.f32.mrf.mxu0 }
 0x536   : > { %v2735_v11 = vadd.f32 %v2734_v10, %v2521_v45  ;;  %2994 = vrot.lane.b32.xlu1 %v6865_v8, %s5956_s3  ;;  %2996 = vrot.lane.b32.xlu0 %v6868_v9, %s5956_s3  ;;  %v5841_v10 = vpack.i.bf16 %v6839_v60, %v3476_v34 }
 0x537   : > { %v5754_v13 = vpop.f32.mrf.mxu0 }
 0x538   : > { %v2742_v14 = vmul.f32 %v2735_v11, %v6372_v26 }
 0x53a   : > { %2747 = vst.msk [vmem:[#allocation3 + $0x28] sm:$0xff] %vm703_vm1, %v2742_v14  ;;  %2960 = vrot.lane.b32.xlu0 %v6865_v8, %s5957_s28  ;;  %2962 = vrot.lane.b32.xlu1 %v6868_v9, %s5957_s28 }
 0x53e   : > { %2926 = vrot.lane.b32.xlu1 %v6865_v8, %s5958_s29  ;;  %2928 = vrot.lane.b32.xlu0 %v6868_v9, %s5958_s29 }
 0x541   : > { %v2986_v17 = vld [vmem:[#allocation3 + $0x28] sm:$0xff] }
 0x542   : > { %2881 = vrot.lane.b32.xlu1 %v6865_v8, %s5952_s30  ;;  %2842 = vrot.lane.b32.xlu0 %v6865_v8, %s5953_s5  ;;  %2913 = vst.msk [vmem:[#allocation4 + $0xc0] sm:$0xff] %vm703_vm1, %v2986_v17 }
 0x546   : > { %2803 = vrot.lane.b32.xlu1 %v6865_v8, %s5954_s22  ;;  %2764 = vrot.lane.b32.xlu0 %v6865_v8, %s5959_s0 }
 0x54a   : > { %3032 = vrot.lane.b32.xlu1 %v6898_v19, %s5955_s25  ;;  %2883 = vrot.lane.b32.xlu0 %v6868_v9, %s5952_s30 }
 0x54e   : > { %2885 = vrot.lane.b32.xlu1 %v6898_v19, %s5952_s30  ;;  %2998 = vrot.lane.b32.xlu0 %v6898_v19, %s5956_s3 }
 0x552   : > { %2846 = vrot.lane.b32.xlu1 %v6898_v19, %s5953_s5  ;;  %2964 = vrot.lane.b32.xlu0 %v6898_v19, %s5957_s28 }
 0x556   : > { %2930 = vrot.lane.b32.xlu0 %v6898_v19, %s5958_s29  ;;  %3000 = vrot.lane.b32.xlu1 %v2986_v17, %s5956_s3  ;;  %s5639_s3 = sld [smem:[#allocation5 + $0x1]] }
 0x55a   : > { %3034 = vrot.lane.b32.xlu0 %v2986_v17, %s5955_s25  ;;  %2966 = vrot.lane.b32.xlu1 %v2986_v17, %s5957_s28  ;;  %s5967_s28 = smov 28  }
 0x55e   : > { %2844 = vrot.lane.b32.xlu0 %v6868_v9, %s5953_s5  ;;  %2932 = vrot.lane.b32.xlu1 %v2986_v17, %s5958_s29 }
 0x562   : > { %2807 = vrot.lane.b32.xlu0 %v6898_v19, %s5954_s22  ;;  %2805 = vrot.lane.b32.xlu1 %v6868_v9, %s5954_s22 }
 0x566   : > { %2766 = vrot.lane.b32.xlu0 %v6868_v9, %s5959_s0  ;;  %2768 = vrot.lane.b32.xlu1 %v6898_v19, %s5959_s0 }
 0x56a   : > { %2887 = vrot.lane.b32.xlu0 %v2986_v17, %s5952_s30  ;;  %2848 = vrot.lane.b32.xlu1 %v2986_v17, %s5953_s5  ;;  %s5960_s30 = smov 32   ;;  %s5961_s5 = smov 36  }
 0x56e   : > { %2809 = vrot.lane.b32.xlu0 %v2986_v17, %s5954_s22  ;;  %2770 = vrot.lane.b32.xlu1 %v2986_v17, %s5959_s0  ;;  %s5962_s22 = smov 124   ;;  %s5963_s0 = smov 4   ;;  %v7065_v17 = vld [vmem:[%s8166_s11] sm:$0xf] }
 0x572   : > { %3099 = vperm.xlu0 %5824, %v3096_v22   ;;  %3425 = vperm.xlu1 %5825, %v3422_v23  }
 0x576   : > { %3436 = vperm.xlu0 %5824, %v3433_v20   ;;  %3953 = vrot.lane.b32.xlu1 %v6654_v1, %s5960_s30 }
 0x57a   : > { %3951 = vrot.lane.b32.xlu0 %v6596_v38, %s5960_s30  ;;  %3955 = vrot.lane.b32.xlu1 %v6661_v2, %s5960_s30 }
 0x57e   : > { %3949 = vrot.lane.b32.xlu0 %v6592_v37, %s5960_s30  ;;  %3874 = vrot.lane.b32.xlu1 %v6654_v1, %s5961_s5 }
 0x582   : > { %3957 = vrot.lane.b32.xlu0 %v6672_v5, %s5960_s30  ;;  %3876 = vrot.lane.b32.xlu1 %v6661_v2, %s5961_s5 }
 0x586   : > { %3872 = vrot.lane.b32.xlu0 %v6596_v38, %s5961_s5  ;;  %3801 = vrot.lane.b32.xlu1 %v6654_v1, %s5962_s22  ;;  %v2800_v1 = vpop.permute.xlu0 %2799 }
 0x58a   : > { %3870 = vrot.lane.b32.xlu0 %v6592_v37, %s5961_s5  ;;  %3803 = vrot.lane.b32.xlu1 %v6661_v2, %s5962_s22 }
 0x58e   : > { %3878 = vrot.lane.b32.xlu0 %v6672_v5, %s5961_s5  ;;  %5827 = vrot.lane.b32.xlu1 %v5826_v33, %s5963_s0 }
 0x592   : > { %3799 = vrot.lane.b32.xlu0 %v6596_v38, %s5962_s22  ;;  %3706 = vrot.lane.b32.xlu1 %v6596_v38, %s5963_s0 }
 0x594   : > { %v2993_v21 = vpop.permute.xlu1 %2992  ;;  %v3027_v29 = vpop.permute.xlu0 %3026 }
 0x596   : > { %3797 = vrot.lane.b32.xlu0 %v6592_v37, %s5962_s22  ;;  %3710 = vrot.lane.b32.xlu1 %v6661_v2, %s5963_s0  ;;  %v5836_v37 = vpack.i.bf16 %v6839_v60, %v3545_v42  ;;  %v3614_v2 = vld [vmem:[#allocation2 + $0x38] sm:$0xf] }
 0x597   : > { %v5831_v51 = vpack.i.bf16 %v6839_v60, %v3614_v2 }
 0x598   : > { %v2925_v36 = vpop.permute.xlu1 %2924  ;;  %v2959_v41 = vpop.permute.xlu0 %2958 }
 0x59a   : > { %3805 = vrot.lane.b32.xlu0 %v6672_v5, %s5962_s22  ;;  %3631 = vrot.lane.b32.xlu1 %v6594_v24, %s5964_s23 }
 0x59c   : > { %v6983_v43 = vpop.permute.xlu1 %2840  ;;  %v2880_v38 = vpop.permute.xlu0 %2879 }
 0x59d   : > { %v6986_v47 = vsel %vm2305_vm9, %v2878_v32, %v2880_v38 }
 0x59e   : > { %2899 = vst [vmem:[#allocation4 + $0x78] sm:$0xff] %v6986_v47  ;;  %3704 = vrot.lane.b32.xlu0 %v6594_v24, %s5963_s0  ;;  %3635 = vrot.lane.b32.xlu1 %v6656_v0, %s5964_s23 }
 0x5a0   : > { %v6994_v5 = vpop.permute.xlu1 %2762  ;;  %v2802_v48 = vpop.permute.xlu0 %2801 }
 0x5a1   : > { %v6997_v27 = vsel %vm2225_vm14, %v2800_v1, %v2802_v48  ;;  %v2772_v18 = vsel %vm2185_vm15, %v6969_v35, %v6994_v5 }
 0x5a2   : > { %2821 = vst [vmem:[#allocation4 + $0x28] sm:$0xff] %v6997_v27  ;;  %3708 = vrot.lane.b32.xlu0 %v6656_v0, %s5963_s0  ;;  %5837 = vrot.lane.b32.xlu1 %v5836_v37, %s5965_s24 }
 0x5a4   : > { %v7004_v52 = vpop.permute.xlu1 %3030  ;;  %v3029_v30 = vpop.permute.xlu0 %3028 }
 0x5a5   : > { %v3036_v49 = vsel %vm2456_vm5, %v3027_v29, %v3029_v30  ;;  %v3037_v53 = vsel %vm2456_vm5, %v3029_v30, %v7004_v52 }
 0x5a6   : > { %5832 = vrot.lane.b32.xlu0 %v5831_v51, %s5964_s23  ;;  %3564 = vrot.lane.b32.xlu1 %v6604_v40, %s5965_s24 }
 0x5a7   : > { %3119 = vmatprep.subr.mxu1 %v3037_v53 }
 0x5a8   : > { %v2995_v39 = vpop.permute.xlu1 %2994  ;;  %v7012_v44 = vpop.permute.xlu0 %2996  ;;  %3120 = vmatpush1.msra.mxu1 %v3036_v49 }
 0x5a9   : > { %v3002_v28 = vsel %vm2421_vm6, %v2993_v21, %v2995_v39  ;;  %v3003_v54 = vsel %vm2421_vm6, %v2995_v39, %v7012_v44 }
 0x5aa   : > { %3011 = vst [vmem:[#allocation4 + $0x118] sm:$0xff] %v3002_v28  ;;  %3012 = vst [vmem:[#allocation4 + $0x120] sm:$0xff] %v3003_v54  ;;  %3633 = vrot.lane.b32.xlu0 %v6604_v40, %s5964_s23  ;;  %3568 = vrot.lane.b32.xlu1 %v6667_v4, %s5965_s24 }
 0x5ab   : > { %3121 = vmatprep.subr.mxu1 %v3003_v54 }
 0x5ac   : > { %v7021_v56 = vpop.permute.xlu1 %2962  ;;  %v2961_v57 = vpop.permute.xlu0 %2960  ;;  %3122 = vmatpush1.msra.mxu1 %v3002_v28 }
 0x5ad   : > { %v2968_v46 = vsel %vm2386_vm7, %v2959_v41, %v2961_v57  ;;  %v2969_v55 = vsel %vm2386_vm7, %v2961_v57, %v7021_v56 }
 0x5ae   : > { %3637 = vrot.lane.b32.xlu0 %v6667_v4, %s5964_s23  ;;  %3493 = vrot.lane.b32.xlu1 %v6594_v24, %s5966_s26 }
 0x5af   : > { %3123 = vmatprep.subr.mxu1 %v2969_v55 }
 0x5b0   : > { %v2927_v61 = vpop.permute.xlu1 %2926  ;;  %v2929_v45 = vpop.permute.xlu0 %2928  ;;  %3124 = vmatpush1.msra.mxu1 %v2968_v46 }
 0x5b1   : > { %v2934_v62 = vsel %vm2351_vm8, %v2925_v36, %v2927_v61  ;;  %v2935_v50 = vsel %vm2351_vm8, %v2927_v61, %v2929_v45 }
 0x5b2   : > { %2943 = vst [vmem:[#allocation4 + $0xc8] sm:$0xff] %v2934_v62  ;;  %2944 = vst [vmem:[#allocation4 + $0xd0] sm:$0xff] %v2935_v50  ;;  %3562 = vrot.lane.b32.xlu0 %v6594_v24, %s5965_s24  ;;  %3497 = vrot.lane.b32.xlu1 %v6656_v0, %s5966_s26 }
 0x5b3   : > { %3125 = vmatprep.subr.mxu1 %v2935_v50 }
 0x5b4   : > { %v2882_v59 = vpop.permute.xlu1 %2881  ;;  %v7036_v58 = vpop.permute.xlu0 %2842  ;;  %3126 = vmatpush1.msra.mxu1 %v2934_v62 }
 0x5b5   : > { %v2890_v6 = vsel %vm2305_vm9, %v2880_v38, %v2882_v59  ;;  %3127 = vmatprep.subr.mxu1 %v6865_v8  ;;  %v2851_v24 = vsel %vm2265_vm13, %v6983_v43, %v7036_v58  ;;  %v2850_v8 = vsel %vm2265_vm13, %v6959_v31, %v6983_v43 }
 0x5b6   : > { %2900 = vst [vmem:[#allocation4 + $0x80] sm:$0xff] %v2890_v6  ;;  %3566 = vrot.lane.b32.xlu0 %v6656_v0, %s5965_s24  ;;  %3128 = vmatpush1.msra.mxu1 %v6846_v63 }
 0x5b7   : > { %3129 = vmatprep.subr.mxu1 %v2890_v6 }
 0x5b8   : > { %v7047_v11 = vpop.permute.xlu1 %2803  ;;  %v7049_v13 = vpop.permute.xlu0 %2764  ;;  %3130 = vmatpush1.msra.mxu1 %v6986_v47 }
 0x5b9   : > { %v2812_v0 = vsel %vm2225_vm14, %v2802_v48, %v7047_v11  ;;  %3131 = vmatprep.subr.mxu1 %v2851_v24  ;;  %v2773_v63 = vsel %vm2185_vm15, %v6994_v5, %v7049_v13 }
 0x5ba   : > { %2822 = vst [vmem:[#allocation4 + $0x30] sm:$0xff] %v2812_v0  ;;  %5842 = vrot.lane.b32.xlu0 %v5841_v10, %s5966_s26  ;;  %3132 = vmatpush1.msra.mxu1 %v2850_v8 }
 0x5bb   : > { %3133 = vmatprep.subr.mxu1 %v2812_v0 }
 0x5bc   : > { %v3033_v14 = vpop.permute.xlu1 %3032  ;;  %v2884_v15 = vpop.permute.xlu0 %2883  ;;  %3134 = vmatpush1.msra.mxu1 %v6997_v27  ;;  %v7104_v27 = vld [vmem:[#allocation2 + $0x28] sm:$0xff] }
 0x5bd   : > { %v7071_v22 = vsel %vm2305_vm9, %v2882_v59, %v2884_v15  ;;  %3135 = vmatprep.subr.mxu1 %v2773_v63 }
 0x5be   : > { %2901 = vst [vmem:[#allocation4 + $0x88] sm:$0xff] %v7071_v22  ;;  %3495 = vrot.lane.b32.xlu0 %v6604_v40, %s5966_s26  ;;  %3136 = vmatpush1.msra.mxu1 %v2772_v18 }
 0x5bf   : > { %5636 = vmatmul.mubr.msk.f32.vlgmr.msra.gmra.mxu1 %vm1168_vm10, %v7065_v17  ;;  %5755 = vmatprep.subr.mxu1 %v6839_v60 }
 0x5c0   : > { %v7079_v23 = vpop.permute.xlu1 %2885  ;;  %v2999_v20 = vpop.permute.xlu0 %2998  ;;  %5773 = vmatprep.mubr.msk.f32.mxu1 %vm5951_vm11, %v6839_v60  ;;  %vm3894_vm11 = vcmask 293888  }
 0x5c1   : > { %v2892_v25 = vsel %vm2305_vm9, %v2884_v15, %v7079_v23  ;;  %v3004_v31 = vsel %vm2421_vm6, %v7012_v44, %v2999_v20 }
 0x5c2   : > { %2902 = vst [vmem:[#allocation4 + $0x90] sm:$0xff] %v2892_v25  ;;  %3013 = vst [vmem:[#allocation4 + $0x128] sm:$0xff] %v3004_v31  ;;  %3499 = vrot.lane.b32.xlu0 %v6667_v4, %s5966_s26  ;;  %v3038_v4 = vsel %vm2456_vm5, %v7004_v52, %v3033_v14 }
 0x5c4   : > { %v7089_v40 = vpop.permute.xlu1 %2846  ;;  %v2965_v32 = vpop.permute.xlu0 %2964 }
 0x5c5   : > { %v2970_v37 = vsel %vm2386_vm7, %v7021_v56, %v2965_v32  ;;  %v3074_v56 = vld [vmem:[#allocation4 + $0xc0] sm:$0xff] }
 0x5c8   : > { %v3001_v33 = vpop.permute.xlu1 %3000  ;;  %v2931_v35 = vpop.permute.xlu0 %2930 }
 0x5c9   : > { %v3005_v1 = vsel %vm2421_vm6, %v2999_v20, %v3001_v33  ;;  %3015 = vst.msk [vmem:[#allocation4 + $0x138] sm:$0xff] %vm703_vm1, %v3001_v33  ;;  %v2936_v21 = vsel %vm2351_vm8, %v2929_v45, %v2931_v35  ;;  %vm3511_vm6 = vcmask 818176  }
 0x5ca   : > { %3014 = vst [vmem:[#allocation4 + $0x130] sm:$0xff] %v3005_v1  ;;  %2945 = vst [vmem:[#allocation4 + $0xd8] sm:$0xff] %v2936_v21 }
 0x5cc   : > { %v2967_v29 = vpop.permute.xlu1 %2966  ;;  %v3035_v36 = vpop.permute.xlu0 %3034 }
 0x5cd   : > { %2981 = vst.msk [vmem:[#allocation4 + $0x110] sm:$0xff] %vm703_vm1, %v2967_v29  ;;  %v3039_v41 = vsel %vm2456_vm5, %v3033_v14, %v3035_v36  ;;  %3049 = vst.msk [vmem:[#allocation4 + $0x160] sm:$0xff] %vm703_vm1, %v3035_v36  ;;  %v2971_v38 = vsel %vm2386_vm7, %v2965_v32, %v2967_v29  ;;  %vm3580_vm5 = vcmask 785408  }
 0x5ce   : > { %3190 = vmatprep.subr.mxu0 %v3039_v41 }
 0x5cf   : > { %3191 = vmatpush1.msra.mxu0 %v3038_v4 }
 0x5d0   : > { %v2933_v42 = vpop.permute.xlu1 %2932  ;;  %v2845_v43 = vpop.permute.xlu0 %2844  ;;  %3192 = vmatprep.subr.mxu0 %v3005_v1  ;;  %v3089_v30 = vld [vmem:[#allocation4 + $0x138] sm:$0xff] }
 0x5d1   : > { %v2937_v47 = vsel %vm2351_vm8, %v2931_v35, %v2933_v42  ;;  %2947 = vst.msk [vmem:[#allocation4 + $0xe8] sm:$0xff] %vm703_vm1, %v2933_v42  ;;  %3193 = vmatpush1.msra.mxu0 %v3004_v31  ;;  %v2853_v44 = vsel %vm2265_vm13, %v2845_v43, %v7089_v40  ;;  %v2852_v28 = vsel %vm2265_vm13, %v7036_v58, %v2845_v43 }
 0x5d2   : > { %2946 = vst [vmem:[#allocation4 + $0xe0] sm:$0xff] %v2937_v47  ;;  %3194 = vmatprep.subr.mxu0 %v2971_v38 }
 0x5d3   : > { %3195 = vmatpush1.msra.mxu0 %v2970_v37 }
 0x5d4   : > { %v2806_v2 = vpop.permute.xlu1 %2805  ;;  %v2808_v5 = vpop.permute.xlu0 %2807  ;;  %v3094_v48 = vld [vmem:[#allocation4 + $0x160] sm:$0xff]  ;;  %3196 = vmatprep.subr.mxu0 %v2937_v47  ;;  %v3084_v39 = vld [vmem:[#allocation4 + $0x110] sm:$0xff] }
 0x5d5   : > { %v2813_v51 = vsel %vm2225_vm14, %v7047_v11, %v2806_v2  ;;  %v2814_v52 = vsel %vm2225_vm14, %v2806_v2, %v2808_v5  ;;  %5756 = vmatpush3.msra.mxu1 %v3094_v48  ;;  %3771 = vst.msk [vmem:[#allocation4 + $0x160] sm:$0xff] %vm703_vm1, %v7104_v27  ;;  %3197 = vmatpush1.msra.mxu0 %v2936_v21 }
 0x5d6   : > { %2823 = vst [vmem:[#allocation4 + $0x38] sm:$0xff] %v2813_v51  ;;  %2824 = vst [vmem:[#allocation4 + $0x40] sm:$0xff] %v2814_v52  ;;  %5757 = vmatprep.subr.mxu1 %v6839_v60  ;;  %3198 = vmatprep.subr.mxu0 %v6898_v19 }
 0x5d7   : > { %5758 = vmatpush3.msra.mxu1 %v3089_v30  ;;  %3199 = vmatpush1.msra.mxu0 %v6868_v9 }
 0x5d8   : > { %v2769_v49 = vpop.permute.xlu1 %2768  ;;  %5759 = vmatprep.subr.mxu1 %v6839_v60  ;;  %v2767_v53 = vpop.permute.xlu0 %2766  ;;  %3200 = vmatprep.subr.mxu0 %v2892_v25  ;;  %v3079_v19 = vld [vmem:[#allocation4 + $0xe8] sm:$0xff] }
 0x5d9   : > { %5760 = vmatpush3.msra.mxu1 %v3084_v39  ;;  %3201 = vmatpush1.msra.mxu0 %v7071_v22  ;;  %v2775_v57 = vsel %vm2185_vm15, %v2767_v53, %v2769_v49  ;;  %v2774_v61 = vsel %vm2185_vm15, %v7049_v13, %v2767_v53 }
 0x5da   : > { %5761 = vmatprep.subr.mxu1 %v6839_v60  ;;  %3202 = vmatprep.subr.mxu0 %v2853_v44 }
 0x5db   : > { %5762 = vmatpush3.msra.mxu1 %v3079_v19  ;;  %3203 = vmatpush1.msra.mxu0 %v2852_v28 }
 0x5dc   : > { %v2849_v9 = vpop.permute.xlu1 %2848  ;;  %5763 = vmatprep.subr.mxu1 %v6839_v60  ;;  %v2888_v54 = vpop.permute.xlu0 %2887  ;;  %3204 = vmatprep.subr.mxu0 %v2814_v52 }
 0x5dd   : > { %v2854_v46 = vsel %vm2265_vm13, %v7089_v40, %v2849_v9  ;;  %v2893_v55 = vsel %vm2305_vm9, %v7079_v23, %v2888_v54  ;;  %5764 = vmatpush3.msra.mxu1 %v3074_v56  ;;  %3205 = vmatpush1.msra.mxu0 %v2813_v51 }
 0x5de   : > { %2864 = vst.msk [vmem:[#allocation4 + $0x70] sm:$0xff] %vm703_vm1, %v2854_v46  ;;  %2903 = vst.msk [vmem:[#allocation4 + $0x98] sm:$0xff] %vm703_vm1, %v2893_v55  ;;  %5765 = vmatprep.subr.mxu1 %v6839_v60  ;;  %3206 = vmatprep.subr.mxu0 %v2775_v57 }
 0x5df   : > { %3207 = vmatpush1.msra.mxu0 %v2774_v61 }
 0x5e0   : > { %v2771_v45 = vpop.permute.xlu1 %2770  ;;  %v2810_v62 = vpop.permute.xlu0 %2809  ;;  %5637 = vmatmul.mubr.msk.f32.vlgmr.msra.gmra.mxu0 %vm1168_vm10, %v7065_v17 }
 0x5e1   : > { %v2776_v50 = vsel %vm2185_vm15, %v2769_v49, %v2771_v45  ;;  %v2815_v34 = vsel %vm2225_vm14, %v2808_v5, %v2810_v62  ;;  %vm4189_vm15 = vcmask 130048  }
 0x5e2   : > { %2786 = vst.msk [vmem:[#allocation4 + $0x20] sm:$0xff] %vm703_vm1, %v2776_v50  ;;  %2825 = vst.msk [vmem:[#allocation4 + $0x48] sm:$0xff] %vm703_vm1, %v2815_v34 }
 0x5e5   : > { %v3069_v59 = vld [vmem:[#allocation4 + $0x98] sm:$0xff]  ;;  %v3064_v58 = vld [vmem:[#allocation4 + $0x70] sm:$0xff] }
 0x5e6   : > { %5766 = vmatpush3.msra.mxu1 %v3069_v59 }
 0x5e7   : > { %5767 = vmatprep.subr.mxu1 %v6839_v60 }
 0x5e8   : > { %5768 = vmatpush3.msra.mxu1 %v3064_v58 }
 0x5e9   : > { %5769 = vmatprep.subr.mxu1 %v6839_v60  ;;  %v3059_v6 = vld [vmem:[#allocation4 + $0x48] sm:$0xff]  ;;  %v3054_v10 = vld [vmem:[#allocation4 + $0x20] sm:$0xff] }
 0x5ea   : > { %5770 = vmatpush3.msra.mxu1 %v3059_v6 }
 0x5eb   : > { %5771 = vmatprep.subr.mxu1 %v6839_v60 }
 0x5ec   : > { %5772 = vmatpush3.msra.mxu1 %v3054_v10 }
 0x5ed   : > { %v7141_v24 = vpop.permute.xlu1 %3425  ;;  %5774 = vmatmul.mubr.msk.f32.vlgmr.msra.gmra.mxu1 %vm1168_vm10, %v7065_v17  ;;  %v7145_v11 = vpop.permute.xlu0 %3099  ;;  %vm3817_vm10 = vcmask 1014784  }
 0x5f1   : > { %v7147_v13 = vpop.permute.xlu1 %3953  ;;  %v7149_v8 = vpop.permute.xlu0 %3436 }
 0x5f5   : > { %v7151_v0 = vpop.permute.xlu1 %3955  ;;  %v7153_v63 = vpop.permute.xlu0 %3951 }
 0x5f9   : > { %v7155_v14 = vpop.permute.xlu1 %3874  ;;  %v7157_v60 = vpop.permute.xlu0 %3949 }
 0x5fd   : > { %v7159_v15 = vpop.permute.xlu1 %3876  ;;  %v7161_v18 = vpop.permute.xlu0 %3957 }
 0x5fe   : > { %v3897_v17 = vsel %vm3894_vm11, %v7155_v14, %v7159_v15 }
 0x5ff   : > { %3917 = vst [vmem:[#allocation4 + $0x1f0] sm:$0xff] %v3897_v17 }
 0x601   : > { %v7166_v22 = vpop.permute.xlu1 %3801  ;;  %v7168_v23 = vpop.permute.xlu0 %3872 }
 0x605   : > { %v7170_v20 = vpop.permute.xlu1 %3803  ;;  %v7172_v25 = vpop.permute.xlu0 %3870 }
 0x606   : > { %v3820_v31 = vsel %vm3817_vm10, %v7166_v22, %v7170_v20 }
 0x607   : > { %3838 = vst [vmem:[#allocation4 + $0x1a0] sm:$0xff] %v3820_v31 }
 0x609   : > { %v7177_v40 = vpop.permute.xlu1 %5827  ;;  %v7179_v32 = vpop.permute.xlu0 %3878 }
 0x60d   : > { %v7181_v33 = vpop.permute.xlu1 %3706  ;;  %v7183_v35 = vpop.permute.xlu0 %3799 }
 0x611   : > { %v7185_v1 = vpop.permute.xlu1 %3710  ;;  %v7187_v21 = vpop.permute.xlu0 %3797 }
 0x615   : > { %v7189_v29 = vpop.permute.xlu1 %3631  ;;  %v7191_v36 = vpop.permute.xlu0 %3805 }
 0x616   : > { %3840 = vst.msk [vmem:[#allocation4 + $0x1b0] sm:$0xff] %vm703_vm1, %v7191_v36 }
 0x619   : > { %v3636_v41 = vpop.permute.xlu1 %3635  ;;  %v7195_v4 = vpop.permute.xlu0 %3704 }
 0x61d   : > { %v7197_v42 = vpop.permute.xlu1 %5837  ;;  %v3709_v43 = vpop.permute.xlu0 %3708 }
 0x61e   : > { %v3729_v38 = vsel %vm3726_vm2, %v7181_v33, %v3709_v43  ;;  %v3730_v47 = vsel %vm3726_vm2, %v3709_v43, %v7185_v1 }
 0x61f   : > { %3749 = vst [vmem:[#allocation4 + $0x100] sm:$0xff] %v3729_v38  ;;  %3750 = vst [vmem:[#allocation4 + $0x108] sm:$0xff] %v3730_v47 }
 0x621   : > { %v7203_v37 = vpop.permute.xlu1 %3564  ;;  %v7205_v2 = vpop.permute.xlu0 %5832 }
 0x625   : > { %v3569_v5 = vpop.permute.xlu1 %3568  ;;  %v7207_v48 = vpop.permute.xlu0 %3633 }
 0x626   : > { %3603 = vst.msk [vmem:[#allocation4 + $0x70] sm:$0xff] %vm703_vm1, %v3569_v5  ;;  %v3652_v51 = vsel %vm3649_vm3, %v7207_v48, %v3636_v41 }
 0x627   : > { %3670 = vst [vmem:[#allocation4 + $0xb0] sm:$0xff] %v3652_v51 }
 0x629   : > { %v3638_v52 = vpop.permute.xlu0 %3637  ;;  %v7219_v28 = vpop.permute.xlu1 %3493 }
 0x62a   : > { %v3653_v30 = vsel %vm3649_vm3, %v3636_v41, %v3638_v52  ;;  %3672 = vst.msk [vmem:[#allocation4 + $0xc0] sm:$0xff] %vm703_vm1, %v3638_v52 }
 0x62b   : > { %3671 = vst [vmem:[#allocation4 + $0xb8] sm:$0xff] %v3653_v30 }
 0x62d   : > { %v7214_v49 = vpop.permute.xlu0 %3562  ;;  %v3498_v9 = vpop.permute.xlu1 %3497 }
 0x631   : > { %v3567_v53 = vpop.permute.xlu0 %3566 }
 0x632   : > { %v3583_v39 = vsel %vm3580_vm5, %v7203_v37, %v3567_v53  ;;  %v3584_v44 = vsel %vm3580_vm5, %v3567_v53, %v3569_v5 }
 0x633   : > { %3601 = vst [vmem:[#allocation4 + $0x60] sm:$0xff] %v3583_v39  ;;  %3602 = vst [vmem:[#allocation4 + $0x68] sm:$0xff] %v3584_v44 }
 0x635   : > { %v7221_v19 = vpop.permute.xlu0 %5842 }
 0x639   : > { %v7223_v54 = vpop.permute.xlu0 %3495 }
 0x63a   : > { %v3514_v56 = vsel %vm3511_vm6, %v7223_v54, %v3498_v9 }
 0x63b   : > { %3532 = vst [vmem:[#allocation4 + $0x10] sm:$0xff] %v3514_v56 }
 0x63d   : > { %v3500_v57 = vpop.permute.xlu0 %3499 }
 0x63e   : > { %v3515_v46 = vsel %vm3511_vm6, %v3498_v9, %v3500_v57  ;;  %3534 = vst.msk [vmem:[#allocation4 + $0x20] sm:$0xff] %vm703_vm1, %v3500_v57 }
 0x63f   : > { %3533 = vst [vmem:[#allocation4 + $0x18] sm:$0xff] %v3515_v46 }
 0x67f   : > { %v3171_v55 = vpop.f32.mrf.mxu1 }
 0x680   : > { %v3172_v61 = vadd.f32 %v3171_v55, %v7145_v11 }
 0x681   : > { %v3173_v45 = vpop.f32.mrf.mxu1 }
 0x682   : > { %v3317_v62 = vsel %vm1989_vm12, %v3172_v61, 0.0  ;;  %v3174_v50 = vadd.f32 %v3173_v45, %v7145_v11 }
 0x683   : > { %v3318_v34 = vrot.slane %v3317_v62, 4 }
 0x684   : > { %v3324_v59 = vsel %vm1989_vm12, %v3174_v50, 0.0 }
 0x685   : > { %v3319_v58 = vadd.f32 %v3318_v34, %v3317_v62  ;;  %v3325_v6 = vrot.slane %v3324_v59, 4 }
 0x687   : > { %v3320_v10 = vrot.slane %v3319_v58, 2  ;;  %v3326_v17 = vadd.f32 %v3325_v6, %v3324_v59 }
 0x689   : > { %v3321_v31 = vadd.f32 %v3320_v10, %v3319_v58  ;;  %v3327_v41 = vrot.slane %v3326_v17, 2 }
 0x68b   : > { %v3322_v43 = vrot.slane %v3321_v31, 1  ;;  %v3328_v38 = vadd.f32 %v3327_v41, %v3326_v17 }
 0x68d   : > { %v3323_v47 = vadd.f32 %v3322_v43, %v3321_v31  ;;  %v3329_v5 = vrot.slane %v3328_v38, 1 }
 0x68f   : > { %v3352_v51 = vmul.f32 0.25, %v3323_v47  ;;  %v3330_v52 = vadd.f32 %v3329_v5, %v3328_v38 }
 0x691   : > { %v3357_v30 = vsub.f32 %v3172_v61, %v3352_v51  ;;  %v3353_v53 = vmul.f32 0.25, %v3330_v52 }
 0x693   : > { %v3362_v39 = vmul.f32 %v3357_v30, %v3357_v30  ;;  %v3358_v44 = vsub.f32 %v3174_v50, %v3353_v53 }
 0x695   : > { %v3367_v9 = vsel %vm1989_vm12, %v3362_v39, 0.0  ;;  %v3363_v56 = vmul.f32 %v3358_v44, %v3358_v44 }
 0x696   : > { %v3368_v57 = vrot.slane %v3367_v9, 4 }
 0x697   : > { %v3374_v46 = vsel %vm1989_vm12, %v3363_v56, 0.0 }
 0x698   : > { %v3369_v55 = vadd.f32 %v3368_v57, %v3367_v9  ;;  %v3375_v45 = vrot.slane %v3374_v46, 4 }
 0x69a   : > { %v3370_v62 = vrot.slane %v3369_v55, 2  ;;  %v3376_v34 = vadd.f32 %v3375_v45, %v3374_v46 }
 0x69c   : > { %v3371_v59 = vadd.f32 %v3370_v62, %v3369_v55  ;;  %v3377_v58 = vrot.slane %v3376_v34, 2 }
 0x69e   : > { %v3372_v6 = vrot.slane %v3371_v59, 1  ;;  %v3378_v10 = vadd.f32 %v3377_v58, %v3376_v34 }
 0x6a0   : > { %v3373_v17 = vadd.f32 %v3372_v6, %v3371_v59  ;;  %v3379_v31 = vrot.slane %v3378_v10, 1  ;;  %v3242_v61 = vpop.f32.mrf.mxu0 }
 0x6a1   : > { %v3243_v41 = vadd.f32 %v3242_v61, %v7145_v11 }
 0x6a2   : > { %v3402_v50 = vmul.f32 0.25, %v3373_v17  ;;  %v3380_v43 = vadd.f32 %v3379_v31, %v3378_v10  ;;  %v3244_v38 = vpop.f32.mrf.mxu0 }
 0x6a3   : > { %v3331_v47 = vsel %vm1989_vm12, %v3243_v41, 0.0  ;;  %v3245_v5 = vadd.f32 %v3244_v38, %v7145_v11 }
 0x6a4   : > { %v3407_v51 = vadd.f32 1e-05, %v3402_v50  ;;  %v3403_v52 = vmul.f32 0.25, %v3380_v43  ;;  %v3332_v53 = vrot.slane %v3331_v47, 4 }
 0x6a5   : > { %v3338_v39 = vsel %vm1989_vm12, %v3245_v5, 0.0 }
 0x6a6   : > { %5889 = vrsqrt.f32 %v3407_v51  ;;  %v3408_v9 = vadd.f32 1e-05, %v3403_v52  ;;  %v3333_v56 = vadd.f32 %v3332_v53, %v3331_v47  ;;  %v3339_v57 = vrot.slane %v3338_v39, 4 }
 0x6a8   : > { %5891 = vrsqrt.f32 %v3408_v9  ;;  %v3334_v46 = vrot.slane %v3333_v56, 2  ;;  %v3340_v55 = vadd.f32 %v3339_v57, %v3338_v39 }
 0x6aa   : > { %v3335_v45 = vadd.f32 %v3334_v46, %v3333_v56  ;;  %v3341_v62 = vrot.slane %v3340_v55, 2 }
 0x6ac   : > { %v3336_v34 = vrot.slane %v3335_v45, 1  ;;  %v3342_v59 = vadd.f32 %v3341_v62, %v3340_v55  ;;  %v7251_v62 = vstv %s5639_s3 }
 0x6ad   : > { %v3313_v58 = vpop.f32.mrf.mxu1 }
 0x6ae   : > { %v3337_v6 = vadd.f32 %v3336_v34, %v3335_v45  ;;  %v3343_v10 = vrot.slane %v3342_v59, 1  ;;  %v3314_v17 = vadd.f32 %v3313_v58, %v7145_v11 }
 0x6af   : > { %v5775_v31 = vpop.f32.mrf.mxu1 }
 0x6b0   : > { %v3354_v61 = vmul.f32 0.25, %v3337_v6  ;;  %v3344_v50 = vadd.f32 %v3343_v10, %v3342_v59  ;;  %v3345_v43 = vsel %vm804_vm0, %v3314_v17, 0.0 }
 0x6b1   : > { %v3346_v38 = vrot.slane %v3345_v43, 4 }
 0x6b2   : > { %v7241_v47 = vsub.f32 %v3243_v41, %v3354_v61  ;;  %v3355_v51 = vmul.f32 0.25, %v3344_v50 }
 0x6b3   : > { %v5890_v52 = vpop.eup %5889  ;;  %v3347_v53 = vadd.f32 %v3346_v38, %v3345_v43 }
 0x6b4   : > { %v3417_v39 = vmul.f32 %v5890_v52, %v3357_v30  ;;  %v3364_v9 = vmul.f32 %v7241_v47, %v7241_v47  ;;  %v7245_v56 = vsub.f32 %v3245_v5, %v3355_v51 }
 0x6b5   : > { %v5892_v57 = vpop.eup %5891  ;;  %v3348_v11 = vrot.slane %v3347_v53, 2 }
 0x6b6   : > { %v3428_v46 = vmul.f32 %v7141_v24, %v3417_v39  ;;  %v3418_v55 = vmul.f32 %v5892_v57, %v3358_v44  ;;  %v3381_v45 = vsel %vm1989_vm12, %v3364_v9, 0.0  ;;  %v3365_v41 = vmul.f32 %v7245_v56, %v7245_v56 }
 0x6b7   : > { %v3382_v34 = vrot.slane %v3381_v45, 4  ;;  %v3349_v59 = vadd.f32 %v3348_v11, %v3347_v53 }
 0x6b8   : > { %v3439_v30 = vadd.f32 %v7149_v8, %v3428_v46  ;;  %v3429_v58 = vmul.f32 %v7141_v24, %v3418_v55  ;;  %v3388_v5 = vsel %vm1989_vm12, %v3365_v41, 0.0 }
 0x6b9   : > { %v3383_v6 = vadd.f32 %v3382_v34, %v3381_v45  ;;  %v3389_v10 = vrot.slane %v3388_v5, 4  ;;  %v3350_v31 = vrot.slane %v3349_v59, 1 }
 0x6ba   : > { %vm3445_vm7 = vcmp.ge.f32.partialorder %v3439_v30, 0.0  ;;  %v3451_v44 = vmul.f32 %v7251_v62, %v3439_v30  ;;  %v3440_v61 = vadd.f32 %v7149_v8, %v3429_v58 }
 0x6bb   : > { %v3384_v50 = vrot.slane %v3383_v6, 2  ;;  %v3390_v43 = vadd.f32 %v3389_v10, %v3388_v5  ;;  %v3351_v38 = vadd.f32 %v3350_v31, %v3349_v59 }
 0x6bc   : > { %v3456_v51 = vsel %vm3445_vm7, %v3439_v30, %v3451_v44  ;;  %vm3446_vm8 = vcmp.ge.f32.partialorder %v3440_v61, 0.0  ;;  %v3452_v52 = vmul.f32 %v7251_v62, %v3440_v61  ;;  %vm3973_vm7 = vcmask 261120  }
 0x6bd   : > { %v3461_v53 = vmul.f32 %v3456_v51, %v6359_v3  ;;  %v3385_v39 = vadd.f32 %v3384_v50, %v3383_v6  ;;  %v3391_v9 = vrot.slane %v3390_v43, 2  ;;  %v3356_v57 = vmul.f32 0.25, %v3351_v38 }
 0x6be   : > { %v3457_v11 = vsel %vm3446_vm8, %v3440_v61, %v3452_v52  ;;  %vm4052_vm8 = vcmask 228352  }
 0x6bf   : > { %3466 = vst [vmem:[#allocation2 + $0x40] sm:$0xf] %v3461_v53  ;;  %v3462_v46 = vmul.f32 %v3457_v11, %v6361_v7  ;;  %v3386_v55 = vrot.slane %v3385_v39, 1  ;;  %v3392_v45 = vadd.f32 %v3391_v9, %v3390_v43  ;;  %v7261_v41 = vsub.f32 %v3314_v17, %v3356_v57 }
 0x6c1   : > { %3467 = vst [vmem:[#allocation2 + $0x48] sm:$0xf] %v3462_v46  ;;  %v3387_v34 = vadd.f32 %v3386_v55, %v3385_v39  ;;  %v3393_v59 = vrot.slane %v3392_v45, 1  ;;  %v3366_v30 = vmul.f32 %v7261_v41, %v7261_v41 }
 0x6c3   : > { %v3404_v58 = vmul.f32 0.25, %v3387_v34  ;;  %v3394_v5 = vadd.f32 %v3393_v59, %v3392_v45  ;;  %v3395_v6 = vsel %vm804_vm0, %v3366_v30, 0.0 }
 0x6c4   : > { %v3396_v10 = vrot.slane %v3395_v6, 4 }
 0x6c5   : > { %v3409_v31 = vadd.f32 1e-05, %v3404_v58  ;;  %v3405_v44 = vmul.f32 0.25, %v3394_v5 }
 0x6c6   : > { %v3397_v61 = vadd.f32 %v3396_v10, %v3395_v6  ;;  %v3931_v50 = vld [vmem:[#allocation2 + $0x40] sm:$0xf] }
 0x6c7   : > { %v3615_v38 = vld [vmem:[#allocation2 + $0x40] sm:$0xf]  ;;  %5893 = vrsqrt.f32 %v3409_v31  ;;  %v3410_v43 = vadd.f32 1e-05, %v3405_v44  ;;  %3961 = vrot.lane.b32.xlu1 %v3931_v50, %s5960_s30 }
 0x6c8   : > { %3641 = vrot.lane.b32.xlu0 %v3615_v38, %s5964_s23  ;;  %v3398_v17 = vrot.slane %v3397_v61, 2  ;;  %v3852_v52 = vld [vmem:[#allocation2 + $0x40] sm:$0xf]  ;;  %v3763_v9 = vld [vmem:[#allocation2 + $0x48] sm:$0xf] }
 0x6c9   : > { %5895 = vrsqrt.f32 %v3410_v43  ;;  %v3477_v53 = vld [vmem:[#allocation2 + $0x40] sm:$0xf]  ;;  %3773 = vst [vmem:[#allocation4 + $0x170] sm:$0xf] %v3763_v9  ;;  %v3686_v55 = vld [vmem:[#allocation2 + $0x48] sm:$0xf] }
 0x6ca   : > { %v3399_v51 = vadd.f32 %v3398_v17, %v3397_v61  ;;  %v3762_v57 = vld [vmem:[#allocation2 + $0x40] sm:$0xf]  ;;  %v3547_v30 = vld [vmem:[#allocation2 + $0x48] sm:$0xf] }
 0x6cb   : > { %3882 = vrot.lane.b32.xlu1 %v3852_v52, %s5961_s5  ;;  %3772 = vst [vmem:[#allocation4 + $0x168] sm:$0xf] %v3762_v57  ;;  %v3782_v46 = vld [vmem:[#allocation2 + $0x40] sm:$0xf]  ;;  %v3932_v38 = vld [vmem:[#allocation2 + $0x48] sm:$0xf] }
 0x6cc   : > { %3503 = vrot.lane.b32.xlu0 %v3477_v53, %s5966_s26  ;;  %v3400_v39 = vrot.slane %v3399_v51, 1  ;;  %v3685_v59 = vld [vmem:[#allocation2 + $0x40] sm:$0xf]  ;;  %v3853_v52 = vld [vmem:[#allocation2 + $0x48] sm:$0xf] }
 0x6cd   : > { %v3546_v10 = vld [vmem:[#allocation2 + $0x40] sm:$0xf] }
 0x6ce   : > { %v3401_v11 = vadd.f32 %v3400_v39, %v3399_v51 }
 0x6cf   : > { %3807 = vrot.lane.b32.xlu1 %v3782_v46, %s5962_s22 }
 0x6d0   : > { %3718 = vrot.lane.b32.xlu0 %v3686_v55, %s5963_s0  ;;  %v3406_v45 = vmul.f32 0.25, %v3401_v11  ;;  %v3783_v11 = vld [vmem:[#allocation2 + $0x48] sm:$0xf] }
 0x6d2   : > { %v3411_v34 = vadd.f32 1e-05, %v3406_v45  ;;  %v3616_v45 = vld [vmem:[#allocation2 + $0x48] sm:$0xf] }
 0x6d3   : > { %3716 = vrot.lane.b32.xlu1 %v3685_v59, %s5963_s0 }
 0x6d4   : > { %3574 = vrot.lane.b32.xlu0 %v3547_v30, %s5965_s24  ;;  %v5894_v58 = vpop.eup %5893  ;;  %5897 = vrsqrt.f32 %v3411_v34 }
 0x6d5   : > { %v3419_v5 = vmul.f32 %v5894_v58, %v7241_v47  ;;  %v3478_v58 = vld [vmem:[#allocation2 + $0x48] sm:$0xf] }
 0x6d6   : > { %v5896_v6 = vpop.eup %5895 }
 0x6d7   : > { %v3430_v31 = vmul.f32 %v7141_v24, %v3419_v5  ;;  %v3420_v44 = vmul.f32 %v5896_v6, %v7245_v56  ;;  %3572 = vrot.lane.b32.xlu1 %v3546_v10, %s5965_s24  ;;  %v4011_v6 = vld [vmem:[#allocation2 + $0x48] sm:$0xf] }
 0x6d9   : > { %v3441_v61 = vadd.f32 %v7149_v8, %v3430_v31  ;;  %v3431_v50 = vmul.f32 %v7141_v24, %v3420_v44 }
 0x6db   : > { %vm3447_vm9 = vcmp.ge.f32.partialorder %v3441_v61, 0.0  ;;  %v3453_v43 = vmul.f32 %v7251_v62, %v3441_v61  ;;  %v3442_v17 = vadd.f32 %v7149_v8, %v3431_v50  ;;  %3963 = vrot.lane.b32.xlu1 %v3932_v38, %s5960_s30 }
 0x6dd   : > { %v3458_v47 = vsel %vm3447_vm9, %v3441_v61, %v3453_v43  ;;  %vm3448_vm13 = vcmp.ge.f32.partialorder %v3442_v17, 0.0  ;;  %v3454_v51 = vmul.f32 %v7251_v62, %v3442_v17 }
 0x6de   : > { %v3463_v56 = vmul.f32 %v3458_v47, %v6364_v12 }
 0x6df   : > { %v3459_v53 = vsel %vm3448_vm13, %v3442_v17, %v3454_v51  ;;  %3884 = vrot.lane.b32.xlu1 %v3853_v52, %s5961_s5  ;;  %v4010_v52 = vld [vmem:[#allocation2 + $0x40] sm:$0xf] }
 0x6e0   : > { %3468 = vst [vmem:[#allocation2 + $0x50] sm:$0xf] %v3463_v56  ;;  %v3464_v39 = vmul.f32 %v3459_v53, %v6367_v16 }
 0x6e1   : > { %v5898_v9 = vpop.eup %5897 }
 0x6e2   : > { %3469 = vst [vmem:[#allocation2 + $0x58] sm:$0xf] %v3464_v39  ;;  %v3421_v57 = vmul.f32 %v5898_v9, %v7261_v41  ;;  %v4005_v9 = vld [vmem:[#allocation2 + $0x10] sm:$0xff] }
 0x6e3   : > { %3809 = vrot.lane.b32.xlu1 %v3783_v11, %s5962_s22 }
 0x6e4   : > { %v3432_v46 = vmul.f32 %v7141_v24, %v3421_v57  ;;  %v4006_v57 = vld [vmem:[#allocation2 + $0x18] sm:$0xff] }
 0x6e6   : > { %v3443_v55 = vadd.f32 %v7149_v8, %v3432_v46  ;;  %v7319_v46 = vld [vmem:[%s8170_s15 + $0x8] sm:$0xff] }
 0x6e7   : > { %3643 = vrot.lane.b32.xlu1 %v3616_v45, %s5964_s23  ;;  %v3933_v34 = vld [vmem:[#allocation2 + $0x50] sm:$0xf]  ;;  %5640 = vmatprep.mubr.msk.f32.mxu0 %vm4189_vm15, %v7319_v46  ;;  %v4004_v45 = vld [vmem:[#allocation2 + $0x8] sm:$0xff] }
 0x6e8   : > { %vm3449_vm14 = vcmp.ge.f32.partialorder %v3443_v55, 0.0  ;;  %v3455_v59 = vmul.f32 %v7251_v62, %v3443_v55  ;;  %3965 = vrot.lane.b32.xlu0 %v3933_v34, %s5960_s30  ;;  %v3854_v5 = vld [vmem:[#allocation2 + $0x50] sm:$0xf]  ;;  %5642 = vmatprep.mubr.msk.f32.mxu1 %vm4189_vm15, %v7319_v46  ;;  %v4007_v34 = vld [vmem:[#allocation2 + $0x20] sm:$0xff] }
 0x6e9   : > { %v3765_v24 = vld [vmem:[#allocation2 + $0x58] sm:$0xf]  ;;  %v3764_v8 = vld [vmem:[#allocation2 + $0x50] sm:$0xf] }
 0x6ea   : > { %v3460_v30 = vsel %vm3449_vm14, %v3443_v55, %v3455_v59  ;;  %3775 = vst [vmem:[#allocation4 + $0x180] sm:$0xf] %v3765_v24  ;;  %3774 = vst [vmem:[#allocation4 + $0x178] sm:$0xf] %v3764_v8  ;;  %v3784_v62 = vld [vmem:[#allocation2 + $0x50] sm:$0xf] }
 0x6eb   : > { %v3465_v41 = vmul.f32 %v3460_v30, %v6372_v26  ;;  %3505 = vrot.lane.b32.xlu1 %v3478_v58, %s5966_s26  ;;  %v3617_v10 = vld [vmem:[#allocation2 + $0x50] sm:$0xf]  ;;  %v3934_v43 = vld [vmem:[#allocation2 + $0x58] sm:$0xf]  ;;  %v7336_v24 = vld [vmem:[#allocation2] sm:$0xff] }
 0x6ec   : > { %3886 = vrot.lane.b32.xlu0 %v3854_v5, %s5961_s5  ;;  %v3687_v31 = vld [vmem:[#allocation2 + $0x50] sm:$0xf]  ;;  %v3855_v47 = vld [vmem:[#allocation2 + $0x58] sm:$0xf]  ;;  %v3857_v5 = vld [vmem:[#allocation2 + $0x68] sm:$0xf] }
 0x6ed   : > { %3470 = vst.msk [vmem:[#allocation2 + $0x60] sm:$0xf] %vm804_vm0, %v3465_v41  ;;  %v3479_v44 = vld [vmem:[#allocation2 + $0x50] sm:$0xf]  ;;  %v3785_v56 = vld [vmem:[#allocation2 + $0x58] sm:$0xf] }
 0x6ee   : > { %v3548_v50 = vld [vmem:[#allocation2 + $0x50] sm:$0xf]  ;;  %v3688_v39 = vld [vmem:[#allocation2 + $0x58] sm:$0xf]  ;;  %v3936_v41 = vld [vmem:[#allocation2 + $0x68] sm:$0xf] }
 0x6ef   : > { %4042 = vrot.lane.b32.xlu1 %v4011_v6, %s5967_s28  ;;  %v4012_v53 = vld [vmem:[#allocation2 + $0x50] sm:$0xf]  ;;  %v3618_v11 = vld [vmem:[#allocation2 + $0x58] sm:$0xf]  ;;  %v4015_v6 = vld [vmem:[#allocation2 + $0x68] sm:$0xf] }
 0x6f0   : > { %3811 = vrot.lane.b32.xlu0 %v3784_v62, %s5962_s22  ;;  %v3549_v55 = vld [vmem:[#allocation2 + $0x58] sm:$0xf]  ;;  %v4178_v62 = vld [vmem:[%s8171_s16 + $0x8] sm:$0xf] }
 0x6f1   : > { %v3480_v59 = vld [vmem:[#allocation2 + $0x58] sm:$0xf] }
 0x6f2   : > { %v4013_v58 = vld [vmem:[#allocation2 + $0x58] sm:$0xf] }
 0x6f3   : > { %3645 = vrot.lane.b32.xlu1 %v3617_v10, %s5964_s23  ;;  %v4177_v10 = vld [vmem:[%s8171_s16] sm:$0xff] }
 0x6f4   : > { %3720 = vrot.lane.b32.xlu0 %v3687_v31, %s5963_s0  ;;  %v3766_v61 = vld [vmem:[#allocation2 + $0x60] sm:$0xf]  ;;  %v5834_v31 = vunpack.i.l.bf16 %v7205_v2 }
 0x6f5   : > { %3776 = vst.msk [vmem:[#allocation4 + $0x188] sm:$0xf] %vm804_vm0, %v3766_v61  ;;  %v3935_v38 = vld [vmem:[#allocation2 + $0x60] sm:$0xf] }
 0x6f6   : > { %v3856_v17 = vld [vmem:[#allocation2 + $0x60] sm:$0xf] }
 0x6f7   : > { %3507 = vrot.lane.b32.xlu1 %v3479_v44, %s5966_s26  ;;  %v3786_v51 = vld [vmem:[#allocation2 + $0x60] sm:$0xf] }
 0x6f8   : > { %3576 = vrot.lane.b32.xlu0 %v3548_v50, %s5965_s24  ;;  %v4014_v30 = vld [vmem:[#allocation2 + $0x60] sm:$0xf]  ;;  %v5844_v50 = vunpack.i.l.bf16 %v7221_v19 }
 0x6f9   : > { %v3689_v8 = vld [vmem:[#allocation2 + $0x60] sm:$0xf] }
 0x6fb   : > { %3969 = vrot.lane.b32.xlu1 %v3935_v38, %s5960_s30 }
 0x6fc   : > { %3967 = vrot.lane.b32.xlu0 %v3934_v43, %s5960_s30 }
 0x6ff   : > { %3890 = vrot.lane.b32.xlu1 %v3856_v17, %s5961_s5 }
 0x700   : > { %3888 = vrot.lane.b32.xlu0 %v3855_v47, %s5961_s5 }
 0x703   : > { %3815 = vrot.lane.b32.xlu1 %v3786_v51, %s5962_s22 }
 0x704   : > { %3813 = vrot.lane.b32.xlu0 %v3785_v56, %s5962_s22  ;;  %v5829_v56 = vunpack.i.l.bf16 %v7177_v40 }
 0x707   : > { %4040 = vrot.lane.b32.xlu1 %v4010_v52, %s5967_s28 }
 0x708   : > { %4044 = vrot.lane.b32.xlu0 %v4012_v53, %s5967_s28 }
 0x70b   : > { %3722 = vrot.lane.b32.xlu1 %v3688_v39, %s5963_s0 }
 0x70c   : > { %4030 = vrot.lane.b32.xlu0 %v4005_v9, %s5967_s28  ;;  %v5839_v9 = vunpack.i.l.bf16 %v7197_v42 }
 0x70f   : > { %4032 = vrot.lane.b32.xlu1 %v4006_v57, %s5967_s28 }
 0x710   : > { %3647 = vrot.lane.b32.xlu0 %v3618_v11, %s5964_s23 }
 0x713   : > { %3578 = vrot.lane.b32.xlu1 %v3549_v55, %s5965_s24 }
 0x714   : > { %4028 = vrot.lane.b32.xlu0 %v4004_v45, %s5967_s28 }
 0x717   : > { %4034 = vrot.lane.b32.xlu1 %v4007_v34, %s5967_s28 }
 0x718   : > { %3509 = vrot.lane.b32.xlu0 %v3480_v59, %s5966_s26 }
 0x71b   : > { %4048 = vrot.lane.b32.xlu1 %v4014_v30, %s5967_s28 }
 0x71c   : > { %4046 = vrot.lane.b32.xlu0 %v4013_v58, %s5967_s28 }
 0x71f   : > { %3971 = vrot.lane.b32.xlu1 %v3936_v41, %s5960_s30 }
 0x720   : > { %4036 = vrot.lane.b32.xlu0 %v7104_v27, %s5967_s28 }
 0x723   : > { %3892 = vrot.lane.b32.xlu1 %v3857_v5, %s5961_s5 }
 0x724   : > { %3959 = vrot.lane.b32.xlu0 %v7336_v24, %s5960_s30 }
 0x727   : > { %3724 = vrot.lane.b32.xlu1 %v3689_v8, %s5963_s0 }
 0x728   : > { %3880 = vrot.lane.b32.xlu0 %v7336_v24, %s5961_s5 }
 0x72b   : > { %4050 = vrot.lane.b32.xlu1 %v4015_v6, %s5967_s28 }
 0x72c   : > { %3712 = vrot.lane.b32.xlu0 %v7104_v27, %s5963_s0 }
 0x72f   : > { %4186 = vperm.xlu1 %5825, %v4178_v62  }
 0x730   : > { %4038 = vrot.lane.b32.xlu0 %v7336_v24, %s5967_s28 }
 0x734   : > { %4181 = vperm.xlu0 %5824, %v4177_v10  }
 0x739   : > { %v3962_v44 = vpop.permute.xlu1 %3961 }
 0x73a   : > { %v3642_v61 = vpop.permute.xlu0 %3641 }
 0x73b   : > { %v3654_v27 = vsel %vm3649_vm3, %v5834_v31, %v3642_v61 }
 0x73c   : > { %3673 = vst [vmem:[#allocation4 + $0xc8] sm:$0xf] %v3654_v27 }
 0x73d   : > { %v3883_v38 = vpop.permute.xlu1 %3882 }
 0x73e   : > { %v3504_v43 = vpop.permute.xlu0 %3503 }
 0x73f   : > { %v3516_v17 = vsel %vm3511_vm6, %v5844_v50, %v3504_v43 }
 0x740   : > { %3535 = vst [vmem:[#allocation4 + $0x28] sm:$0xf] %v3516_v17 }
 0x741   : > { %v3808_v47 = vpop.permute.xlu1 %3807 }
 0x742   : > { %v3719_v51 = vpop.permute.xlu0 %3718 }
 0x745   : > { %v3717_v52 = vpop.permute.xlu1 %3716 }
 0x746   : > { %v3732_v53 = vsel %vm3726_vm2, %v5829_v56, %v3717_v52  ;;  %v3733_v39 = vsel %vm3726_vm2, %v3717_v52, %v3719_v51  ;;  %v3575_v57 = vpop.permute.xlu0 %3574 }
 0x747   : > { %3752 = vst [vmem:[#allocation4 + $0x118] sm:$0xf] %v3732_v53  ;;  %3753 = vst [vmem:[#allocation4 + $0x120] sm:$0xf] %v3733_v39  ;;  %v3974_v53 = vsel %vm3973_vm7, %v7157_v60, %v7153_v63  ;;  %v3895_v60 = vsel %vm3894_vm11, %v7172_v25, %v7168_v23  ;;  %v3818_v25 = vsel %vm3817_vm10, %v7187_v21, %v7183_v35  ;;  %v4123_v21 = vld [vmem:[#allocation4 + $0x140] sm:$0xff] }
 0x749   : > { %v3573_v11 = vpop.permute.xlu1 %3572 }
 0x74a   : > { %v3585_v55 = vsel %vm3580_vm5, %v5839_v9, %v3573_v11  ;;  %v3586_v45 = vsel %vm3580_vm5, %v3573_v11, %v3575_v57 }
 0x74b   : > { %3604 = vst [vmem:[#allocation4 + $0x78] sm:$0xf] %v3585_v55  ;;  %3605 = vst [vmem:[#allocation4 + $0x80] sm:$0xf] %v3586_v45 }
 0x74d   : > { %v3964_v34 = vpop.permute.xlu1 %3963 }
 0x74e   : > { %v3979_v59 = vsel %vm3973_vm7, %v3962_v44, %v3964_v34 }
 0x74f   : > { %3999 = vst [vmem:[#allocation4 + $0x258] sm:$0xf] %v3979_v59 }
 0x751   : > { %v3885_v30 = vpop.permute.xlu1 %3884 }
 0x752   : > { %v3900_v58 = vsel %vm3894_vm11, %v3883_v38, %v3885_v30 }
 0x753   : > { %3920 = vst [vmem:[#allocation4 + $0x208] sm:$0xf] %v3900_v58 }
 0x755   : > { %v3810_v41 = vpop.permute.xlu1 %3809 }
 0x756   : > { %v3822_v5 = vsel %vm3817_vm10, %v3808_v47, %v3810_v41  ;;  %v4158_v56 = vld [vmem:[#allocation4 + $0x258] sm:$0xff] }
 0x757   : > { %3841 = vst [vmem:[#allocation4 + $0x1b8] sm:$0xf] %v3822_v5 }
 0x759   : > { %v3644_v8 = vpop.permute.xlu1 %3643 }
 0x75a   : > { %v3655_v6 = vsel %vm3649_vm3, %v3642_v61, %v3644_v8  ;;  %v3966_v62 = vpop.permute.xlu0 %3965  ;;  %v4148_v45 = vld [vmem:[#allocation4 + $0x208] sm:$0xff] }
 0x75b   : > { %3674 = vst [vmem:[#allocation4 + $0xd0] sm:$0xf] %v3655_v6  ;;  %v3980_v10 = vsel %vm3973_vm7, %v3964_v34, %v3966_v62  ;;  %v3896_v34 = vsel %vm3894_vm11, %v7168_v23, %v7155_v14  ;;  %v4129_v6 = vld [vmem:[#allocation4 + $0x170] sm:$0xff] }
 0x75c   : > { %4000 = vst [vmem:[#allocation4 + $0x260] sm:$0xf] %v3980_v10 }
 0x75d   : > { %v3506_v31 = vpop.permute.xlu1 %3505 }
 0x75e   : > { %v3517_v44 = vsel %vm3511_vm6, %v3504_v43, %v3506_v31  ;;  %v3887_v50 = vpop.permute.xlu0 %3886  ;;  %v3975_v43 = vsel %vm3973_vm7, %v7153_v63, %v7147_v13  ;;  %v4138_v14 = vld [vmem:[#allocation4 + $0x1b8] sm:$0xff] }
 0x75f   : > { %3536 = vst [vmem:[#allocation4 + $0x30] sm:$0xf] %v3517_v44  ;;  %v3901_v27 = vsel %vm3894_vm11, %v3885_v30, %v3887_v50  ;;  %v5830_v44 = vunpack.i.h.bf16 %v7177_v40 }
 0x760   : > { %3921 = vst [vmem:[#allocation4 + $0x210] sm:$0xf] %v3901_v27 }
 0x761   : > { %v7371_v38 = vpop.permute.xlu1 %4042  ;;  %v3727_v40 = vsel %vm3726_vm2, %v5830_v44, %v7195_v4  ;;  %v4088_v44 = vld [vmem:[#allocation4 + $0x28] sm:$0xff] }
 0x762   : > { %v7373_v17 = vpop.permute.xlu0 %3811 }
 0x763   : > { %v3823_v61 = vsel %vm3817_vm10, %v3810_v41, %v7373_v17  ;;  %v4159_v47 = vld [vmem:[#allocation4 + $0x260] sm:$0xff]  ;;  %v3819_v41 = vsel %vm3817_vm10, %v7183_v35, %v7166_v22  ;;  %v4128_v22 = vld [vmem:[#allocation4 + $0x168] sm:$0xff] }
 0x764   : > { %3842 = vst [vmem:[#allocation4 + $0x1c0] sm:$0xf] %v3823_v61  ;;  %4196 = vmatprep.subr.mxu0 %v4159_v47  ;;  %v4119_v61 = vld [vmem:[#allocation4 + $0x120] sm:$0xff]  ;;  %v4118_v47 = vld [vmem:[#allocation4 + $0x118] sm:$0xff] }
 0x765   : > { %v7380_v52 = vpop.permute.xlu1 %3645  ;;  %4197 = vmatpush1.msra.mxu0 %v4158_v56  ;;  %v3728_v56 = vsel %vm3726_vm2, %v7195_v4, %v7181_v33  ;;  %v4108_v4 = vld [vmem:[#allocation4 + $0xc8] sm:$0xff] }
 0x766   : > { %v3656_v39 = vsel %vm3649_vm3, %v3644_v8, %v7380_v52  ;;  %4198 = vmatprep.subr.mxu0 %v3975_v43  ;;  %v7387_v9 = vpop.permute.xlu0 %3720 }
 0x767   : > { %3675 = vst [vmem:[#allocation4 + $0xd8] sm:$0xf] %v3656_v39  ;;  %v3734_v11 = vsel %vm3726_vm2, %v3719_v51, %v7387_v9  ;;  %4199 = vmatpush1.msra.mxu0 %v3974_v53  ;;  %v4149_v55 = vld [vmem:[#allocation4 + $0x210] sm:$0xff] }
 0x768   : > { %3754 = vst [vmem:[#allocation4 + $0x128] sm:$0xf] %v3734_v11  ;;  %4200 = vmatprep.subr.mxu0 %v4149_v55  ;;  %v4109_v55 = vld [vmem:[#allocation4 + $0xd0] sm:$0xff] }
 0x769   : > { %v7394_v63 = vpop.permute.xlu1 %3507  ;;  %4201 = vmatpush1.msra.mxu0 %v4148_v45 }
 0x76a   : > { %v3518_v59 = vsel %vm3511_vm6, %v3506_v31, %v7394_v63  ;;  %4202 = vmatprep.subr.mxu0 %v3896_v34  ;;  %v7401_v51 = vpop.permute.xlu0 %3576  ;;  %v4124_v31 = vld [vmem:[#allocation4 + $0x148] sm:$0xff] }
 0x76b   : > { %3537 = vst [vmem:[#allocation4 + $0x38] sm:$0xf] %v3518_v59  ;;  %v3587_v30 = vsel %vm3580_vm5, %v3575_v57, %v7401_v51  ;;  %4203 = vmatpush1.msra.mxu0 %v3895_v60  ;;  %v4139_v58 = vld [vmem:[#allocation4 + $0x1c0] sm:$0xff]  ;;  %v3976_v60 = vsel %vm3973_vm7, %v7147_v13, %v7151_v0  ;;  %v5840_v59 = vunpack.i.h.bf16 %v7197_v42 }
 0x76c   : > { %3606 = vst [vmem:[#allocation4 + $0x88] sm:$0xf] %v3587_v30  ;;  %4204 = vmatprep.subr.mxu0 %v4139_v58  ;;  %v4099_v13 = vld [vmem:[#allocation4 + $0x80] sm:$0xff] }
 0x76d   : > { %v7408_v23 = vpop.permute.xlu1 %3969  ;;  %4205 = vmatpush1.msra.mxu0 %v4138_v14 }
 0x76e   : > { %4206 = vmatprep.subr.mxu0 %v3819_v41  ;;  %v3968_v5 = vpop.permute.xlu0 %3967  ;;  %v3898_v41 = vsel %vm3894_vm11, %v7159_v15, %v7179_v32  ;;  %v4145_v15 = vld [vmem:[#allocation4 + $0x1f0] sm:$0xff] }
 0x76f   : > { %v3981_v57 = vsel %vm3973_vm7, %v3966_v62, %v3968_v5  ;;  %v3982_v8 = vsel %vm3973_vm7, %v3968_v5, %v7408_v23  ;;  %4207 = vmatpush1.msra.mxu0 %v3818_v25  ;;  %v3582_v25 = vsel %vm3580_vm5, %v7214_v49, %v7203_v37  ;;  %v4089_v37 = vld [vmem:[#allocation4 + $0x30] sm:$0xff] }
 0x770   : > { %4001 = vst [vmem:[#allocation4 + $0x268] sm:$0xf] %v3981_v57  ;;  %4002 = vst [vmem:[#allocation4 + $0x270] sm:$0xf] %v3982_v8  ;;  %4208 = vmatprep.subr.mxu0 %v4129_v6  ;;  %v5845_v57 = vunpack.i.h.bf16 %v7221_v19  ;;  %v3513_v19 = vsel %vm3511_vm6, %v7219_v28, %v7223_v54 }
 0x771   : > { %v7416_v10 = vpop.permute.xlu1 %3890  ;;  %4209 = vmatpush1.msra.mxu0 %v4128_v22 }
 0x772   : > { %4210 = vmatprep.subr.mxu0 %v4124_v31  ;;  %v3889_v35 = vpop.permute.xlu0 %3888 }
 0x773   : > { %v3902_v62 = vsel %vm3894_vm11, %v3887_v50, %v3889_v35  ;;  %v3903_v27 = vsel %vm3894_vm11, %v3889_v35, %v7416_v10  ;;  %4211 = vmatpush1.msra.mxu0 %v4123_v21  ;;  %v5835_v50 = vunpack.i.h.bf16 %v7205_v2  ;;  %v3977_v2 = vsel %vm3973_vm7, %v7151_v0, %v7161_v18 }
 0x774   : > { %3922 = vst [vmem:[#allocation4 + $0x218] sm:$0xf] %v3902_v62  ;;  %3923 = vst [vmem:[#allocation4 + $0x220] sm:$0xf] %v3903_v27  ;;  %4212 = vmatprep.subr.mxu0 %v4119_v61  ;;  %v3512_v35 = vsel %vm3511_vm6, %v5845_v57, %v7219_v28  ;;  %v4135_v62 = vld [vmem:[#allocation4 + $0x1a0] sm:$0xff]  ;;  %v4130_v61 = vld [vmem:[#allocation4 + $0x178] sm:$0xff] }
 0x775   : > { %v3816_v43 = vpop.permute.xlu1 %3815  ;;  %4213 = vmatpush1.msra.mxu0 %v4118_v47  ;;  %v3650_v30 = vsel %vm3649_vm3, %v5835_v50, %v7189_v29  ;;  %v7486_v50 = vld [vmem:[%s8170_s15] sm:$0xff]  ;;  %v4090_v57 = vld [vmem:[#allocation4 + $0x38] sm:$0xff] }
 0x776   : > { %3845 = vst.msk [vmem:[#allocation4 + $0x1d8] sm:$0xf] %vm804_vm0, %v3816_v43  ;;  %4214 = vmatprep.subr.mxu0 %v3728_v56  ;;  %v3814_v53 = vpop.permute.xlu0 %3813  ;;  %v4126_v56 = vld [vmem:[#allocation4 + $0x158] sm:$0xff] }
 0x777   : > { %v3824_v39 = vsel %vm3817_vm10, %v7373_v17, %v3814_v53  ;;  %v3825_v11 = vsel %vm3817_vm10, %v3814_v53, %v3816_v43  ;;  %4215 = vmatpush1.msra.mxu0 %v3727_v40  ;;  %v4161_v33 = vld [vmem:[#allocation4 + $0x270] sm:$0xff]  ;;  %v4160_v45 = vld [vmem:[#allocation4 + $0x268] sm:$0xff]  ;;  %v3651_v17 = vsel %vm3649_vm3, %v7189_v29, %v7207_v48  ;;  %v4098_v29 = vld [vmem:[#allocation4 + $0x78] sm:$0xff] }
 0x778   : > { %3843 = vst [vmem:[#allocation4 + $0x1c8] sm:$0xf] %v3824_v39  ;;  %3844 = vst [vmem:[#allocation4 + $0x1d0] sm:$0xf] %v3825_v11  ;;  %4216 = vmatprep.subr.mxu0 %v4109_v55  ;;  %4273 = vmatprep.subr.mxu1 %v4161_v33  ;;  %v4125_v40 = vld [vmem:[#allocation4 + $0x150] sm:$0xff]  ;;  %v4120_v11 = vld [vmem:[#allocation4 + $0x128] sm:$0xff] }
 0x779   : > { %v4041_v34 = vpop.permute.xlu1 %4040  ;;  %4217 = vmatpush1.msra.mxu0 %v4108_v4  ;;  %4274 = vmatpush1.msra.mxu1 %v4160_v45  ;;  %v4116_v33 = vld [vmem:[#allocation4 + $0x108] sm:$0xff]  ;;  %v4115_v4 = vld [vmem:[#allocation4 + $0x100] sm:$0xff] }
 0x77a   : > { %v4058_v58 = vsel %vm4052_vm8, %v4041_v34, %v7371_v38  ;;  %4275 = vmatprep.subr.mxu1 %v3977_v2  ;;  %v7446_v14 = vpop.permute.xlu0 %4044  ;;  %4218 = vmatprep.subr.mxu0 %v3651_v17  ;;  %v7502_v2 = vld [vmem:[%s8170_s15 + $0x10] sm:$0xf] }
 0x77b   : > { %4078 = vst [vmem:[#allocation4 + $0x2a8] sm:$0xf] %v4058_v58  ;;  %v4059_v48 = vsel %vm4052_vm8, %v7371_v38, %v7446_v14  ;;  %4219 = vmatpush1.msra.mxu0 %v3650_v30  ;;  %4276 = vmatpush1.msra.mxu1 %v3976_v60  ;;  %v4151_v0 = vld [vmem:[#allocation4 + $0x220] sm:$0xff]  ;;  %v4150_v42 = vld [vmem:[#allocation4 + $0x218] sm:$0xff]  ;;  %v3581_v38 = vsel %vm3580_vm5, %v5840_v59, %v7214_v49 }
 0x77c   : > { %4079 = vst [vmem:[#allocation4 + $0x2b0] sm:$0xf] %v4059_v48  ;;  %4220 = vmatprep.subr.mxu0 %v4099_v13  ;;  %4277 = vmatprep.subr.mxu1 %v4151_v0  ;;  %v3821_v49 = vsel %vm3817_vm10, %v7170_v20, %v7191_v36  ;;  %v4131_v36 = vld [vmem:[#allocation4 + $0x180] sm:$0xff]  ;;  %v4110_v60 = vld [vmem:[#allocation4 + $0xd8] sm:$0xff]  ;;  %v4105_v48 = vld [vmem:[#allocation4 + $0xb0] sm:$0xff] }
 0x77d   : > { %v7457_v5 = vpop.permute.xlu1 %3722  ;;  %4221 = vmatpush1.msra.mxu0 %v4098_v29  ;;  %4278 = vmatpush1.msra.mxu1 %v4150_v42  ;;  %v4106_v30 = vld [vmem:[#allocation4 + $0xb8] sm:$0xff]  ;;  %v4100_v42 = vld [vmem:[#allocation4 + $0x88] sm:$0xff] }
 0x77e   : > { %v3735_v8 = vsel %vm3726_vm2, %v7387_v9, %v7457_v5  ;;  %4279 = vmatprep.subr.mxu1 %v3898_v41  ;;  %v4031_v6 = vpop.permute.xlu0 %4030  ;;  %4222 = vmatprep.subr.mxu0 %v3582_v25  ;;  %v4096_v41 = vld [vmem:[#allocation4 + $0x68] sm:$0xff] }
 0x77f   : > { %3755 = vst [vmem:[#allocation4 + $0x130] sm:$0xf] %v3735_v8  ;;  %4223 = vmatpush1.msra.mxu0 %v3581_v38  ;;  %4280 = vmatpush1.msra.mxu1 %v4145_v15  ;;  %v4141_v22 = vld [vmem:[#allocation4 + $0x1d0] sm:$0xff]  ;;  %v4140_v31 = vld [vmem:[#allocation4 + $0x1c8] sm:$0xff] }
 0x780   : > { %4224 = vmatprep.subr.mxu0 %v4089_v37  ;;  %4281 = vmatprep.subr.mxu1 %v4141_v22  ;;  %v4085_v22 = vld [vmem:[#allocation4 + $0x10] sm:$0xff] }
 0x781   : > { %v7471_v9 = vpop.permute.xlu1 %4032  ;;  %4225 = vmatpush1.msra.mxu0 %v4088_v44  ;;  %4282 = vmatpush1.msra.mxu1 %v4140_v31 }
 0x782   : > { %4283 = vmatprep.subr.mxu1 %v3821_v49  ;;  %v3648_v21 = vpop.permute.xlu0 %3647  ;;  %4226 = vmatprep.subr.mxu0 %v3513_v19  ;;  %v4168_v54 = vld [vmem:[#allocation4 + $0x2a8] sm:$0xff]  ;;  %v4054_v28 = vsel %vm4052_vm8, %v4031_v6, %v7471_v9 }
 0x783   : > { %v3657_v27 = vsel %vm3649_vm3, %v7380_v52, %v3648_v21  ;;  %3677 = vst.msk [vmem:[#allocation4 + $0xe8] sm:$0xf] %vm804_vm0, %v3648_v21  ;;  %4227 = vmatpush1.msra.mxu0 %v3512_v35  ;;  %4284 = vmatpush1.msra.mxu1 %v4135_v62  ;;  %v4169_v20 = vld [vmem:[#allocation4 + $0x2b0] sm:$0xff] }
 0x784   : > { %3676 = vst [vmem:[#allocation4 + $0xe0] sm:$0xf] %v3657_v27  ;;  %4256 = vmatprep.subr.mxu0 %v4169_v20  ;;  %4285 = vmatprep.subr.mxu1 %v4131_v36 }
 0x785   : > { %v3579_v47 = vpop.permute.xlu1 %3578  ;;  %4257 = vmatpush2.msra.mxu0 %v4168_v54  ;;  %4286 = vmatpush1.msra.mxu1 %v4130_v61 }
 0x786   : > { %v3588_v52 = vsel %vm3580_vm5, %v7401_v51, %v3579_v47  ;;  %3608 = vst.msk [vmem:[#allocation4 + $0x98] sm:$0xf] %vm804_vm0, %v3579_v47  ;;  %4287 = vmatprep.subr.mxu1 %v4126_v56  ;;  %v4029_v43 = vpop.permute.xlu0 %4028  ;;  %4258 = vmatprep.subr.mxu0 %v4054_v28  ;;  %v4121_v39 = vld [vmem:[#allocation4 + $0x130] sm:$0xff]  ;;  %v7492_v51 = vld [vmem:[%s8170_s15 + $0x18] sm:$0xf]  ;;  %v4132_v56 = vld [vmem:[#allocation4 + $0x188] sm:$0xff] }
 0x787   : > { %3607 = vst [vmem:[#allocation4 + $0x90] sm:$0xf] %v3588_v52  ;;  %v4053_v53 = vsel %vm4052_vm8, %v4029_v43, %v4031_v6  ;;  %4288 = vmatpush1.msra.mxu1 %v4125_v40  ;;  %v4086_v6 = vld [vmem:[#allocation4 + $0x18] sm:$0xff]  ;;  %v4137_v47 = vld [vmem:[#allocation4 + $0x1b0] sm:$0xff]  ;;  %v4127_v52 = vld [vmem:[#allocation4 + $0x160] sm:$0xff] }
 0x788   : > { %4289 = vmatprep.subr.mxu1 %v4121_v39  ;;  %4259 = vmatpush2.msra.mxu0 %v4053_v53  ;;  %v4107_v39 = vld [vmem:[#allocation4 + $0xc0] sm:$0xff] }
 0x789   : > { %v7494_v55 = vpop.permute.xlu1 %4034  ;;  %4290 = vmatpush1.msra.mxu1 %v4120_v11  ;;  %4261 = vmatmul.mubr.f32.vlgmr.msra.gmra.mxu0 %v7486_v50 }
 0x78a   : > { %4291 = vmatprep.subr.mxu1 %v4116_v33  ;;  %v3510_v45 = vpop.permute.xlu0 %3509  ;;  %5641 = vmatprep.mubr.msk.f32.mxu0 %vm4189_vm15, %v7492_v51  ;;  %v4112_v53 = vld [vmem:[#allocation4 + $0xe8] sm:$0xff] }
 0x78b   : > { %v3519_v17 = vsel %vm3511_vm6, %v7394_v63, %v3510_v45  ;;  %3539 = vst.msk [vmem:[#allocation4 + $0x48] sm:$0xf] %vm804_vm0, %v3510_v45  ;;  %4292 = vmatpush1.msra.mxu1 %v4115_v4  ;;  %v4111_v34 = vld [vmem:[#allocation4 + $0xe0] sm:$0xff]  ;;  %4350 = vmatprep.subr.mxu0 %v7336_v24 }
 0x78c   : > { %3538 = vst [vmem:[#allocation4 + $0x40] sm:$0xf] %v3519_v17  ;;  %4293 = vmatprep.subr.mxu1 %v4111_v34  ;;  %v4087_v45 = vld [vmem:[#allocation4 + $0x20] sm:$0xff]  ;;  %v4655_v34 = vld [vmem:[#allocation3 + $0x38] sm:$0xf] }
 0x78d   : > { %v4049_v59 = vpop.permute.xlu1 %4048  ;;  %4294 = vmatpush1.msra.mxu1 %v4110_v60  ;;  %4267 = vmatmul.mubr.f32.gmra.mxu0 %v7502_v2  ;;  %v4102_v11 = vld [vmem:[#allocation4 + $0x98] sm:$0xff]  ;;  %v4586_v60 = vld [vmem:[#allocation3 + $0x38] sm:$0xf] }
 0x78e   : > { %4295 = vmatprep.subr.mxu1 %v4106_v30  ;;  %v4047_v58 = vpop.permute.xlu0 %4046  ;;  %5644 = vmatprep.mubr.msk.f32.mxu0 %vm4189_vm15, %v7319_v46  ;;  %v4101_v0 = vld [vmem:[#allocation4 + $0x90] sm:$0xff]  ;;  %v4095_v46 = vld [vmem:[#allocation4 + $0x60] sm:$0xff]  ;;  %v5851_v30 = vpack.i.bf16 %v7336_v24, %v4586_v60 }
 0x78f   : > { %v4060_v63 = vsel %vm4052_vm8, %v7446_v14, %v4047_v58  ;;  %v4061_v13 = vsel %vm4052_vm8, %v4047_v58, %v4049_v59  ;;  %4296 = vmatpush1.msra.mxu1 %v4105_v48  ;;  %v4518_v58 = vld [vmem:[#allocation3 + $0x38] sm:$0xf] }
 0x790   : > { %4080 = vst [vmem:[#allocation4 + $0x2b8] sm:$0xf] %v4060_v63  ;;  %4081 = vst [vmem:[#allocation4 + $0x2c0] sm:$0xf] %v4061_v13  ;;  %4297 = vmatprep.subr.mxu1 %v4101_v0  ;;  %5852 = vrot.lane.b32.xlu0 %v5851_v30, %s5964_s23  ;;  %v4450_v48 = vld [vmem:[#allocation3 + $0x38] sm:$0xf]  ;;  %v5856_v63 = vpack.i.bf16 %v7336_v24, %v4518_v58 }
 0x791   : > { %v3972_v29 = vpop.permute.xlu1 %3971  ;;  %4298 = vmatpush1.msra.mxu1 %v4100_v42 }
 0x792   : > { %v3983_v25 = vsel %vm3973_vm7, %v7408_v23, %v3972_v29  ;;  %4299 = vmatprep.subr.mxu1 %v4096_v41  ;;  %v4037_v38 = vpop.permute.xlu0 %4036  ;;  %v4092_v33 = vld [vmem:[#allocation4 + $0x48] sm:$0xff] }
 0x793   : > { %4003 = vst.msk [vmem:[#allocation4 + $0x278] sm:$0xf] %vm804_vm0, %v3983_v25  ;;  %4300 = vmatpush1.msra.mxu1 %v4095_v46  ;;  %v4091_v14 = vld [vmem:[#allocation4 + $0x40] sm:$0xff]  ;;  %v4056_v49 = vsel %vm4052_vm8, %v7494_v55, %v4037_v38 }
 0x794   : > { %4301 = vmatprep.subr.mxu1 %v4091_v14 }
 0x795   : > { %v3893_v8 = vpop.permute.xlu1 %3892  ;;  %4302 = vmatpush1.msra.mxu1 %v4090_v57 }
 0x796   : > { %v3904_v15 = vsel %vm3894_vm11, %v7416_v10, %v3893_v8  ;;  %4303 = vmatprep.subr.mxu1 %v4086_v6  ;;  %v3960_v37 = vpop.permute.xlu0 %3959  ;;  %v4055_v10 = vsel %vm4052_vm8, %v7471_v9, %v7494_v55  ;;  %v4097_v55 = vld [vmem:[#allocation4 + $0x70] sm:$0xff] }
 0x797   : > { %3924 = vst.msk [vmem:[#allocation4 + $0x228] sm:$0xf] %vm804_vm0, %v3904_v15  ;;  %v3978_v23 = vsel %vm3973_vm7, %v7161_v18, %v3960_v37  ;;  %4304 = vmatpush1.msra.mxu1 %v4085_v22  ;;  %v4171_v31 = vld [vmem:[#allocation4 + $0x2c0] sm:$0xff]  ;;  %v4170_v44 = vld [vmem:[#allocation4 + $0x2b8] sm:$0xff] }
 0x798   : > { %3998 = vst.msk [vmem:[#allocation4 + $0x250] sm:$0xff] %vm703_vm1, %v3978_v23  ;;  %4333 = vmatprep.subr.mxu1 %v4171_v31 }
 0x799   : > { %v3725_v19 = vpop.permute.xlu1 %3724  ;;  %4334 = vmatpush2.msra.mxu1 %v4170_v44 }
 0x79a   : > { %v3736_v35 = vsel %vm3726_vm2, %v7457_v5, %v3725_v19  ;;  %v3881_v21 = vpop.permute.xlu0 %3880  ;;  %v4162_v18 = vld [vmem:[#allocation4 + $0x278] sm:$0xff]  ;;  %4335 = vmatprep.subr.mxu1 %v4056_v49 }
 0x79b   : > { %3756 = vst.msk [vmem:[#allocation4 + $0x138] sm:$0xf] %vm804_vm0, %v3736_v35  ;;  %v3899_v62 = vsel %vm3894_vm11, %v7179_v32, %v3881_v21  ;;  %4351 = vmatpush1.msra.mxu0 %v4162_v18  ;;  %4336 = vmatpush2.msra.mxu1 %v4055_v10 }
 0x79c   : > { %3919 = vst.msk [vmem:[#allocation4 + $0x200] sm:$0xff] %vm703_vm1, %v3899_v62  ;;  %4338 = vmatmul.mubr.f32.vlgmr.msra.gmra.mxu1 %v7486_v50  ;;  %4352 = vmatprep.subr.mxu0 %v7336_v24 }
 0x79d   : > { %v4051_v9 = vpop.permute.xlu1 %4050  ;;  %5643 = vmatprep.mubr.msk.f32.mxu1 %vm4189_vm15, %v7492_v51 }
 0x79e   : > { %v4062_v5 = vsel %vm4052_vm8, %v4049_v59, %v4051_v9  ;;  %v3713_v27 = vpop.permute.xlu0 %3712  ;;  %v4152_v36 = vld [vmem:[#allocation4 + $0x228] sm:$0xff]  ;;  %v5846_v59 = vpack.i.bf16 %v7336_v24, %v4655_v34 }
 0x79f   : > { %4082 = vst.msk [vmem:[#allocation4 + $0x2c8] sm:$0xf] %vm804_vm0, %v4062_v5  ;;  %v3731_v32 = vsel %vm3726_vm2, %v7185_v1, %v3713_v27  ;;  %v4157_v20 = vld [vmem:[#allocation4 + $0x250] sm:$0xff]  ;;  %v4142_v1 = vld [vmem:[#allocation4 + $0x1d8] sm:$0xff] }
 0x7a0   : > { %3751 = vst.msk [vmem:[#allocation4 + $0x110] sm:$0xff] %vm703_vm1, %v3731_v32  ;;  %4353 = vmatpush1.msra.mxu0 %v4157_v20  ;;  %4344 = vmatmul.mubr.f32.gmra.mxu1 %v7502_v2 }
 0x7a1   : > { %4354 = vmatprep.subr.mxu0 %v7336_v24  ;;  %5847 = vrot.lane.b32.xlu1 %v5846_v59, %s5963_s0 }
 0x7a2   : > { %v4039_v54 = vpop.permute.xlu0 %4038  ;;  %4355 = vmatpush1.msra.mxu0 %v4152_v36  ;;  %v4122_v43 = vld [vmem:[#allocation4 + $0x138] sm:$0xff] }
 0x7a3   : > { %v4057_v61 = vsel %vm4052_vm8, %v4037_v38, %v4039_v54  ;;  %4356 = vmatprep.subr.mxu0 %v7336_v24  ;;  %v4147_v28 = vld [vmem:[#allocation4 + $0x200] sm:$0xff] }
 0x7a4   : > { %4077 = vst.msk [vmem:[#allocation4 + $0x2a0] sm:$0xff] %vm703_vm1, %v4057_v61  ;;  %4357 = vmatpush1.msra.mxu0 %v4147_v28 }
 0x7a5   : > { %4358 = vmatprep.subr.mxu0 %v7336_v24  ;;  %5857 = vrot.lane.b32.xlu1 %v5856_v63, %s5965_s24 }
 0x7a6   : > { %4359 = vmatpush1.msra.mxu0 %v4142_v1  ;;  %v4172_v4 = vld [vmem:[#allocation4 + $0x2c8] sm:$0xff] }
 0x7a7   : > { %4360 = vmatprep.subr.mxu0 %v7336_v24  ;;  %v4117_v40 = vld [vmem:[#allocation4 + $0x110] sm:$0xff] }
 0x7a8   : > { %4361 = vmatpush1.msra.mxu0 %v4137_v47 }
 0x7a9   : > { %4362 = vmatprep.subr.mxu0 %v7336_v24 }
 0x7aa   : > { %4363 = vmatpush1.msra.mxu0 %v4132_v56  ;;  %v7585_v14 = vpop.permute.xlu1 %4186 }
 0x7ab   : > { %4364 = vmatprep.subr.mxu0 %v7336_v24  ;;  %v4167_v17 = vld [vmem:[#allocation4 + $0x2a0] sm:$0xff] }
 0x7ac   : > { %4365 = vmatpush1.msra.mxu0 %v4127_v52 }
 0x7ad   : > { %4366 = vmatprep.subr.mxu0 %v7336_v24 }
 0x7ae   : > { %4367 = vmatpush1.msra.mxu0 %v4122_v43 }
 0x7af   : > { %4368 = vmatprep.subr.mxu0 %v7336_v24  ;;  %v7578_v42 = vpop.permute.xlu0 %4181 }
 0x7b0   : > { %4369 = vmatpush1.msra.mxu0 %v4117_v40 }
 0x7b1   : > { %4370 = vmatprep.subr.mxu0 %v7336_v24 }
 0x7b2   : > { %4371 = vmatpush1.msra.mxu0 %v4112_v53 }
 0x7b3   : > { %4372 = vmatprep.subr.mxu0 %v7336_v24 }
 0x7b4   : > { %4373 = vmatpush1.msra.mxu0 %v4107_v39 }
 0x7b5   : > { %4374 = vmatprep.subr.mxu0 %v7336_v24 }
 0x7b6   : > { %4375 = vmatpush1.msra.mxu0 %v4102_v11 }
 0x7b7   : > { %4376 = vmatprep.subr.mxu0 %v7336_v24 }
 0x7b8   : > { %4377 = vmatpush1.msra.mxu0 %v4097_v55 }
 0x7b9   : > { %4378 = vmatprep.subr.mxu0 %v7336_v24 }
 0x7ba   : > { %4379 = vmatpush1.msra.mxu0 %v4092_v33 }
 0x7bb   : > { %4380 = vmatprep.subr.mxu0 %v7336_v24 }
 0x7bc   : > { %4381 = vmatpush1.msra.mxu0 %v4087_v45 }
 0x7bd   : > { %4410 = vmatprep.subr.mxu0 %v7336_v24 }
 0x7be   : > { %4411 = vmatpush2.msra.mxu0 %v4172_v4 }
 0x7bf   : > { %4412 = vmatprep.subr.mxu0 %v7336_v24 }
 0x7c0   : > { %4413 = vmatpush2.msra.mxu0 %v4167_v17 }
 0x7c1   : > { %4415 = vmatmul.mubr.f32.vlgmr.msra.gmra.mxu0 %v7486_v50  ;;  %v5861_v50 = vpack.i.bf16 %v7336_v24, %v4450_v48 }
 0x7c2   : > { %5645 = vmatprep.mubr.msk.f32.mxu0 %vm4189_vm15, %v7492_v51  ;;  %v4904_v51 = vld [vmem:[#allocation3 + $0x68] sm:$0xf] }
 0x7c3   : > { %5862 = vrot.lane.b32.xlu0 %v5861_v50, %s5966_s26  ;;  %v5866_v13 = vpack.i.bf16 %v7336_v24, %v4904_v51 }
 0x7c5   : > { %4420 = vmatmul.mubr.f32.gmra.mxu0 %v7502_v2  ;;  %v4826_v2 = vld [vmem:[#allocation3 + $0x68] sm:$0xf]  ;;  %5867 = vrot.lane.b32.xlu1 %v5866_v13, %s5960_s30 }
 0x7c6   : > { %v5871_v0 = vpack.i.bf16 %v7336_v24, %v4826_v2 }
 0x7c8   : > { %5872 = vrot.lane.b32.xlu0 %v5871_v0, %s5961_s5 }
 0x849   : > { %v4262_v29 = vpop.f32.mrf.mxu0 }
 0x84a   : > { %v4263_v41 = vadd.f32 %v4262_v29, %v7578_v42 }
 0x84b   : > { %v4264_v25 = vpop.f32.mrf.mxu0 }
 0x84c   : > { %v7582_v38 = vmul.f32 %v4263_v41, %v6359_v3  ;;  %v4265_v46 = vadd.f32 %v4264_v25, %v7578_v42 }
 0x84d   : > { %v4268_v57 = vpop.f32.mrf.mxu0 }
 0x84e   : > { %4435 = vst [vmem:[#allocation3 + $0x8] sm:$0xff] %v7582_v38  ;;  %v7589_v24 = vmul.f32 %v4265_v46, %v6361_v7  ;;  %v4269_v8 = vadd.f32 %v4268_v57, %v7585_v14  ;;  %4917 = vrot.lane.b32.xlu0 %v7582_v38, %s5960_s30  ;;  %4603 = vrot.lane.b32.xlu1 %v7582_v38, %s5964_s23  ;;  %4737 = vst [vmem:[#allocation4 + $0x140] sm:$0xff] %v7582_v38  ;;  %v7702_v46 = vpop.permute.xlu1 %5847 }
 0x84f   : > { %v4270_v6 = vpop.f32.mrf.mxu0 }
 0x850   : > { %4436 = vst [vmem:[#allocation3 + $0x10] sm:$0xff] %v7589_v24  ;;  %v4430_v15 = vmul.f32 %v4269_v8, %v6359_v3  ;;  %v4271_v37 = vadd.f32 %v4270_v6, %v7585_v14  ;;  %4738 = vst [vmem:[#allocation4 + $0x148] sm:$0xff] %v7589_v24 }
 0x852   : > { %4440 = vst [vmem:[#allocation3 + $0x40] sm:$0xf] %v4430_v15  ;;  %v4431_v22 = vmul.f32 %v4271_v37, %v6361_v7  ;;  %4839 = vrot.lane.b32.xlu0 %v7582_v38, %s5961_s5  ;;  %4467 = vrot.lane.b32.xlu1 %v7582_v38, %s5966_s26  ;;  %v7708_v15 = vpop.permute.xlu1 %5857 }
 0x854   : > { %4441 = vst [vmem:[#allocation3 + $0x48] sm:$0xf] %v4431_v22 }
 0x856   : > { %4767 = vrot.lane.b32.xlu0 %v7582_v38, %s5962_s22 }
 0x859   : > { %v4732_v23 = vld [vmem:[#allocation3 + $0x40] sm:$0xf] }
 0x85a   : > { %4742 = vst [vmem:[#allocation4 + $0x168] sm:$0xf] %v4732_v23  ;;  %4675 = vrot.lane.b32.xlu0 %v7582_v38, %s5963_s0  ;;  %v4587_v28 = vld [vmem:[#allocation3 + $0x40] sm:$0xf]  ;;  %v7718_v23 = vpop.permute.xlu1 %5867 }
 0x85b   : > { %v4733_v19 = vld [vmem:[#allocation3 + $0x48] sm:$0xf]  ;;  %v4899_v1 = vld [vmem:[#allocation3 + $0x40] sm:$0xf] }
 0x85c   : > { %v4339_v31 = vpop.f32.mrf.mxu1  ;;  %4743 = vst [vmem:[#allocation4 + $0x170] sm:$0xf] %v4733_v19  ;;  %v4451_v56 = vld [vmem:[#allocation3 + $0x40] sm:$0xf]  ;;  %v4657_v63 = vld [vmem:[#allocation3 + $0x48] sm:$0xf] }
 0x85d   : > { %v4340_v44 = vadd.f32 %v4339_v31, %v7578_v42  ;;  %v4821_v53 = vld [vmem:[#allocation3 + $0x40] sm:$0xf]  ;;  %v4520_v50 = vld [vmem:[#allocation3 + $0x48] sm:$0xf] }
 0x85e   : > { %v4341_v49 = vpop.f32.mrf.mxu1  ;;  %4535 = vrot.lane.b32.xlu0 %v7582_v38, %s5965_s24  ;;  %v4752_v45 = vld [vmem:[#allocation3 + $0x40] sm:$0xf]  ;;  %v4900_v51 = vld [vmem:[#allocation3 + $0x48] sm:$0xf] }
 0x85f   : > { %v7614_v10 = vmul.f32 %v4340_v44, %v6364_v12  ;;  %v4342_v35 = vadd.f32 %v4341_v49, %v7578_v42  ;;  %v4656_v4 = vld [vmem:[#allocation3 + $0x40] sm:$0xf]  ;;  %v4822_v13 = vld [vmem:[#allocation3 + $0x48] sm:$0xf] }
 0x860   : > { %v4345_v21 = vpop.f32.mrf.mxu1  ;;  %v4519_v60 = vld [vmem:[#allocation3 + $0x40] sm:$0xf]  ;;  %v4588_v41 = vld [vmem:[#allocation3 + $0x48] sm:$0xf] }
 0x861   : > { %4437 = vst [vmem:[#allocation3 + $0x18] sm:$0xff] %v7614_v10  ;;  %v7619_v18 = vmul.f32 %v4342_v35, %v6367_v16  ;;  %v4346_v62 = vadd.f32 %v4345_v21, %v7585_v14  ;;  %4921 = vrot.lane.b32.xlu1 %v7614_v10, %s5960_s30  ;;  %v4977_v58 = vld [vmem:[#allocation3 + $0x40] sm:$0xf]  ;;  %v4452_v57 = vld [vmem:[#allocation3 + $0x48] sm:$0xf] }
 0x862   : > { %v4347_v9 = vpop.f32.mrf.mxu1  ;;  %4995 = vrot.lane.b32.xlu0 %v7582_v38, %s5967_s28  ;;  %v4978_v6 = vld [vmem:[#allocation3 + $0x48] sm:$0xf] }
 0x863   : > { %4438 = vst [vmem:[#allocation3 + $0x20] sm:$0xff] %v7619_v18  ;;  %v4432_v5 = vmul.f32 %v4346_v62, %v6364_v12  ;;  %v4348_v27 = vadd.f32 %v4347_v9, %v7585_v14 }
 0x865   : > { %4442 = vst [vmem:[#allocation3 + $0x50] sm:$0xf] %v4432_v5  ;;  %v4433_v32 = vmul.f32 %v4348_v27, %v6367_v16  ;;  %4843 = vrot.lane.b32.xlu1 %v7614_v10, %s5961_s5  ;;  %v7737_v27 = vld [vmem:[%s8172_s17] sm:$0xff] }
 0x866   : > { %4919 = vrot.lane.b32.xlu0 %v7589_v24, %s5960_s30 }
 0x867   : > { %4443 = vst [vmem:[#allocation3 + $0x58] sm:$0xf] %v4433_v32  ;;  %v7743_v32 = vcombine.high %v7737_v27, %v7737_v27 }
 0x868   : > { %v7634_v20 = vld [vmem:[#allocation3 + $0x18] sm:$0xff] }
 0x869   : > { %4771 = vrot.lane.b32.xlu1 %v7614_v10, %s5962_s22  ;;  %4739 = vst [vmem:[#allocation4 + $0x150] sm:$0xff] %v7634_v20  ;;  %5646 = vmatprep.mubr.msk.f32.mxu1 %vm4189_vm15, %v7743_v32 }
 0x86a   : > { %4841 = vrot.lane.b32.xlu0 %v7589_v24, %s5961_s5  ;;  %v7641_v36 = vld [vmem:[#allocation3 + $0x20] sm:$0xff]  ;;  %5647 = vmatprep.mubr.msk.f32.mxu0 %vm4189_vm15, %v7743_v32 }
 0x86b   : > { %4740 = vst [vmem:[#allocation4 + $0x158] sm:$0xff] %v7641_v36 }
 0x86c   : > { %v4734_v54 = vld [vmem:[#allocation3 + $0x50] sm:$0xf] }
 0x86d   : > { %4744 = vst [vmem:[#allocation4 + $0x178] sm:$0xf] %v4734_v54  ;;  %4677 = vrot.lane.b32.xlu1 %v7589_v24, %s5963_s0  ;;  %v4901_v17 = vld [vmem:[#allocation3 + $0x50] sm:$0xf] }
 0x86e   : > { %4769 = vrot.lane.b32.xlu0 %v7589_v24, %s5962_s22  ;;  %v4735_v61 = vld [vmem:[#allocation3 + $0x58] sm:$0xf]  ;;  %v4823_v30 = vld [vmem:[#allocation3 + $0x50] sm:$0xf] }
 0x86f   : > { %4745 = vst [vmem:[#allocation4 + $0x180] sm:$0xf] %v4735_v61  ;;  %v4754_v48 = vld [vmem:[#allocation3 + $0x50] sm:$0xf]  ;;  %v4902_v29 = vld [vmem:[#allocation3 + $0x58] sm:$0xf] }
 0x870   : > { %v4979_v2 = vld [vmem:[#allocation3 + $0x50] sm:$0xf]  ;;  %v4824_v25 = vld [vmem:[#allocation3 + $0x58] sm:$0xf] }
 0x871   : > { %4537 = vrot.lane.b32.xlu1 %v7589_v24, %s5965_s24  ;;  %v4589_v0 = vld [vmem:[#allocation3 + $0x50] sm:$0xf]  ;;  %v4659_v8 = vld [vmem:[#allocation3 + $0x58] sm:$0xf] }
 0x872   : > { %4605 = vrot.lane.b32.xlu0 %v7589_v24, %s5964_s23  ;;  %v4658_v22 = vld [vmem:[#allocation3 + $0x50] sm:$0xf]  ;;  %v4755_v44 = vld [vmem:[#allocation3 + $0x58] sm:$0xf] }
 0x873   : > { %v4590_v19 = vld [vmem:[#allocation3 + $0x58] sm:$0xf] }
 0x875   : > { %4999 = vrot.lane.b32.xlu1 %v7614_v10, %s5967_s28 }
 0x876   : > { %4469 = vrot.lane.b32.xlu0 %v7589_v24, %s5966_s26 }
 0x879   : > { %4679 = vrot.lane.b32.xlu1 %v7614_v10, %s5963_s0 }
 0x87a   : > { %4997 = vrot.lane.b32.xlu0 %v7589_v24, %s5967_s28 }
 0x87d   : > { %4607 = vrot.lane.b32.xlu1 %v7614_v10, %s5964_s23 }
 0x87e   : > { %4613 = vrot.lane.b32.xlu0 %v4587_v28, %s5964_s23 }
 0x881   : > { %v4416_v47 = vpop.f32.mrf.mxu0  ;;  %4929 = vrot.lane.b32.xlu1 %v4899_v1, %s5960_s30 }
 0x882   : > { %v4417_v52 = vadd.f32 %v4416_v47, %v7578_v42  ;;  %4477 = vrot.lane.b32.xlu0 %v4451_v56, %s5966_s26  ;;  %v4753_v42 = vld [vmem:[#allocation3 + $0x48] sm:$0xf]  ;;  %v4522_v56 = vld [vmem:[#allocation3 + $0x58] sm:$0xf] }
 0x883   : > { %v4418_v43 = vpop.f32.mrf.mxu0 }
 0x884   : > { %v4429_v40 = vmul.f32 %v4417_v52, %v6372_v26  ;;  %v5850_v52 = vunpack.i.h.bf16 %v7702_v46 }
 0x885   : > { %v4421_v39 = vpop.f32.mrf.mxu0  ;;  %4851 = vrot.lane.b32.xlu1 %v4821_v53, %s5961_s5 }
 0x886   : > { %4439 = vst.msk [vmem:[#allocation3 + $0x28] sm:$0xff] %vm703_vm1, %v4429_v40  ;;  %v4422_v11 = vadd.f32 %v4421_v39, %v7585_v14  ;;  %4845 = vrot.lane.b32.xlu0 %v7619_v18, %s5961_s5  ;;  %v7704_v14 = vpop.permute.xlu0 %5852  ;;  %v5860_v39 = vunpack.i.h.bf16 %v7708_v15 }
 0x887   : > { %v4423_v55 = vpop.f32.mrf.mxu0  ;;  %v5855_v49 = vunpack.i.h.bf16 %v7704_v14 }
 0x888   : > { %v4434_v33 = vmul.f32 %v4422_v11, %v6372_v26  ;;  %v4521_v11 = vld [vmem:[#allocation3 + $0x50] sm:$0xf] }
 0x889   : > { %4777 = vrot.lane.b32.xlu1 %v4752_v45, %s5962_s22  ;;  %v4454_v45 = vld [vmem:[#allocation3 + $0x58] sm:$0xf] }
 0x88a   : > { %4444 = vst.msk [vmem:[#allocation3 + $0x60] sm:$0xf] %vm804_vm0, %v4434_v33  ;;  %4681 = vrot.lane.b32.xlu0 %v7619_v18, %s5963_s0  ;;  %v7710_v37 = vpop.permute.xlu0 %5862 }
 0x88b   : > { %v5865_v62 = vunpack.i.h.bf16 %v7710_v37 }
 0x88d   : > { %4687 = vrot.lane.b32.xlu1 %v4656_v4, %s5963_s0  ;;  %v7678_v34 = vld [vmem:[#allocation3 + $0x28] sm:$0xff] }
 0x88e   : > { %4933 = vrot.lane.b32.xlu0 %v4901_v17, %s5960_s30  ;;  %4741 = vst.msk [vmem:[#allocation4 + $0x160] sm:$0xff] %vm703_vm1, %v7678_v34  ;;  %v7720_v31 = vpop.permute.xlu0 %5872 }
 0x891   : > { %v4736_v59 = vld [vmem:[#allocation3 + $0x60] sm:$0xf]  ;;  %4545 = vrot.lane.b32.xlu1 %v4519_v60, %s5965_s24 }
 0x892   : > { %4746 = vst.msk [vmem:[#allocation4 + $0x188] sm:$0xf] %vm804_vm0, %v4736_v59  ;;  %4855 = vrot.lane.b32.xlu0 %v4823_v30, %s5961_s5  ;;  %v4756_v5 = vld [vmem:[#allocation3 + $0x60] sm:$0xf]  ;;  %v4453_v59 = vld [vmem:[#allocation3 + $0x50] sm:$0xf] }
 0x893   : > { %v4903_v1 = vld [vmem:[#allocation3 + $0x60] sm:$0xf] }
 0x894   : > { %v4825_v43 = vld [vmem:[#allocation3 + $0x60] sm:$0xf] }
 0x895   : > { %5007 = vrot.lane.b32.xlu1 %v4977_v58, %s5967_s28 }
 0x896   : > { %4781 = vrot.lane.b32.xlu0 %v4754_v48, %s5962_s22 }
 0x899   : > { %4923 = vrot.lane.b32.xlu1 %v7619_v18, %s5960_s30 }
 0x89a   : > { %4689 = vrot.lane.b32.xlu0 %v4657_v63, %s5963_s0  ;;  %v4981_v63 = vld [vmem:[#allocation3 + $0x60] sm:$0xf] }
 0x89d   : > { %4773 = vrot.lane.b32.xlu1 %v7619_v18, %s5962_s22 }
 0x89e   : > { %4547 = vrot.lane.b32.xlu0 %v4520_v50, %s5965_s24 }
 0x8a1   : > { %4931 = vrot.lane.b32.xlu1 %v4900_v51, %s5960_s30  ;;  %v4660_v51 = vld [vmem:[#allocation3 + $0x60] sm:$0xf] }
 0x8a2   : > { %5011 = vrot.lane.b32.xlu0 %v4979_v2, %s5967_s28 }
 0x8a5   : > { %4853 = vrot.lane.b32.xlu1 %v4822_v13, %s5961_s5 }
 0x8a6   : > { %4617 = vrot.lane.b32.xlu0 %v4589_v0, %s5964_s23 }
 0x8a9   : > { %4779 = vrot.lane.b32.xlu1 %v4753_v42, %s5962_s22 }
 0x8aa   : > { %4935 = vrot.lane.b32.xlu0 %v4902_v29, %s5960_s30 }
 0x8ad   : > { %4615 = vrot.lane.b32.xlu1 %v4588_v41, %s5964_s23 }
 0x8ae   : > { %4857 = vrot.lane.b32.xlu0 %v4824_v25, %s5961_s5 }
 0x8b1   : > { %4479 = vrot.lane.b32.xlu1 %v4452_v57, %s5966_s26 }
 0x8b2   : > { %4693 = vrot.lane.b32.xlu0 %v4659_v8, %s5963_s0  ;;  %v7819_v8 = vld [vmem:[#allocation2] sm:$0xff] }
 0x8b5   : > { %5009 = vrot.lane.b32.xlu1 %v4978_v6, %s5967_s28  ;;  %v5467_v6 = vld [vmem:[%s8174_s19] sm:$0xf] }
 0x8b6   : > { %4925 = vrot.lane.b32.xlu0 %v7678_v34, %s5960_s30 }
 0x8b9   : > { %4691 = vrot.lane.b32.xlu1 %v4658_v22, %s5963_s0  ;;  %v4980_v22 = vld [vmem:[#allocation3 + $0x58] sm:$0xf] }
 0x8ba   : > { %4775 = vrot.lane.b32.xlu0 %v7678_v34, %s5962_s22 }
 0x8bd   : > { %4783 = vrot.lane.b32.xlu1 %v4755_v44, %s5962_s22 }
 0x8be   : > { %4683 = vrot.lane.b32.xlu0 %v7678_v34, %s5963_s0 }
 0x8c0   : > { %v4918_v35 = vpop.permute.xlu0 %4917  ;;  %v7726_v21 = vpop.permute.xlu1 %4603 }
 0x8c1   : > { %4619 = vrot.lane.b32.xlu1 %v4590_v19, %s5964_s23  ;;  %v7732_v9 = vsel %vm3649_vm3, %v5855_v49, %v7726_v21 }
 0x8c2   : > { %4639 = vst [vmem:[#allocation4 + $0xa0] sm:$0xff] %v7732_v9  ;;  %4785 = vrot.lane.b32.xlu0 %v4756_v5, %s5962_s22  ;;  %v4982_v5 = vld [vmem:[#allocation3 + $0x68] sm:$0xf] }
 0x8c4   : > { %v4840_v54 = vpop.permute.xlu0 %4839  ;;  %v7745_v61 = vpop.permute.xlu1 %4467 }
 0x8c5   : > { %4847 = vrot.lane.b32.xlu1 %v7678_v34, %s5961_s5  ;;  %v7755_v28 = vsel %vm3511_vm6, %v5865_v62, %v7745_v61 }
 0x8c6   : > { %4503 = vst [vmem:[#allocation4] sm:$0xff] %v7755_v28  ;;  %4609 = vrot.lane.b32.xlu0 %v7619_v18, %s5964_s23 }
 0x8c8   : > { %v4768_v47 = vpop.permute.xlu0 %4767 }
 0x8c9   : > { %4937 = vrot.lane.b32.xlu1 %v4903_v1, %s5960_s30 }
 0x8ca   : > { %4551 = vrot.lane.b32.xlu0 %v4522_v56, %s5965_s24  ;;  %v5854_v56 = vunpack.i.l.bf16 %v7704_v14  ;;  %v5864_v14 = vunpack.i.l.bf16 %v7710_v37 }
 0x8cc   : > { %v4676_v40 = vpop.permute.xlu0 %4675 }
 0x8cd   : > { %4859 = vrot.lane.b32.xlu1 %v4825_v43, %s5961_s5  ;;  %v7765_v53 = vsel %vm3726_vm2, %v5850_v52, %v4676_v40 }
 0x8ce   : > { %4717 = vst [vmem:[#allocation4 + $0xf0] sm:$0xff] %v7765_v53  ;;  %4541 = vrot.lane.b32.xlu0 %v7619_v18, %s5965_s24 }
 0x8d0   : > { %v4536_v55 = vpop.permute.xlu0 %4535 }
 0x8d1   : > { %4549 = vrot.lane.b32.xlu1 %v4521_v11, %s5965_s24  ;;  %v7773_v33 = vsel %vm3580_vm5, %v5860_v39, %v4536_v55  ;;  %v5478_v11 = vld [vmem:[%s8175_s20] sm:$0xf] }
 0x8d2   : > { %4571 = vst [vmem:[#allocation4 + $0x50] sm:$0xff] %v7773_v33  ;;  %4483 = vrot.lane.b32.xlu0 %v4454_v45, %s5966_s26 }
 0x8d3   : > { %v7777_v4 = vpop.permute.xlu1 %4921 }
 0x8d4   : > { %v4996_v17 = vpop.permute.xlu0 %4995 }
 0x8d5   : > { %4539 = vrot.lane.b32.xlu1 %v7614_v10, %s5965_s24 }
 0x8d6   : > { %4473 = vrot.lane.b32.xlu0 %v7619_v18, %s5966_s26 }
 0x8d7   : > { %v7783_v60 = vpop.permute.xlu1 %4843 }
 0x8d8   : > { %v4920_v30 = vpop.permute.xlu0 %4919 }
 0x8d9   : > { %4481 = vrot.lane.b32.xlu1 %v4453_v59, %s5966_s26  ;;  %v7787_v58 = vsel %vm3973_vm7, %v4918_v35, %v4920_v30  ;;  %v7791_v48 = vsel %vm3973_vm7, %v4920_v30, %v7777_v4 }
 0x8da   : > { %5015 = vrot.lane.b32.xlu0 %v4981_v63, %s5967_s28 }
 0x8db   : > { %v7794_v50 = vpop.permute.xlu1 %4771 }
 0x8dc   : > { %v4842_v2 = vpop.permute.xlu0 %4841 }
 0x8dd   : > { %4695 = vrot.lane.b32.xlu1 %v4660_v51, %s5963_s0  ;;  %v7798_v13 = vsel %vm3894_vm11, %v4840_v54, %v4842_v2  ;;  %v7802_v0 = vsel %vm3894_vm11, %v4842_v2, %v7783_v60 }
 0x8de   : > { %5003 = vrot.lane.b32.xlu0 %v7678_v34, %s5967_s28 }
 0x8df   : > { %v4678_v42 = vpop.permute.xlu1 %4677 }
 0x8e0   : > { %v7807_v29 = vsel %vm3726_vm2, %v4676_v40, %v4678_v42  ;;  %v4770_v41 = vpop.permute.xlu0 %4769 }
 0x8e1   : > { %4718 = vst [vmem:[#allocation4 + $0xf8] sm:$0xff] %v7807_v29  ;;  %4471 = vrot.lane.b32.xlu1 %v7614_v10, %s5966_s26  ;;  %v7813_v25 = vsel %vm3817_vm10, %v4768_v47, %v4770_v41  ;;  %v7817_v57 = vsel %vm3817_vm10, %v4770_v41, %v7794_v50  ;;  %s5649_s26 = sld [smem:[#allocation5 + $0x2]] }
 0x8e2   : > { %5005 = vrot.lane.b32.xlu0 %v7819_v8, %s5967_s28 }
 0x8e3   : > { %v7823_v34 = vpop.permute.xlu1 %4537 }
 0x8e4   : > { %v7830_v10 = vsel %vm3580_vm5, %v4536_v55, %v7823_v34  ;;  %v4606_v44 = vpop.permute.xlu0 %4605 }
 0x8e5   : > { %4572 = vst [vmem:[#allocation4 + $0x58] sm:$0xff] %v7830_v10  ;;  %5013 = vrot.lane.b32.xlu1 %v4980_v22, %s5967_s28  ;;  %v7836_v49 = vsel %vm3649_vm3, %v7726_v21, %v4606_v44 }
 0x8e6   : > { %4640 = vst [vmem:[#allocation4 + $0xa8] sm:$0xff] %v7836_v49  ;;  %5470 = vperm.xlu0 %5824, %v5467_v6  }
 0x8e7   : > { %v7839_v19 = vpop.permute.xlu1 %4999 }
 0x8e8   : > { %v7841_v35 = vpop.permute.xlu0 %4469 }
 0x8e9   : > { %5001 = vrot.lane.b32.xlu1 %v7619_v18, %s5967_s28  ;;  %v7848_v62 = vsel %vm3511_vm6, %v7745_v61, %v7841_v35  ;;  %v5140_v61 = vld [vmem:[%s8173_s18] sm:$0xf] }
 0x8ea   : > { %4504 = vst [vmem:[#allocation4 + $0x8] sm:$0xff] %v7848_v62 }
 0x8eb   : > { %v4680_v21 = vpop.permute.xlu1 %4679 }
 0x8ec   : > { %v7852_v54 = vsel %vm3726_vm2, %v4678_v42, %v4680_v21  ;;  %v4998_v1 = vpop.permute.xlu0 %4997  ;;  %v5849_v42 = vunpack.i.l.bf16 %v7702_v46 }
 0x8ed   : > { %4719 = vst [vmem:[#allocation4 + $0x100] sm:$0xff] %v7852_v54  ;;  %5017 = vrot.lane.b32.xlu1 %v4982_v5, %s5967_s28  ;;  %v7857_v47 = vsel %vm4052_vm8, %v4996_v17, %v4998_v1  ;;  %v7861_v18 = vsel %vm4052_vm8, %v4998_v1, %v7839_v19 }
 0x8ef   : > { %v7867_v52 = vpop.permute.xlu1 %4607 }
 0x8f0   : > { %v7871_v43 = vsel %vm3649_vm3, %v4606_v44, %v7867_v52  ;;  %v7873_v40 = vpop.permute.xlu0 %4613 }
 0x8f1   : > { %4641 = vst [vmem:[#allocation4 + $0xb0] sm:$0xff] %v7871_v43  ;;  %5143 = vperm.xlu1 %5825, %v5140_v61   ;;  %v4625_v39 = vsel %vm3649_vm3, %v5854_v56, %v7873_v40 }
 0x8f2   : > { %4644 = vst [vmem:[#allocation4 + $0xc8] sm:$0xf] %v4625_v39 }
 0x8f3   : > { %v4930_v55 = vpop.permute.xlu1 %4929 }
 0x8f4   : > { %v7882_v45 = vpop.permute.xlu0 %4477 }
 0x8f5   : > { %5481 = vperm.xlu1 %5825, %v5478_v11   ;;  %v4489_v17 = vsel %vm3511_vm6, %v5864_v14, %v7882_v45 }
 0x8f6   : > { %4508 = vst [vmem:[#allocation4 + $0x28] sm:$0xf] %v4489_v17 }
 0x8f7   : > { %v4852_v59 = vpop.permute.xlu1 %4851 }
 0x8f8   : > { %v7886_v30 = vpop.permute.xlu0 %4845 }
 0x8f9   : > { %v7891_v63 = vsel %vm3894_vm11, %v7783_v60, %v7886_v30  ;;  %v5859_v60 = vunpack.i.l.bf16 %v7708_v15 }
 0x8fa   : > { %4885 = vst [vmem:[#allocation4 + $0x1f0] sm:$0xff] %v7891_v63 }
 0x8fb   : > { %v4778_v51 = vpop.permute.xlu1 %4777 }
 0x8fc   : > { %v7894_v37 = vpop.permute.xlu0 %4681 }
 0x8fd   : > { %v7898_v2 = vsel %vm3726_vm2, %v4680_v21, %v7894_v37 }
 0x8fe   : > { %4720 = vst [vmem:[#allocation4 + $0x108] sm:$0xff] %v7898_v2 }
 0x8ff   : > { %v4688_v41 = vpop.permute.xlu1 %4687 }
 0x900   : > { %v4702_v6 = vsel %vm3726_vm2, %v5849_v42, %v4688_v41  ;;  %v4934_v22 = vpop.permute.xlu0 %4933 }
 0x901   : > { %4722 = vst [vmem:[#allocation4 + $0x118] sm:$0xf] %v4702_v6 }
 0x903   : > { %v4546_v44 = vpop.permute.xlu1 %4545 }
 0x904   : > { %v4557_v5 = vsel %vm3580_vm5, %v5859_v60, %v4546_v44  ;;  %v4856_v1 = vpop.permute.xlu0 %4855 }
 0x905   : > { %4576 = vst [vmem:[#allocation4 + $0x78] sm:$0xf] %v4557_v5 }
 0x907   : > { %v7905_v61 = vpop.permute.xlu1 %5007 }
 0x908   : > { %v7907_v21 = vpop.permute.xlu0 %4781 }
 0x90b   : > { %v7909_v56 = vpop.permute.xlu1 %4923 }
 0x90c   : > { %v7914_v46 = vsel %vm3973_vm7, %v7777_v4, %v7909_v56  ;;  %v7916_v39 = vpop.permute.xlu0 %4689 }
 0x90d   : > { %v4703_v15 = vsel %vm3726_vm2, %v4688_v41, %v7916_v39 }
 0x90e   : > { %4723 = vst [vmem:[#allocation4 + $0x120] sm:$0xf] %v4703_v15 }
 0x90f   : > { %v7920_v11 = vpop.permute.xlu1 %4773 }
 0x910   : > { %v7925_v14 = vsel %vm3817_vm10, %v7794_v50, %v7920_v11  ;;  %v7927_v17 = vpop.permute.xlu0 %4547 }
 0x911   : > { %4807 = vst [vmem:[#allocation4 + $0x1a0] sm:$0xff] %v7925_v14  ;;  %v4558_v4 = vsel %vm3580_vm5, %v4546_v44, %v7927_v17 }
 0x912   : > { %4577 = vst [vmem:[#allocation4 + $0x80] sm:$0xf] %v4558_v4 }
 0x913   : > { %v4932_v42 = vpop.permute.xlu1 %4931 }
 0x914   : > { %v4946_v6 = vsel %vm3973_vm7, %v4930_v55, %v4932_v42  ;;  %v4947_v41 = vsel %vm3973_vm7, %v4932_v42, %v4934_v22  ;;  %v7934_v60 = vpop.permute.xlu0 %5011 }
 0x915   : > { %4966 = vst [vmem:[#allocation4 + $0x258] sm:$0xf] %v4946_v6  ;;  %4967 = vst [vmem:[#allocation4 + $0x260] sm:$0xf] %v4947_v41 }
 0x917   : > { %v4854_v5 = vpop.permute.xlu1 %4853 }
 0x918   : > { %v4868_v50 = vsel %vm3894_vm11, %v4852_v59, %v4854_v5  ;;  %v4869_v15 = vsel %vm3894_vm11, %v4854_v5, %v4856_v1  ;;  %v7938_v26 = vpop.permute.xlu0 %4617 }
 0x919   : > { %4888 = vst [vmem:[#allocation4 + $0x208] sm:$0xf] %v4868_v50  ;;  %4889 = vst [vmem:[#allocation4 + $0x210] sm:$0xf] %v4869_v15 }
 0x91b   : > { %v4780_v44 = vpop.permute.xlu1 %4779 }
 0x91c   : > { %v4791_v4 = vsel %vm3817_vm10, %v4778_v51, %v4780_v44  ;;  %v4792_v55 = vsel %vm3817_vm10, %v4780_v44, %v7907_v21  ;;  %v5125_v42 = vld [vmem:[#allocation4 + $0x260] sm:$0xff]  ;;  %v5124_v16 = vld [vmem:[#allocation4 + $0x258] sm:$0xff]  ;;  %v7943_v12 = vpop.permute.xlu0 %4935 }
 0x91d   : > { %4810 = vst [vmem:[#allocation4 + $0x1b8] sm:$0xf] %v4791_v4  ;;  %4811 = vst [vmem:[#allocation4 + $0x1c0] sm:$0xf] %v4792_v55  ;;  %5150 = vmatprep.subr.mxu1 %v5125_v42  ;;  %v4948_v59 = vsel %vm3973_vm7, %v4934_v22, %v7943_v12  ;;  %v5094_v42 = vld [vmem:[#allocation4 + $0x168] sm:$0xff] }
 0x91e   : > { %5151 = vmatpush1.msra.mxu1 %v5124_v16  ;;  %4968 = vst [vmem:[#allocation4 + $0x268] sm:$0xf] %v4948_v59 }
 0x91f   : > { %5152 = vmatprep.subr.mxu1 %v7791_v48  ;;  %v4616_v6 = vpop.permute.xlu1 %4615 }
 0x920   : > { %v4626_v51 = vsel %vm3649_vm3, %v7873_v40, %v4616_v6  ;;  %v4627_v41 = vsel %vm3649_vm3, %v4616_v6, %v7938_v26  ;;  %5153 = vmatpush1.msra.mxu1 %v7787_v58  ;;  %v5115_v5 = vld [vmem:[#allocation4 + $0x210] sm:$0xff]  ;;  %v5114_v50 = vld [vmem:[#allocation4 + $0x208] sm:$0xff]  ;;  %v7953_v15 = vpop.permute.xlu0 %4857 }
 0x921   : > { %4645 = vst [vmem:[#allocation4 + $0xd0] sm:$0xf] %v4626_v51  ;;  %4646 = vst [vmem:[#allocation4 + $0xd8] sm:$0xf] %v4627_v41  ;;  %5154 = vmatprep.subr.mxu1 %v5115_v5  ;;  %v4870_v16 = vsel %vm3894_vm11, %v4856_v1, %v7953_v15  ;;  %v5870_v1 = vunpack.i.h.bf16 %v7718_v23  ;;  %v5085_v51 = vld [vmem:[#allocation4 + $0x120] sm:$0xff] }
 0x922   : > { %5155 = vmatpush1.msra.mxu1 %v5114_v50  ;;  %4890 = vst [vmem:[#allocation4 + $0x218] sm:$0xf] %v4870_v16  ;;  %v5074_v16 = vld [vmem:[#allocation4 + $0xc8] sm:$0xff] }
 0x923   : > { %5156 = vmatprep.subr.mxu1 %v7802_v0  ;;  %v7958_v48 = vpop.permute.xlu1 %4479 }
 0x924   : > { %v4490_v58 = vsel %vm3511_vm6, %v7882_v45, %v7958_v48  ;;  %5157 = vmatpush1.msra.mxu1 %v7798_v13  ;;  %v5105_v40 = vld [vmem:[#allocation4 + $0x1c0] sm:$0xff]  ;;  %v5104_v22 = vld [vmem:[#allocation4 + $0x1b8] sm:$0xff]  ;;  %v7964_v44 = vpop.permute.xlu0 %4693  ;;  %v5095_v13 = vld [vmem:[#allocation4 + $0x170] sm:$0xff] }
 0x925   : > { %4509 = vst [vmem:[#allocation4 + $0x30] sm:$0xf] %v4490_v58  ;;  %5158 = vmatprep.subr.mxu1 %v5105_v40  ;;  %v5064_v40 = vld [vmem:[#allocation4 + $0x78] sm:$0xff] }
 0x926   : > { %5159 = vmatpush1.msra.mxu1 %v5104_v22  ;;  %v5875_v22 = vunpack.i.h.bf16 %v7720_v31 }
 0x927   : > { %5160 = vmatprep.subr.mxu1 %v7817_v57  ;;  %v5010_v0 = vpop.permute.xlu1 %5009 }
 0x928   : > { %v5024_v4 = vsel %vm4052_vm8, %v7905_v61, %v5010_v0  ;;  %v5025_v45 = vsel %vm4052_vm8, %v5010_v0, %v7934_v60  ;;  %5161 = vmatpush1.msra.mxu1 %v7813_v25  ;;  %v4926_v55 = vpop.permute.xlu0 %4925 }
 0x929   : > { %5044 = vst [vmem:[#allocation4 + $0x2a8] sm:$0xf] %v5024_v4  ;;  %5045 = vst [vmem:[#allocation4 + $0x2b0] sm:$0xf] %v5025_v45  ;;  %5162 = vmatprep.subr.mxu1 %v5095_v13  ;;  %v7975_v59 = vsel %vm3973_vm7, %v7909_v56, %v4926_v55  ;;  %v4945_v57 = vsel %vm3973_vm7, %v4926_v55, %v5870_v1  ;;  %v5084_v56 = vld [vmem:[#allocation4 + $0x118] sm:$0xff]  ;;  %v5054_v4 = vld [vmem:[#allocation4 + $0x28] sm:$0xff] }
 0x92a   : > { %5163 = vmatpush1.msra.mxu1 %v5094_v42  ;;  %4965 = vst.msk [vmem:[#allocation4 + $0x250] sm:$0xff] %vm703_vm1, %v4945_v57  ;;  %v5874_v42 = vunpack.i.l.bf16 %v7720_v31 }
 0x92b   : > { %5164 = vmatprep.subr.mxu1 %v7589_v24  ;;  %v4692_v61 = vpop.permute.xlu1 %4691 }
 0x92c   : > { %v4704_v25 = vsel %vm3726_vm2, %v7916_v39, %v4692_v61  ;;  %v4705_v6 = vsel %vm3726_vm2, %v4692_v61, %v7964_v44  ;;  %5165 = vmatpush1.msra.mxu1 %v7582_v38  ;;  %v4776_v41 = vpop.permute.xlu0 %4775  ;;  %v5075_v38 = vld [vmem:[#allocation4 + $0xd0] sm:$0xff] }
 0x92d   : > { %4724 = vst [vmem:[#allocation4 + $0x128] sm:$0xf] %v4704_v25  ;;  %4725 = vst [vmem:[#allocation4 + $0x130] sm:$0xf] %v4705_v6  ;;  %5166 = vmatprep.subr.mxu1 %v5085_v51  ;;  %v7987_v5 = vsel %vm3817_vm10, %v7920_v11, %v4776_v41  ;;  %v5055_v1 = vld [vmem:[#allocation4 + $0x30] sm:$0xff]  ;;  %v5126_v6 = vld [vmem:[#allocation4 + $0x268] sm:$0xff] }
 0x92e   : > { %4809 = vst.msk [vmem:[#allocation4 + $0x1b0] sm:$0xff] %vm703_vm1, %v4776_v41  ;;  %5167 = vmatpush1.msra.mxu1 %v5084_v56 }
 0x92f   : > { %5168 = vmatprep.subr.mxu1 %v7807_v29  ;;  %v4784_v24 = vpop.permute.xlu1 %4783 }
 0x930   : > { %v4793_v39 = vsel %vm3817_vm10, %v7907_v21, %v4784_v24  ;;  %5169 = vmatpush1.msra.mxu1 %v7765_v53  ;;  %v4684_v50 = vpop.permute.xlu0 %4683  ;;  %v5065_v53 = vld [vmem:[#allocation4 + $0x80] sm:$0xff]  ;;  %v5135_v55 = vld [vmem:[#allocation4 + $0x2b0] sm:$0xff] }
 0x931   : > { %4812 = vst [vmem:[#allocation4 + $0x1c8] sm:$0xf] %v4793_v39  ;;  %5170 = vmatprep.subr.mxu1 %v5075_v38  ;;  %v4701_v11 = vsel %vm3726_vm2, %v7894_v37, %v4684_v50 }
 0x932   : > { %5171 = vmatpush1.msra.mxu1 %v5074_v16  ;;  %4721 = vst.msk [vmem:[#allocation4 + $0x110] sm:$0xff] %vm703_vm1, %v4701_v11 }
 0x933   : > { %5172 = vmatprep.subr.mxu1 %v7836_v49  ;;  %v4620_v29 = vpop.permute.xlu1 %4619 }
 0x934   : > { %v4628_v58 = vsel %vm3649_vm3, %v7938_v26, %v4620_v29  ;;  %4648 = vst.msk [vmem:[#allocation4 + $0xe8] sm:$0xf] %vm804_vm0, %v4620_v29  ;;  %5173 = vmatpush1.msra.mxu1 %v7732_v9  ;;  %v4786_v21 = vpop.permute.xlu0 %4785 }
 0x935   : > { %4647 = vst [vmem:[#allocation4 + $0xe0] sm:$0xf] %v4628_v58  ;;  %5174 = vmatprep.subr.mxu1 %v5065_v53  ;;  %v4794_v37 = vsel %vm3817_vm10, %v4784_v24, %v4786_v21  ;;  %4814 = vst.msk [vmem:[#allocation4 + $0x1d8] sm:$0xf] %vm804_vm0, %v4786_v21  ;;  %v5103_v53 = vld [vmem:[#allocation4 + $0x1b0] sm:$0xff]  ;;  %v5097_v21 = vld [vmem:[#allocation4 + $0x180] sm:$0xff] }
 0x936   : > { %5175 = vmatpush1.msra.mxu1 %v5064_v40  ;;  %4813 = vst [vmem:[#allocation4 + $0x1d0] sm:$0xf] %v4794_v37  ;;  %v5098_v40 = vld [vmem:[#allocation4 + $0x188] sm:$0xff] }
 0x937   : > { %5176 = vmatprep.subr.mxu1 %v7830_v10  ;;  %v4848_v26 = vpop.permute.xlu1 %4847  ;;  %v5869_v10 = vunpack.i.l.bf16 %v7718_v23  ;;  %v5134_v23 = vld [vmem:[#allocation4 + $0x2a8] sm:$0xff] }
 0x938   : > { %v8008_v49 = vsel %vm3894_vm11, %v7886_v30, %v4848_v26  ;;  %v4867_v9 = vsel %vm3894_vm11, %v4848_v26, %v5875_v22  ;;  %5177 = vmatpush1.msra.mxu1 %v7773_v33  ;;  %v4610_v0 = vpop.permute.xlu0 %4609  ;;  %v5106_v58 = vld [vmem:[#allocation4 + $0x1c8] sm:$0xff]  ;;  %v5096_v22 = vld [vmem:[#allocation4 + $0x178] sm:$0xff] }
 0x939   : > { %4887 = vst.msk [vmem:[#allocation4 + $0x200] sm:$0xff] %vm703_vm1, %v4867_v9  ;;  %5178 = vmatprep.subr.mxu1 %v5055_v1  ;;  %v8015_v45 = vsel %vm3649_vm3, %v7867_v52, %v4610_v0  ;;  %4643 = vst.msk [vmem:[#allocation4 + $0xc0] sm:$0xff] %vm703_vm1, %v4610_v0  ;;  %v5086_v1 = vld [vmem:[#allocation4 + $0x128] sm:$0xff] }
 0x93a   : > { %5179 = vmatpush1.msra.mxu1 %v5054_v4  ;;  %4642 = vst [vmem:[#allocation4 + $0xb8] sm:$0xff] %v8015_v45 }
 0x93b   : > { %5180 = vmatprep.subr.mxu1 %v7848_v62  ;;  %v4938_v33 = vpop.permute.xlu1 %4937 }
 0x93c   : > { %v4949_v30 = vsel %vm3973_vm7, %v7943_v12, %v4938_v33  ;;  %v4950_v13 = vsel %vm3973_vm7, %v4938_v33, %v5869_v10  ;;  %5181 = vmatpush1.msra.mxu1 %v7755_v28  ;;  %v4552_v52 = vpop.permute.xlu0 %4551  ;;  %v5108_v11 = vld [vmem:[#allocation4 + $0x1d8] sm:$0xff]  ;;  %v5077_v4 = vld [vmem:[#allocation4 + $0xe0] sm:$0xff] }
 0x93d   : > { %4969 = vst [vmem:[#allocation4 + $0x270] sm:$0xf] %v4949_v30  ;;  %4970 = vst.msk [vmem:[#allocation4 + $0x278] sm:$0xf] %vm804_vm0, %v4950_v13  ;;  %5210 = vmatprep.subr.mxu1 %v5135_v55  ;;  %v5107_v16 = vld [vmem:[#allocation4 + $0x1d0] sm:$0xff]  ;;  %v5076_v33 = vld [vmem:[#allocation4 + $0xd8] sm:$0xff] }
 0x93e   : > { %4580 = vst.msk [vmem:[#allocation4 + $0x98] sm:$0xf] %vm804_vm0, %v4552_v52  ;;  %5211 = vmatpush2.msra.mxu1 %v5134_v23  ;;  %v5078_v55 = vld [vmem:[#allocation4 + $0xe8] sm:$0xff] }
 0x93f   : > { %5212 = vmatprep.subr.mxu1 %v7861_v18  ;;  %v4860_v62 = vpop.permute.xlu1 %4859 }
 0x940   : > { %v4871_v12 = vsel %vm3894_vm11, %v7953_v15, %v4860_v62  ;;  %v4872_v28 = vsel %vm3894_vm11, %v4860_v62, %v5874_v42  ;;  %5213 = vmatpush2.msra.mxu1 %v7857_v47  ;;  %v4542_v57 = vpop.permute.xlu0 %4541 }
 0x941   : > { %4891 = vst [vmem:[#allocation4 + $0x220] sm:$0xf] %v4871_v12  ;;  %4892 = vst.msk [vmem:[#allocation4 + $0x228] sm:$0xf] %vm804_vm0, %v4872_v28  ;;  %5215 = vmatmul.mubr.f32.vlgmr.msra.gmra.mxu1 %v7737_v27  ;;  %5292 = vmatprep.subr.mxu1 %v7819_v8 }
 0x942   : > { %4575 = vst.msk [vmem:[#allocation4 + $0x70] sm:$0xff] %vm703_vm1, %v4542_v57  ;;  %5648 = vmatprep.mubr.msk.f32.mxu1 %vm4189_vm15, %v7743_v32  ;;  %v5123_v32 = vld [vmem:[#allocation4 + $0x250] sm:$0xff] }
 0x943   : > { %v4550_v31 = vpop.permute.xlu1 %4549 }
 0x944   : > { %v4559_v18 = vsel %vm3580_vm5, %v7927_v17, %v4550_v31  ;;  %v4560_v15 = vsel %vm3580_vm5, %v4550_v31, %v4552_v52  ;;  %v5127_v47 = vld [vmem:[#allocation4 + $0x270] sm:$0xff]  ;;  %v5128_v61 = vld [vmem:[#allocation4 + $0x278] sm:$0xff]  ;;  %v4484_v25 = vpop.permute.xlu0 %4483 }
 0x945   : > { %4578 = vst [vmem:[#allocation4 + $0x88] sm:$0xf] %v4559_v18  ;;  %4579 = vst [vmem:[#allocation4 + $0x90] sm:$0xf] %v4560_v15  ;;  %5221 = vmatprep.subr.mxu0 %v5127_v47  ;;  %5293 = vmatpush1.msra.mxu1 %v5128_v61  ;;  %v5068_v42 = vld [vmem:[#allocation4 + $0x98] sm:$0xff] }
 0x946   : > { %4512 = vst.msk [vmem:[#allocation4 + $0x48] sm:$0xf] %vm804_vm0, %v4484_v25  ;;  %5222 = vmatpush1.msra.mxu0 %v5126_v6  ;;  %5294 = vmatprep.subr.mxu1 %v7819_v8 }
 0x947   : > { %5223 = vmatprep.subr.mxu0 %v7975_v59  ;;  %5295 = vmatpush1.msra.mxu1 %v5123_v32  ;;  %v4540_v17 = vpop.permute.xlu1 %4539  ;;  %v5116_v59 = vld [vmem:[#allocation4 + $0x218] sm:$0xff] }
 0x948   : > { %v8047_v51 = vsel %vm3580_vm5, %v7823_v34, %v4540_v17  ;;  %v8050_v41 = vsel %vm3580_vm5, %v4540_v17, %v4542_v57  ;;  %5224 = vmatpush1.msra.mxu0 %v7914_v46  ;;  %5296 = vmatprep.subr.mxu1 %v7819_v8  ;;  %v5117_v56 = vld [vmem:[#allocation4 + $0x220] sm:$0xff]  ;;  %v5118_v24 = vld [vmem:[#allocation4 + $0x228] sm:$0xff]  ;;  %v4474_v39 = vpop.permute.xlu0 %4473 }
 0x949   : > { %4573 = vst [vmem:[#allocation4 + $0x60] sm:$0xff] %v8047_v51  ;;  %4574 = vst [vmem:[#allocation4 + $0x68] sm:$0xff] %v8050_v41  ;;  %5225 = vmatprep.subr.mxu0 %v5117_v56  ;;  %5297 = vmatpush1.msra.mxu1 %v5118_v24  ;;  %v5113_v34 = vld [vmem:[#allocation4 + $0x200] sm:$0xff]  ;;  %v5063_v12 = vld [vmem:[#allocation4 + $0x70] sm:$0xff] }
 0x94a   : > { %4507 = vst.msk [vmem:[#allocation4 + $0x20] sm:$0xff] %vm703_vm1, %v4474_v39  ;;  %5226 = vmatpush1.msra.mxu0 %v5116_v59  ;;  %5298 = vmatprep.subr.mxu1 %v7819_v8 }
 0x94b   : > { %5227 = vmatprep.subr.mxu0 %v8008_v49  ;;  %5299 = vmatpush1.msra.mxu1 %v5113_v34  ;;  %v4482_v46 = vpop.permute.xlu1 %4481  ;;  %v5087_v49 = vld [vmem:[#allocation4 + $0x130] sm:$0xff] }
 0x94c   : > { %v4491_v38 = vsel %vm3511_vm6, %v7958_v48, %v4482_v46  ;;  %v4492_v50 = vsel %vm3511_vm6, %v4482_v46, %v4484_v25  ;;  %5228 = vmatpush1.msra.mxu0 %v7891_v63  ;;  %5300 = vmatprep.subr.mxu1 %v7819_v8  ;;  %v8064_v29 = vpop.permute.xlu0 %5015  ;;  %v5067_v13 = vld [vmem:[#allocation4 + $0x90] sm:$0xff]  ;;  %v5066_v52 = vld [vmem:[#allocation4 + $0x88] sm:$0xff] }
 0x94d   : > { %4510 = vst [vmem:[#allocation4 + $0x38] sm:$0xf] %v4491_v38  ;;  %4511 = vst [vmem:[#allocation4 + $0x40] sm:$0xf] %v4492_v50  ;;  %5229 = vmatprep.subr.mxu0 %v5107_v16  ;;  %5301 = vmatpush1.msra.mxu1 %v5108_v11  ;;  %v5058_v57 = vld [vmem:[#allocation4 + $0x48] sm:$0xff] }
 0x94e   : > { %5230 = vmatpush1.msra.mxu0 %v5106_v58  ;;  %5302 = vmatprep.subr.mxu1 %v7819_v8 }
 0x94f   : > { %5231 = vmatprep.subr.mxu0 %v7987_v5  ;;  %5303 = vmatpush1.msra.mxu1 %v5103_v53  ;;  %v4696_v48 = vpop.permute.xlu1 %4695  ;;  %v5093_v5 = vld [vmem:[#allocation4 + $0x160] sm:$0xff] }
 0x950   : > { %v4706_v63 = vsel %vm3726_vm2, %v7964_v44, %v4696_v48  ;;  %5232 = vmatpush1.msra.mxu0 %v7925_v14  ;;  %5304 = vmatprep.subr.mxu1 %v7819_v8  ;;  %v5004_v37 = vpop.permute.xlu0 %5003 }
 0x951   : > { %4726 = vst.msk [vmem:[#allocation4 + $0x138] sm:$0xf] %vm804_vm0, %v4706_v63  ;;  %5233 = vmatprep.subr.mxu0 %v5097_v21  ;;  %5305 = vmatpush1.msra.mxu1 %v5098_v40  ;;  %v5053_v18 = vld [vmem:[#allocation4 + $0x20] sm:$0xff] }
 0x952   : > { %5234 = vmatpush1.msra.mxu0 %v5096_v22  ;;  %5306 = vmatprep.subr.mxu1 %v7819_v8 }
 0x953   : > { %5235 = vmatprep.subr.mxu0 %v7641_v36  ;;  %5307 = vmatpush1.msra.mxu1 %v5093_v5  ;;  %v4472_v44 = vpop.permute.xlu1 %4471 }
 0x954   : > { %v4487_v14 = vsel %vm3511_vm6, %v7841_v35, %v4472_v44  ;;  %v4488_v26 = vsel %vm3511_vm6, %v4472_v44, %v4474_v39  ;;  %5236 = vmatpush1.msra.mxu0 %v7634_v20  ;;  %5308 = vmatprep.subr.mxu1 %v7819_v8  ;;  %v5006_v9 = vpop.permute.xlu0 %5005  ;;  %v5056_v62 = vld [vmem:[#allocation4 + $0x38] sm:$0xff] }
 0x955   : > { %4505 = vst [vmem:[#allocation4 + $0x10] sm:$0xff] %v4487_v14  ;;  %4506 = vst [vmem:[#allocation4 + $0x18] sm:$0xff] %v4488_v26  ;;  %5237 = vmatprep.subr.mxu0 %v5087_v49  ;;  %v5023_v0 = vsel %vm4052_vm8, %v5004_v37, %v5006_v9 }
 0x956   : > { %5238 = vmatpush1.msra.mxu0 %v5086_v1  ;;  %5043 = vst.msk [vmem:[#allocation4 + $0x2a0] sm:$0xff] %vm703_vm1, %v5023_v0 }
 0x957   : > { %5239 = vmatprep.subr.mxu0 %v7898_v2  ;;  %v5014_v36 = vpop.permute.xlu1 %5013  ;;  %v5083_v2 = vld [vmem:[#allocation4 + $0x110] sm:$0xff] }
 0x958   : > { %v5026_v35 = vsel %vm4052_vm8, %v7934_v60, %v5014_v36  ;;  %v5027_v20 = vsel %vm4052_vm8, %v5014_v36, %v8064_v29  ;;  %5240 = vmatpush1.msra.mxu0 %v7852_v54  ;;  %v5088_v10 = vld [vmem:[#allocation4 + $0x138] sm:$0xff] }
 0x959   : > { %5046 = vst [vmem:[#allocation4 + $0x2b8] sm:$0xf] %v5026_v35  ;;  %5047 = vst [vmem:[#allocation4 + $0x2c0] sm:$0xf] %v5027_v20  ;;  %5241 = vmatprep.subr.mxu0 %v5077_v4  ;;  %5309 = vmatpush1.msra.mxu1 %v5088_v10 }
 0x95a   : > { %5242 = vmatpush1.msra.mxu0 %v5076_v33  ;;  %5310 = vmatprep.subr.mxu1 %v7819_v8 }
 0x95b   : > { %5243 = vmatprep.subr.mxu0 %v8015_v45  ;;  %5311 = vmatpush1.msra.mxu1 %v5083_v2  ;;  %v5002_v60 = vpop.permute.xlu1 %5001  ;;  %v5073_v45 = vld [vmem:[#allocation4 + $0xc0] sm:$0xff] }
 0x95c   : > { %v5021_v30 = vsel %vm4052_vm8, %v7839_v19, %v5002_v60  ;;  %v5022_v54 = vsel %vm4052_vm8, %v5002_v60, %v5004_v37  ;;  %5244 = vmatpush1.msra.mxu0 %v7871_v43  ;;  %5312 = vmatprep.subr.mxu1 %v7819_v8  ;;  %v5057_v43 = vld [vmem:[#allocation4 + $0x40] sm:$0xff] }
 0x95d   : > { %5245 = vmatprep.subr.mxu0 %v5067_v13  ;;  %5313 = vmatpush1.msra.mxu1 %v5078_v55  ;;  %v5133_v47 = vld [vmem:[#allocation4 + $0x2a0] sm:$0xff] }
 0x95e   : > { %5246 = vmatpush1.msra.mxu0 %v5066_v52  ;;  %5314 = vmatprep.subr.mxu1 %v7819_v8 }
 0x95f   : > { %5247 = vmatprep.subr.mxu0 %v8050_v41  ;;  %5315 = vmatpush1.msra.mxu1 %v5073_v45  ;;  %v5018_v23 = vpop.permute.xlu1 %5017 }
 0x960   : > { %v5028_v19 = vsel %vm4052_vm8, %v8064_v29, %v5018_v23  ;;  %5248 = vmatpush1.msra.mxu0 %v8047_v51  ;;  %5316 = vmatprep.subr.mxu1 %v7819_v8  ;;  %v5137_v28 = vld [vmem:[#allocation4 + $0x2c0] sm:$0xff]  ;;  %v5136_v31 = vld [vmem:[#allocation4 + $0x2b8] sm:$0xff] }
 0x961   : > { %5048 = vst.msk [vmem:[#allocation4 + $0x2c8] sm:$0xf] %vm804_vm0, %v5028_v19  ;;  %5249 = vmatprep.subr.mxu0 %v5057_v43  ;;  %5317 = vmatpush1.msra.mxu1 %v5068_v42 }
 0x962   : > { %5250 = vmatpush1.msra.mxu0 %v5056_v62  ;;  %5318 = vmatprep.subr.mxu1 %v7819_v8 }
 0x963   : > { %5251 = vmatprep.subr.mxu0 %v4488_v26  ;;  %5319 = vmatpush1.msra.mxu1 %v5063_v12 }
 0x964   : > { %5252 = vmatpush1.msra.mxu0 %v4487_v14  ;;  %5320 = vmatprep.subr.mxu1 %v7819_v8 }
 0x965   : > { %5281 = vmatprep.subr.mxu0 %v5137_v28  ;;  %5321 = vmatpush1.msra.mxu1 %v5058_v57 }
 0x966   : > { %5282 = vmatpush2.msra.mxu0 %v5136_v31  ;;  %5322 = vmatprep.subr.mxu1 %v7819_v8 }
 0x967   : > { %5283 = vmatprep.subr.mxu0 %v5022_v54  ;;  %5323 = vmatpush1.msra.mxu1 %v5053_v18 }
 0x968   : > { %5284 = vmatpush2.msra.mxu0 %v5021_v30  ;;  %5352 = vmatprep.subr.mxu1 %v7819_v8  ;;  %v5138_v15 = vld [vmem:[#allocation4 + $0x2c8] sm:$0xff] }
 0x969   : > { %5286 = vmatmul.mubr.f32.vlgmr.msra.gmra.mxu0 %v7737_v27  ;;  %5353 = vmatpush2.msra.mxu1 %v5138_v15 }
 0x96a   : > { %5354 = vmatprep.subr.mxu1 %v7819_v8 }
 0x96b   : > { %5355 = vmatpush2.msra.mxu1 %v5133_v47 }
 0x96c   : > { %5357 = vmatmul.mubr.f32.vlgmr.msra.gmra.mxu1 %v7737_v27  ;;  %v5144_v61 = vpop.permute.xlu1 %5143 }
 0xa01   : > { %v5216_v25 = vpop.f32.mrf.mxu1 }
 0xa02   : > { %v5217_v6 = vadd.f32 %v5216_v25, %v5144_v61 }
 0xa03   : > { %v5218_v32 = vpop.f32.mrf.mxu1 }
 0xa04   : > { %v5362_v17 = vsel %vm1989_vm12, %v5217_v6, 0.0  ;;  %v5219_v51 = vadd.f32 %v5218_v32, %v5144_v61 }
 0xa05   : > { %v5363_v41 = vrot.slane %v5362_v17, 4 }
 0xa06   : > { %v5369_v56 = vsel %vm1989_vm12, %v5219_v51, 0.0 }
 0xa07   : > { %v5364_v24 = vadd.f32 %v5363_v41, %v5362_v17  ;;  %v5370_v39 = vrot.slane %v5369_v56, 4 }
 0xa09   : > { %v5365_v59 = vrot.slane %v5364_v24, 2  ;;  %v5371_v34 = vadd.f32 %v5370_v39, %v5369_v56  ;;  %v8116_v56 = vpop.permute.xlu0 %5470 }
 0xa0b   : > { %v5366_v46 = vadd.f32 %v5365_v59, %v5364_v24  ;;  %v5372_v8 = vrot.slane %v5371_v34, 2 }
 0xa0d   : > { %v5367_v38 = vrot.slane %v5366_v46, 1  ;;  %v5373_v50 = vadd.f32 %v5372_v8, %v5371_v34  ;;  %v8119_v8 = vpop.permute.xlu1 %5481 }
 0xa0f   : > { %v5368_v16 = vadd.f32 %v5367_v38, %v5366_v46  ;;  %v5374_v27 = vrot.slane %v5373_v50, 1  ;;  %v8121_v38 = vstv %s5649_s26 }
 0xa11   : > { %v5397_v11 = vmul.f32 0.25, %v5368_v16  ;;  %v5375_v29 = vadd.f32 %v5374_v27, %v5373_v50 }
 0xa13   : > { %v5402_v58 = vsub.f32 %v5217_v6, %v5397_v11  ;;  %v5398_v53 = vmul.f32 0.25, %v5375_v29 }
 0xa15   : > { %v5407_v48 = vmul.f32 %v5402_v58, %v5402_v58  ;;  %v5403_v63 = vsub.f32 %v5219_v51, %v5398_v53 }
 0xa17   : > { %v5412_v21 = vsel %vm1989_vm12, %v5407_v48, 0.0  ;;  %v5408_v40 = vmul.f32 %v5403_v63, %v5403_v63 }
 0xa18   : > { %v5413_v37 = vrot.slane %v5412_v21, 4 }
 0xa19   : > { %v5419_v22 = vsel %vm1989_vm12, %v5408_v40, 0.0 }
 0xa1a   : > { %v5414_v5 = vadd.f32 %v5413_v37, %v5412_v21  ;;  %v5420_v44 = vrot.slane %v5419_v22, 4 }
 0xa1c   : > { %v5415_v14 = vrot.slane %v5414_v5, 2  ;;  %v5421_v26 = vadd.f32 %v5420_v44, %v5419_v22 }
 0xa1e   : > { %v5416_v49 = vadd.f32 %v5415_v14, %v5414_v5  ;;  %v5422_v9 = vrot.slane %v5421_v26, 2 }
 0xa20   : > { %v5417_v1 = vrot.slane %v5416_v49, 1  ;;  %v5423_v0 = vadd.f32 %v5422_v9, %v5421_v26 }
 0xa22   : > { %v5418_v36 = vadd.f32 %v5417_v1, %v5416_v49  ;;  %v5424_v35 = vrot.slane %v5423_v0, 1 }
 0xa24   : > { %v5447_v20 = vmul.f32 0.25, %v5418_v36  ;;  %v5425_v4 = vadd.f32 %v5424_v35, %v5423_v0 }
 0xa26   : > { %v5452_v10 = vadd.f32 1e-05, %v5447_v20  ;;  %v5448_v33 = vmul.f32 0.25, %v5425_v4 }
 0xa28   : > { %5899 = vrsqrt.f32 %v5452_v10  ;;  %v5453_v2 = vadd.f32 1e-05, %v5448_v33 }
 0xa29   : > { %v5287_v60 = vpop.f32.mrf.mxu0 }
 0xa2a   : > { %5901 = vrsqrt.f32 %v5453_v2  ;;  %v5288_v30 = vadd.f32 %v5287_v60, %v5144_v61 }
 0xa2b   : > { %v5289_v54 = vpop.f32.mrf.mxu0 }
 0xa2c   : > { %v5376_v13 = vsel %vm1989_vm12, %v5288_v30, 0.0  ;;  %v5290_v55 = vadd.f32 %v5289_v54, %v5144_v61  ;;  %v5358_v52 = vpop.f32.mrf.mxu1 }
 0xa2d   : > { %v5377_v45 = vrot.slane %v5376_v13, 4  ;;  %v5359_v23 = vadd.f32 %v5358_v52, %v5144_v61 }
 0xa2e   : > { %v5383_v19 = vsel %vm1989_vm12, %v5290_v55, 0.0  ;;  %v5360_v43 = vpop.f32.mrf.mxu1 }
 0xa2f   : > { %v5378_v42 = vadd.f32 %v5377_v45, %v5376_v13  ;;  %v5384_v62 = vrot.slane %v5383_v19, 4  ;;  %v5390_v12 = vsel %vm804_vm0, %v5359_v23, 0.0 }
 0xa30   : > { %v5391_v28 = vrot.slane %v5390_v12, 4 }
 0xa31   : > { %v5379_v57 = vrot.slane %v5378_v42, 2  ;;  %v5385_v31 = vadd.f32 %v5384_v62, %v5383_v19 }
 0xa32   : > { %v5392_v18 = vadd.f32 %v5391_v28, %v5390_v12 }
 0xa33   : > { %v5380_v15 = vadd.f32 %v5379_v57, %v5378_v42  ;;  %v5386_v47 = vrot.slane %v5385_v31, 2 }
 0xa34   : > { %v5393_v25 = vrot.slane %v5392_v18, 2 }
 0xa35   : > { %v5900_v6 = vpop.eup %5899  ;;  %v5381_v32 = vrot.slane %v5380_v15, 1  ;;  %v5387_v17 = vadd.f32 %v5386_v47, %v5385_v31 }
 0xa36   : > { %v5462_v51 = vmul.f32 %v5900_v6, %v5402_v58  ;;  %v5394_v61 = vadd.f32 %v5393_v25, %v5392_v18 }
 0xa37   : > { %v5902_v41 = vpop.eup %5901  ;;  %v5382_v24 = vadd.f32 %v5381_v32, %v5380_v15  ;;  %v5388_v39 = vrot.slane %v5387_v17, 1 }
 0xa38   : > { %v5473_v59 = vmul.f32 %v8116_v56, %v5462_v51  ;;  %v5463_v34 = vmul.f32 %v5902_v41, %v5403_v63  ;;  %v5395_v46 = vrot.slane %v5394_v61, 1 }
 0xa39   : > { %v5399_v50 = vmul.f32 0.25, %v5382_v24  ;;  %v5389_v16 = vadd.f32 %v5388_v39, %v5387_v17 }
 0xa3a   : > { %v5484_v27 = vadd.f32 %v8119_v8, %v5473_v59  ;;  %v5474_v11 = vmul.f32 %v8116_v56, %v5463_v34  ;;  %v5396_v29 = vadd.f32 %v5395_v46, %v5394_v61 }
 0xa3b   : > { %v5404_v58 = vsub.f32 %v5288_v30, %v5399_v50  ;;  %v5400_v53 = vmul.f32 0.25, %v5389_v16 }
 0xa3c   : > { %vm5490_vm11 = vcmp.ge.f32.partialorder %v5484_v27, 0.0  ;;  %v5496_v48 = vmul.f32 %v8121_v38, %v5484_v27  ;;  %v5485_v21 = vadd.f32 %v8119_v8, %v5474_v11  ;;  %v5401_v63 = vmul.f32 0.25, %v5396_v29 }
 0xa3d   : > { %v5409_v40 = vmul.f32 %v5404_v58, %v5404_v58  ;;  %v5405_v37 = vsub.f32 %v5290_v55, %v5400_v53 }
 0xa3e   : > { %v5501_v22 = vsel %vm5490_vm11, %v5484_v27, %v5496_v48  ;;  %vm5491_vm10 = vcmp.ge.f32.partialorder %v5485_v21, 0.0  ;;  %v5497_v5 = vmul.f32 %v8121_v38, %v5485_v21  ;;  %v5406_v44 = vsub.f32 %v5359_v23, %v5401_v63  ;;  %v8197_v63 = vld [vmem:[#allocation9_spill] sm:$0xff] }
 0xa3f   : > { %v5506_v14 = vmul.f32 %v5501_v22, %v6359_v3  ;;  %v5426_v26 = vsel %vm1989_vm12, %v5409_v40, 0.0  ;;  %v5410_v49 = vmul.f32 %v5405_v37, %v5405_v37  ;;  %v8198_v22 = vld [vmem:[#allocation10_spill] sm:$0xff] }
 0xa40   : > { %v5502_v9 = vsel %vm5491_vm10, %v5485_v21, %v5497_v5  ;;  %v5427_v1 = vrot.slane %v5426_v26, 4  ;;  %v5411_v0 = vmul.f32 %v5406_v44, %v5406_v44 }
 0xa41   : > { %v5516_v36 = vrot.slane %v5506_v14, 4  ;;  %v5507_v35 = vmul.f32 %v5502_v9, %v6361_v7  ;;  %v5433_v20 = vsel %vm1989_vm12, %v5410_v49, 0.0 }
 0xa42   : > { %v5428_v4 = vadd.f32 %v5427_v1, %v5426_v26  ;;  %v5434_v10 = vrot.slane %v5433_v20, 4  ;;  %v5440_v33 = vsel %vm804_vm0, %v5411_v0, 0.0 }
 0xa43   : > { %5526 = vst [vmem:[#allocation2 + $0x40] sm:$0xf0] %v5516_v36  ;;  %v5517_v2 = vrot.slane %v5507_v35, 4  ;;  %v5441_v60 = vrot.slane %v5440_v33, 4 }
 0xa44   : > { %v5429_v3 = vrot.slane %v5428_v4, 2  ;;  %v5435_v30 = vadd.f32 %v5434_v10, %v5433_v20 }
 0xa45   : > { %5527 = vst [vmem:[#allocation2 + $0x48] sm:$0xf0] %v5517_v2  ;;  %v5442_v54 = vadd.f32 %v5441_v60, %v5440_v33 }
 0xa46   : > { %v5430_v13 = vadd.f32 %v5429_v3, %v5428_v4  ;;  %v5436_v55 = vrot.slane %v5435_v30, 2 }
 0xa47   : > { %v5443_v52 = vrot.slane %v5442_v54, 2 }
 0xa48   : > { %v5431_v45 = vrot.slane %v5430_v13, 1  ;;  %v5437_v7 = vadd.f32 %v5436_v55, %v5435_v30 }
 0xa49   : > { %v5444_v23 = vadd.f32 %v5443_v52, %v5442_v54 }
 0xa4a   : > { %v5536_v19 = vld [vmem:[#allocation2 + $0x40] sm:$0xff]  ;;  %v5432_v43 = vadd.f32 %v5431_v45, %v5430_v13  ;;  %v5438_v42 = vrot.slane %v5437_v7, 1 }
 0xa4b   : > { %5546 = vst [vmem:[%s6590_s1 + $0x28] sm:$0xff] %v5536_v19  ;;  %v5445_v62 = vrot.slane %v5444_v23, 1 }
 0xa4c   : > { %v5537_v12 = vld [vmem:[#allocation2 + $0x48] sm:$0xff]  ;;  %v5449_v28 = vmul.f32 0.25, %v5432_v43  ;;  %v5439_v57 = vadd.f32 %v5438_v42, %v5437_v7 }
 0xa4d   : > { %5547 = vst [vmem:[%s6590_s1 + $0x30] sm:$0xff] %v5537_v12  ;;  %v5446_v31 = vadd.f32 %v5445_v62, %v5444_v23 }
 0xa4e   : > { %v5454_v18 = vadd.f32 1e-05, %v5449_v28  ;;  %v5450_v15 = vmul.f32 0.25, %v5439_v57 }
 0xa4f   : > { %v5451_v47 = vmul.f32 0.25, %v5446_v31 }
 0xa50   : > { %5903 = vrsqrt.f32 %v5454_v18  ;;  %v5455_v25 = vadd.f32 1e-05, %v5450_v15 }
 0xa51   : > { %v5456_v6 = vadd.f32 1e-05, %v5451_v47 }
 0xa52   : > { %5905 = vrsqrt.f32 %v5455_v25 }
 0xa53   : > { %5907 = vrsqrt.f32 %v5456_v6 }
 0xa5d   : > { %v5904_v32 = vpop.eup %5903 }
 0xa5e   : > { %v5464_v17 = vmul.f32 %v5904_v32, %v5404_v58  ;;  %v8196_v58 = vld [vmem:[#allocation8_spill] sm:$0xff] }
 0xa5f   : > { %v5906_v51 = vpop.eup %5905 }
 0xa60   : > { %v5908_v61 = vpop.eup %5907  ;;  %v5475_v41 = vmul.f32 %v8116_v56, %v5464_v17  ;;  %v5465_v24 = vmul.f32 %v5906_v51, %v5405_v37 }
 0xa61   : > { %v5466_v39 = vmul.f32 %v5908_v61, %v5406_v44 }
 0xa62   : > { %v5486_v59 = vadd.f32 %v8119_v8, %v5475_v41  ;;  %v5476_v34 = vmul.f32 %v8116_v56, %v5465_v24 }
 0xa63   : > { %v5477_v46 = vmul.f32 %v8116_v56, %v5466_v39 }
 0xa64   : > { %vm5492_vm0 = vcmp.ge.f32.partialorder %v5486_v59, 0.0  ;;  %v5498_v50 = vmul.f32 %v8121_v38, %v5486_v59  ;;  %v5487_v16 = vadd.f32 %v8119_v8, %v5476_v34 }
 0xa65   : > { %v5488_v27 = vadd.f32 %v8119_v8, %v5477_v46 }
 0xa66   : > { %v5503_v11 = vsel %vm5492_vm0, %v5486_v59, %v5498_v50  ;;  %vm5493_vm12 = vcmp.ge.f32.partialorder %v5487_v16, 0.0  ;;  %v5499_v29 = vmul.f32 %v8121_v38, %v5487_v16 }
 0xa67   : > { %v5508_v53 = vmul.f32 %v5503_v11, %v8196_v58  ;;  %vm5494_vm2 = vcmp.ge.f32.partialorder %v5488_v27, 0.0  ;;  %v5500_v48 = vmul.f32 %v8121_v38, %v5488_v27 }
 0xa68   : > { %v5504_v56 = vsel %vm5493_vm12, %v5487_v16, %v5499_v29 }
 0xa69   : > { %v5518_v21 = vrot.slane %v5508_v53, 4  ;;  %v5509_v40 = vmul.f32 %v5504_v56, %v8197_v63  ;;  %v5505_v37 = vsel %vm5494_vm2, %v5488_v27, %v5500_v48 }
 0xa6a   : > { %v5510_v5 = vmul.f32 %v5505_v37, %v8198_v22 }
 0xa6b   : > { %5528 = vst [vmem:[#allocation2 + $0x50] sm:$0xf0] %v5518_v21  ;;  %v5519_v8 = vrot.slane %v5509_v40, 4 }
 0xa6c   : > { %v5520_v44 = vrot.slane %v5510_v5, 4 }
 0xa6d   : > { %5529 = vst [vmem:[#allocation2 + $0x58] sm:$0xf0] %v5519_v8 }
 0xa6e   : > { %5530 = vst.msk [vmem:[#allocation2 + $0x60] sm:$0xf0] %vm2159_vm4, %v5520_v44 }
 0xa72   : > { %v5538_v14 = vld [vmem:[#allocation2 + $0x50] sm:$0xff] }
 0xa73   : > { %5548 = vst [vmem:[%s6590_s1 + $0x38] sm:$0xff] %v5538_v14 }
 0xa74   : > { %v5539_v26 = vld [vmem:[#allocation2 + $0x58] sm:$0xff] }
 0xa75   : > { %5549 = vst [vmem:[%s6590_s1 + $0x40] sm:$0xff] %v5539_v26  ;;  %v5540_v49 = vld [vmem:[#allocation2 + $0x60] sm:$0xff] }
 0xa76   : > { %5550 = vst.msk [vmem:[%s6590_s1 + $0x48] sm:$0xff] %vm703_vm1, %v5540_v49 }
 0xa77 PF: > { %s32_s2 = sadd.s32 1, %s5938_s2  }
 0xa78   : > { %p29_p1 = scmp.ge.s32.totalorder %s32_s2, 4  }
 0xa7a   :  { %31 = sbr.rel (!%p29_p1) target bundleno = 8 (0x8), region = 139 }
 0xa7f   :  { %5572 = vsyncpa [#allocation6], 1 }
 0xa80   :  { %5574 = vsyncpa [#allocation6 + $0x1], 1 }

</bundles_post_ra>
